<compile_context>
chip_gen: v7x
topology: tpu7x:2x2x1
jax: 0.10.0
libtpu: 0.0.40
codegen_flags: <defaults>
</compile_context>

<pallas_src>
import functools

import numpy as np
import jax
import jax.numpy as jnp
from jax import lax
from jax.experimental import pallas as pl
from jax.experimental.pallas import tpu as pltpu

EPS = 1e-5
KERNEL_SIZE = 7
STRIDE = 3
OUTPUT_DIM = 256
LANE = 128
ROW_ALIGN = 8
MAX_ROW_TILE = 256


def _round_up(x, m):
    return ((x + m - 1) // m) * m


# ----------------------------- Pallas kernel ------------------------------- #
def fused_encoder_kernel(x_ref,
                         m1_ref, st1_ref,
                         m2_ref, st2_ref,
                         m3_ref, st3_ref,
                         wl_ref, bl_ref,
                         o_ref, *, h1, h2, h3):
    """Whole CNNEncoder forward for one tile of batch rows.

    Per conv block:  y = bf16(x) @ M_bf16      (cols ordered [parity][channel][pos])
                     y = relu(y * scale + shift)          # conv bias + BN(eval), f32
                     h = max(y[:, :half], y[:, half:])    # MaxPool1d(2)
    The pooled h is already the channel-major flattened input of the next layer
    (padded lanes are zero).  Finally Linear + ReLU (lane-dense output).
    """
    # TODO(synk): Dropout is eval-mode identity (inference semantics), so it is omitted.
    def conv_bn_relu_pool(h, m_ref, st_ref, half):
        y = jnp.dot(h.astype(jnp.bfloat16), m_ref[...],
                    preferred_element_type=jnp.float32)
        y = jnp.maximum(y * st_ref[0:1, :] + st_ref[1:2, :], 0.0)
        return jnp.maximum(y[:, :half], y[:, half:])

    h = x_ref[...]
    h = conv_bn_relu_pool(h, m1_ref, st1_ref, h1)
    h = conv_bn_relu_pool(h, m2_ref, st2_ref, h2)
    h = conv_bn_relu_pool(h, m3_ref, st3_ref, h3)
    y = jnp.dot(h.astype(jnp.bfloat16), wl_ref[...],
                preferred_element_type=jnp.float32) + bl_ref[...]
    o_ref[...] = jnp.maximum(y, 0.0)


# -------------------- Weight preprocessing (host side) ---------------------- #
def _build_conv_pool_matrix(w, l_in, rows_pad, half_pad):
    """Banded conv->matmul matrix for stride-3 / kernel-7 VALID Conv1d.

    M[ci*l_in + 3*(2m+p) + k, p*half_pad + co*l_half + m] = w[co, ci, k]
    so that  (x_flat @ M)[:, p*half_pad + co*l_half + m] = Conv1d(x)[:, co, 2m+p].
    All other entries (including padded rows/columns) are zero.
    """
    # TODO(synk): layer-1's matrix (Cin=1) is ~99% structural zeros; a
    # band-restricted / 7-tap VPU formulation would cut its MACs and bytes further.
    # Kept dense (but bf16) here for robustness of lowering.
    c_out, c_in, k = w.shape
    l_out = (l_in - k) // STRIDE + 1
    l_half = l_out // 2                           # MaxPool1d(2) output length
    M = np.zeros((rows_pad, 2 * half_pad), np.float32)

    par = np.arange(2).reshape(2, 1, 1, 1, 1)
    co = np.arange(c_out).reshape(1, c_out, 1, 1, 1)
    m = np.arange(l_half).reshape(1, 1, l_half, 1, 1)
    ci = np.arange(c_in).reshape(1, 1, 1, c_in, 1)
    kk = np.arange(k).reshape(1, 1, 1, 1, k)

    rows = ci * l_in + STRIDE * (2 * m + par) + kk
    cols = par * half_pad + co * l_half + m
    vals = w[co, ci, kk]
    shape = (2, c_out, l_half, c_in, k)
    M[np.broadcast_to(rows, shape).ravel(),
      np.broadcast_to(cols, shape).ravel()] = np.broadcast_to(vals, shape).ravel()
    return M, l_half


def prepare_params(params, input_dim):
    """Precompute (once, outside jit) lane-dense banded conv matrices (bf16),
    per-lane packed BN scale/shift (f32) and the padded Linear weight (bf16)."""
    p0 = _round_up(input_dim, LANE)
    l_in, rows_pad = input_dim, p0
    mats, sts = [], []
    for p in params["conv"]:
        w = np.asarray(p["w"], np.float32)
        b = np.asarray(p["b"], np.float32)
        gamma = np.asarray(p["gamma"], np.float32)
        beta = np.asarray(p["beta"], np.float32)
        rmean = np.asarray(p["rmean"], np.float32)
        rvar = np.asarray(p["rvar"], np.float32)
        s_c = gamma / np.sqrt(rvar + EPS)          # per-channel BN scale
        t_c = (b - rmean) * s_c + beta             # conv bias + BN shift, folded

        c_out = w.shape[0]
        l_out = (l_in - KERNEL_SIZE) // STRIDE + 1
        l_half = l_out // 2
        half_pad = _round_up(c_out * l_half, LANE)
        M, _ = _build_conv_pool_matrix(w, l_in, rows_pad, half_pad)

        st = np.zeros((2, 2 * half_pad), np.float32)   # row 0: scale, row 1: shift
        rep_s = np.repeat(s_c, l_half)
        rep_t = np.repeat(t_c, l_half)
        for par in (0, 1):
            st[0, par * half_pad: par * half_pad + c_out * l_half] = rep_s
            st[1, par * half_pad: par * half_pad + c_out * l_half] = rep_t

        mats.append(M)
        sts.append(st)
        l_in, rows_pad = l_half, half_pad

    lw = np.asarray(params["lin_w"], np.float32)   # (OUTPUT_DIM, cnn_out_dim)
    lb = np.asarray(params["lin_b"], np.float32)
    wl = np.zeros((rows_pad, lw.shape[0]), np.float32)
    wl[: lw.shape[1], :] = lw.T                    # padded rows stay zero

    return dict(
        m1=jnp.asarray(mats[0], jnp.bfloat16), st1=jnp.asarray(sts[0]),
        m2=jnp.asarray(mats[1], jnp.bfloat16), st2=jnp.asarray(sts[1]),
        m3=jnp.asarray(mats[2], jnp.bfloat16), st3=jnp.asarray(sts[2]),
        wl=jnp.asarray(wl, jnp.bfloat16), bl=jnp.asarray(lb.reshape(1, -1)),
    )


# ------------------------------- Forward ------------------------------------ #
def _batch_tiling(batch):
    """Row tile in [8, 256], multiple of 8; >=2 grid steps when the batch is big
    enough so the 'parallel' axis can shard across v7x's two TensorCores."""
    if batch <= 16:
        tile = _round_up(max(batch, 1), ROW_ALIGN)
        return tile, tile
    n_tiles = max(2, -(-batch // MAX_ROW_TILE))
    tile = _round_up(-(-batch // n_tiles), ROW_ALIGN)
    return tile, tile * n_tiles


@jax.jit
def cnn_encoder_forward(x, prep):
    """x: (B, input_dim) float32 -> (B, OUTPUT_DIM) float32."""
    if x.ndim > 2:
        x = x.reshape(x.shape[0], -1)
    B = x.shape[0]
    m1, st1 = prep["m1"], prep["st1"]
    m2, st2 = prep["m2"], prep["st2"]
    m3, st3 = prep["m3"], prep["st3"]
    wl, bl = prep["wl"], prep["bl"]

    p0 = m1.shape[0]
    h1, h2, h3 = m1.shape[1] // 2, m2.shape[1] // 2, m3.shape[1] // 2
    out_dim = wl.shape[1]

    row_tile, b_pad = _batch_tiling(B)
    n_tiles = b_pad // row_tile

    # Skip the padding copy when the batch is already tile-aligned and lane-full.
    if B == b_pad and x.shape[1] == p0 and x.dtype == jnp.float32:
        x_pad = x
    else:
        x_pad = jnp.zeros((b_pad, p0), jnp.float32).at[:B, : x.shape[1]].set(
            x.astype(jnp.float32))

    weight_bytes = sum(int(v.size) * v.dtype.itemsize
                       for v in (m1, st1, m2, st2, m3, st3, wl, bl))
    flops = 2 * b_pad * (p0 * 2 * h1 + h1 * 2 * h2 + h2 * 2 * h3 + h3 * out_dim)
    bytes_accessed = weight_bytes + b_pad * p0 * 4 + b_pad * out_dim * 4
    vmem_limit = int(min(max(
        weight_bytes                                   # single-buffered weights
        + 2 * row_tile * (p0 + out_dim) * 4            # double-buffered x / out tiles
        + row_tile * 2 * (h1 + h2 + h3) * 6            # f32 intermediates + bf16 copies
        + (8 << 20),                                   # compiler scratch headroom
        24 << 20), 96 << 20))

    def const_spec(shape):
        # Grid-invariant operand: single-buffer it (constant index_map -> nothing
        # to overlap). Fall back to the default if pipeline_mode is unavailable.
        try:
            return pl.BlockSpec(shape, lambda r: (0, 0),
                                pipeline_mode=pl.Buffered(1))
        except TypeError:
            return pl.BlockSpec(shape, lambda r: (0, 0))

    kernel = functools.partial(fused_encoder_kernel, h1=h1, h2=h2, h3=h3)
    out = pl.pallas_call(
        kernel,
        out_shape=jax.ShapeDtypeStruct((b_pad, out_dim), jnp.float32),
        grid=(n_tiles,),
        in_specs=[
            pl.BlockSpec((row_tile, p0), lambda r: (r, 0)),   # x batch tile
            const_spec((p0, 2 * h1)), const_spec((2, 2 * h1)),   # layer 1
            const_spec((h1, 2 * h2)), const_spec((2, 2 * h2)),   # layer 2
            const_spec((h2, 2 * h3)), const_spec((2, 2 * h3)),   # layer 3
            const_spec((h3, out_dim)), const_spec((1, out_dim)),  # linear
        ],
        out_specs=pl.BlockSpec((row_tile, out_dim), lambda r: (r, 0)),
        compiler_params=pltpu.CompilerParams(
            dimension_semantics=("parallel",),
            vmem_limit_bytes=vmem_limit,
        ),
        cost_estimate=pl.CostEstimate(
            flops=int(flops), transcendentals=0,
            bytes_accessed=int(bytes_accessed)),
    )(x_pad, m1, st1, m2, st2, m3, st3, wl, bl)
    return out[:B]


# --------------------------- Parameter creation ----------------------------- #
def make_params(key, input_dim):
    channels = [(1, 4), (4, 16), (16, 32)]
    conv_params = []
    for c_in, c_out in channels:
        key, kw, kb, kg, kbe, km, kv = jax.random.split(key, 7)
        conv_params.append(dict(
            w=0.1 * jax.random.normal(kw, (c_out, c_in, KERNEL_SIZE), jnp.float32),
            b=0.1 * jax.random.normal(kb, (c_out,), jnp.float32),
            gamma=1.0 + 0.1 * jax.random.normal(kg, (c_out,), jnp.float32),
            beta=0.1 * jax.random.normal(kbe, (c_out,), jnp.float32),
            rmean=0.1 * jax.random.normal(km, (c_out,), jnp.float32),
            rvar=1.0 + 0.1 * jnp.abs(jax.random.normal(kv, (c_out,), jnp.float32)),
        ))

    # Mirror _get_cnn_output_dim
    def conv_out(l): return (l - KERNEL_SIZE) // STRIDE + 1
    def pool_out(l): return (l - 2) // 2 + 1
    l = input_dim
    for _ in range(3):
        l = pool_out(conv_out(l))
    cnn_out_dim = 32 * l

    key, kw, kb = jax.random.split(key, 3)
    lin_w = 0.05 * jax.random.normal(kw, (OUTPUT_DIM, cnn_out_dim), jnp.float32)
    lin_b = 0.05 * jax.random.normal(kb, (OUTPUT_DIM,), jnp.float32)
    return dict(conv=conv_params, lin_w=lin_w, lin_b=lin_b), cnn_out_dim


# ------------------------------ Pure-JAX reference -------------------------- #
def reference_forward(x, params):
    h = x[:, None, :]
    for p in params["conv"]:
        dn = lax.conv_dimension_numbers(h.shape, p["w"].shape, ("NCH", "OIH", "NCH"))
        y = lax.conv_general_dilated(h, p["w"], window_strides=(STRIDE,),
                                     padding="VALID", dimension_numbers=dn)
        y = y + p["b"][None, :, None]
        y = (y - p["rmean"][None, :, None]) / jnp.sqrt(p["rvar"][None, :, None] + EPS)
        y = y * p["gamma"][None, :, None] + p["beta"][None, :, None]
        y = jnp.maximum(y, 0.0)
        B, C, L = y.shape
        lp = L // 2
        h = y[:, :, : 2 * lp].reshape(B, C, lp, 2).max(-1)
    B = h.shape[0]
    hf = h.reshape(B, -1)
    return jnp.maximum(hf @ params["lin_w"].T + params["lin_b"][None, :], 0.0)


# ----------------------------------- Main ----------------------------------- #
if __name__ == "__main__":
    B, INPUT_DIM = 4, 1024
    key = jax.random.PRNGKey(0)
    key, kx = jax.random.split(key)
    x = jax.random.normal(kx, (B, INPUT_DIM), jnp.float32)

    params, cnn_out_dim = make_params(key, INPUT_DIM)
    prep = prepare_params(params, INPUT_DIM)

    out = jax.block_until_ready(cnn_encoder_forward(x, prep))
    ref = reference_forward(x, params)

    assert out.shape == (B, OUTPUT_DIM), out.shape
    max_err = float(jnp.max(jnp.abs(out - ref)))
    # bf16 weights/activations through 4 chained MXU matmuls (f32 accumulation):
    # relaxed-but-meaningful tolerance for the mathematically identical folded form.
    assert jnp.allclose(out, ref, rtol=2e-2, atol=2e-2), max_err

    print("KERNEL_OK")
</pallas_src>

<mosaic_0001>
module attributes {stable_mosaic.version = 11 : i64} {
  func.func @fused_encoder_kernel(%arg0: i32, %arg1: memref<8x1024xf32, #tpu.memory_space<vmem>>, %arg2: memref<1024x1536xbf16, #tpu.memory_space<vmem>>, %arg3: memref<2x1536xf32, #tpu.memory_space<vmem>>, %arg4: memref<768x1024xbf16, #tpu.memory_space<vmem>>, %arg5: memref<2x1024xf32, #tpu.memory_space<vmem>>, %arg6: memref<512x256xbf16, #tpu.memory_space<vmem>>, %arg7: memref<2x256xf32, #tpu.memory_space<vmem>>, %arg8: memref<128x256xbf16, #tpu.memory_space<vmem>>, %arg9: memref<1x256xf32, #tpu.memory_space<vmem>>, %arg10: memref<8x256xf32, #tpu.memory_space<vmem>>) attributes {dimension_semantics = [#tpu.dimension_semantics<parallel>], iteration_bounds = array<i64: 1>, scalar_prefetch = 0 : i64, scratch_operands = 0 : i64, tpu.core_type = #tpu.core_type<tc>, window_params = [{transform_indices = @transform_0, window_bounds = array<i64: 8, 1024>}, {pipeline_mode = #tpu.pipeline_mode<synchronous>, transform_indices = @transform_1, window_bounds = array<i64: 1024, 1536>}, {pipeline_mode = #tpu.pipeline_mode<synchronous>, transform_indices = @transform_2, window_bounds = array<i64: 2, 1536>}, {pipeline_mode = #tpu.pipeline_mode<synchronous>, transform_indices = @transform_3, window_bounds = array<i64: 768, 1024>}, {pipeline_mode = #tpu.pipeline_mode<synchronous>, transform_indices = @transform_4, window_bounds = array<i64: 2, 1024>}, {pipeline_mode = #tpu.pipeline_mode<synchronous>, transform_indices = @transform_5, window_bounds = array<i64: 512, 256>}, {pipeline_mode = #tpu.pipeline_mode<synchronous>, transform_indices = @transform_6, window_bounds = array<i64: 2, 256>}, {pipeline_mode = #tpu.pipeline_mode<synchronous>, transform_indices = @transform_7, window_bounds = array<i64: 128, 256>}, {pipeline_mode = #tpu.pipeline_mode<synchronous>, transform_indices = @transform_8, window_bounds = array<i64: 1, 256>}, {transform_indices = @transform_9, window_bounds = array<i64: 8, 256>}]} {
    %c0 = arith.constant 0 : index
    %c0_0 = arith.constant 0 : index
    %0 = vector.load %arg1[%c0, %c0_0] : memref<8x1024xf32, #tpu.memory_space<vmem>>, vector<8x1024xf32>
    %1 = arith.truncf %0 : vector<8x1024xf32> to vector<8x1024xbf16>
    %c0_1 = arith.constant 0 : index
    %c0_2 = arith.constant 0 : index
    %2 = vector.load %arg2[%c0_1, %c0_2] : memref<1024x1536xbf16, #tpu.memory_space<vmem>>, vector<1024x1536xbf16>
    %cst = arith.constant dense<0.000000e+00> : vector<8x1536xf32>
    %3 = tpu.matmul %1, %2, %cst {dimension_numbers = #tpu.dot_dimension_numbers<[1], [0], [0], [1], [0, 0, 1, 1], [], []>} : vector<8x1024xbf16>, vector<1024x1536xbf16>, vector<8x1536xf32> -> vector<8x1536xf32>
    %c0_3 = arith.constant 0 : index
    %c0_4 = arith.constant 0 : index
    %4 = vector.load %arg3[%c0_3, %c0_4] : memref<2x1536xf32, #tpu.memory_space<vmem>>, vector<1x1536xf32>
    %5 = vector.broadcast %4 : vector<1x1536xf32> to vector<8x1536xf32>
    %6 = arith.mulf %3, %5 : vector<8x1536xf32>
    %c1 = arith.constant 1 : index
    %c0_5 = arith.constant 0 : index
    %7 = vector.load %arg3[%c1, %c0_5] : memref<2x1536xf32, #tpu.memory_space<vmem>>, vector<1x1536xf32>
    %8 = vector.broadcast %7 : vector<1x1536xf32> to vector<8x1536xf32>
    %9 = arith.addf %6, %8 : vector<8x1536xf32>
    %cst_6 = arith.constant 0.000000e+00 : f32
    %10 = vector.broadcast %cst_6 : f32 to vector<8x1536xf32>
    %11 = arith.maximumf %9, %10 : vector<8x1536xf32>
    %12 = vector.extract_strided_slice %11 {offsets = [0, 0], sizes = [8, 768], strides = [1, 1]} : vector<8x1536xf32> to vector<8x768xf32>
    %13 = vector.extract_strided_slice %11 {offsets = [0, 768], sizes = [8, 768], strides = [1, 1]} : vector<8x1536xf32> to vector<8x768xf32>
    %14 = arith.maximumf %12, %13 : vector<8x768xf32>
    %15 = arith.truncf %14 : vector<8x768xf32> to vector<8x768xbf16>
    %c0_7 = arith.constant 0 : index
    %c0_8 = arith.constant 0 : index
    %16 = vector.load %arg4[%c0_7, %c0_8] : memref<768x1024xbf16, #tpu.memory_space<vmem>>, vector<768x1024xbf16>
    %cst_9 = arith.constant dense<0.000000e+00> : vector<8x1024xf32>
    %17 = tpu.matmul %15, %16, %cst_9 {dimension_numbers = #tpu.dot_dimension_numbers<[1], [0], [0], [1], [0, 0, 1, 1], [], []>} : vector<8x768xbf16>, vector<768x1024xbf16>, vector<8x1024xf32> -> vector<8x1024xf32>
    %c0_10 = arith.constant 0 : index
    %c0_11 = arith.constant 0 : index
    %18 = vector.load %arg5[%c0_10, %c0_11] : memref<2x1024xf32, #tpu.memory_space<vmem>>, vector<1x1024xf32>
    %19 = vector.broadcast %18 : vector<1x1024xf32> to vector<8x1024xf32>
    %20 = arith.mulf %17, %19 : vector<8x1024xf32>
    %c1_12 = arith.constant 1 : index
    %c0_13 = arith.constant 0 : index
    %21 = vector.load %arg5[%c1_12, %c0_13] : memref<2x1024xf32, #tpu.memory_space<vmem>>, vector<1x1024xf32>
    %22 = vector.broadcast %21 : vector<1x1024xf32> to vector<8x1024xf32>
    %23 = arith.addf %20, %22 : vector<8x1024xf32>
    %cst_14 = arith.constant 0.000000e+00 : f32
    %24 = vector.broadcast %cst_14 : f32 to vector<8x1024xf32>
    %25 = arith.maximumf %23, %24 : vector<8x1024xf32>
    %26 = vector.extract_strided_slice %25 {offsets = [0, 0], sizes = [8, 512], strides = [1, 1]} : vector<8x1024xf32> to vector<8x512xf32>
    %27 = vector.extract_strided_slice %25 {offsets = [0, 512], sizes = [8, 512], strides = [1, 1]} : vector<8x1024xf32> to vector<8x512xf32>
    %28 = arith.maximumf %26, %27 : vector<8x512xf32>
    %29 = arith.truncf %28 : vector<8x512xf32> to vector<8x512xbf16>
    %c0_15 = arith.constant 0 : index
    %c0_16 = arith.constant 0 : index
    %30 = vector.load %arg6[%c0_15, %c0_16] : memref<512x256xbf16, #tpu.memory_space<vmem>>, vector<512x256xbf16>
    %cst_17 = arith.constant dense<0.000000e+00> : vector<8x256xf32>
    %31 = tpu.matmul %29, %30, %cst_17 {dimension_numbers = #tpu.dot_dimension_numbers<[1], [0], [0], [1], [0, 0, 1, 1], [], []>} : vector<8x512xbf16>, vector<512x256xbf16>, vector<8x256xf32> -> vector<8x256xf32>
    %c0_18 = arith.constant 0 : index
    %c0_19 = arith.constant 0 : index
    %32 = vector.load %arg7[%c0_18, %c0_19] : memref<2x256xf32, #tpu.memory_space<vmem>>, vector<1x256xf32>
    %33 = vector.broadcast %32 : vector<1x256xf32> to vector<8x256xf32>
    %34 = arith.mulf %31, %33 : vector<8x256xf32>
    %c1_20 = arith.constant 1 : index
    %c0_21 = arith.constant 0 : index
    %35 = vector.load %arg7[%c1_20, %c0_21] : memref<2x256xf32, #tpu.memory_space<vmem>>, vector<1x256xf32>
    %36 = vector.broadcast %35 : vector<1x256xf32> to vector<8x256xf32>
    %37 = arith.addf %34, %36 : vector<8x256xf32>
    %cst_22 = arith.constant 0.000000e+00 : f32
    %38 = vector.broadcast %cst_22 : f32 to vector<8x256xf32>
    %39 = arith.maximumf %37, %38 : vector<8x256xf32>
    %40 = vector.extract_strided_slice %39 {offsets = [0, 0], sizes = [8, 128], strides = [1, 1]} : vector<8x256xf32> to vector<8x128xf32>
    %41 = vector.extract_strided_slice %39 {offsets = [0, 128], sizes = [8, 128], strides = [1, 1]} : vector<8x256xf32> to vector<8x128xf32>
    %42 = arith.maximumf %40, %41 : vector<8x128xf32>
    %43 = arith.truncf %42 : vector<8x128xf32> to vector<8x128xbf16>
    %c0_23 = arith.constant 0 : index
    %c0_24 = arith.constant 0 : index
    %44 = vector.load %arg8[%c0_23, %c0_24] : memref<128x256xbf16, #tpu.memory_space<vmem>>, vector<128x256xbf16>
    %cst_25 = arith.constant dense<0.000000e+00> : vector<8x256xf32>
    %45 = tpu.matmul %43, %44, %cst_25 {dimension_numbers = #tpu.dot_dimension_numbers<[1], [0], [0], [1], [0, 0, 1, 1], [], []>} : vector<8x128xbf16>, vector<128x256xbf16>, vector<8x256xf32> -> vector<8x256xf32>
    %c0_26 = arith.constant 0 : index
    %c0_27 = arith.constant 0 : index
    %46 = vector.load %arg9[%c0_26, %c0_27] : memref<1x256xf32, #tpu.memory_space<vmem>>, vector<1x256xf32>
    %47 = vector.broadcast %46 : vector<1x256xf32> to vector<8x256xf32>
    %48 = arith.addf %45, %47 : vector<8x256xf32>
    %cst_28 = arith.constant 0.000000e+00 : f32
    %49 = vector.broadcast %cst_28 : f32 to vector<8x256xf32>
    %50 = arith.maximumf %48, %49 : vector<8x256xf32>
    %c0_29 = arith.constant 0 : index
    %c0_30 = arith.constant 0 : index
    %51 = vector.load %arg10[%c0_29, %c0_30] : memref<8x256xf32, #tpu.memory_space<vmem>>, vector<8x256xf32>
    tpu.vector_store %arg10[%c0_29, %c0_30], %50 {strides = array<i32>} : memref<8x256xf32, #tpu.memory_space<vmem>>, vector<8x256xf32>,
    return
  }
  func.func @transform_0(%arg0: i32) -> (i32, i32) {
    %c0_i32 = arith.constant 0 : i32
    %c0_i32_0 = arith.constant 0 : i32
    return %arg0, %c0_i32 : i32, i32
  }
  func.func @transform_1(%arg0: i32) -> (i32, i32) {
    %c0_i32 = arith.constant 0 : i32
    %c0_i32_0 = arith.constant 0 : i32
    %c0_i32_1 = arith.constant 0 : i32
    return %c0_i32, %c0_i32_0 : i32, i32
  }
  func.func @transform_2(%arg0: i32) -> (i32, i32) {
    %c0_i32 = arith.constant 0 : i32
    %c0_i32_0 = arith.constant 0 : i32
    %c0_i32_1 = arith.constant 0 : i32
    return %c0_i32, %c0_i32_0 : i32, i32
  }
  func.func @transform_3(%arg0: i32) -> (i32, i32) {
    %c0_i32 = arith.constant 0 : i32
    %c0_i32_0 = arith.constant 0 : i32
    %c0_i32_1 = arith.constant 0 : i32
    return %c0_i32, %c0_i32_0 : i32, i32
  }
  func.func @transform_4(%arg0: i32) -> (i32, i32) {
    %c0_i32 = arith.constant 0 : i32
    %c0_i32_0 = arith.constant 0 : i32
    %c0_i32_1 = arith.constant 0 : i32
    return %c0_i32, %c0_i32_0 : i32, i32
  }
  func.func @transform_5(%arg0: i32) -> (i32, i32) {
    %c0_i32 = arith.constant 0 : i32
    %c0_i32_0 = arith.constant 0 : i32
    %c0_i32_1 = arith.constant 0 : i32
    return %c0_i32, %c0_i32_0 : i32, i32
  }
  func.func @transform_6(%arg0: i32) -> (i32, i32) {
    %c0_i32 = arith.constant 0 : i32
    %c0_i32_0 = arith.constant 0 : i32
    %c0_i32_1 = arith.constant 0 : i32
    return %c0_i32, %c0_i32_0 : i32, i32
  }
  func.func @transform_7(%arg0: i32) -> (i32, i32) {
    %c0_i32 = arith.constant 0 : i32
    %c0_i32_0 = arith.constant 0 : i32
    %c0_i32_1 = arith.constant 0 : i32
    return %c0_i32, %c0_i32_0 : i32, i32
  }
  func.func @transform_8(%arg0: i32) -> (i32, i32) {
    %c0_i32 = arith.constant 0 : i32
    %c0_i32_0 = arith.constant 0 : i32
    %c0_i32_1 = arith.constant 0 : i32
    return %c0_i32, %c0_i32_0 : i32, i32
  }
  func.func @transform_9(%arg0: i32) -> (i32, i32) {
    %c0_i32 = arith.constant 0 : i32
    %c0_i32_0 = arith.constant 0 : i32
    return %arg0, %c0_i32 : i32, i32
  }
}

</mosaic_0001>

<bundles_post_ra>
// kernel: cnn_encoder_forward.1
= control target key start
LH: loop header
LB: loop body
LE: loop exit
PB: predicated region body
PF: predicated region fallthrough
CT: control target
= control target key end

     0   :  { %14 = vsyncpa [#allocation3], 0  ;;  %s12776_s0 = inlined_call_operand.vmem [shape: f32[8,1024], index: 0, kind: input, shape index: {}]   ;;  %s12777_s1 = inlined_call_operand.hbm [shape: bf16[1024,1536], index: 1, kind: input, shape index: {}]   ;;  %s12778_s2 = inlined_call_operand.hbm [shape: f32[2,1536], index: 2, kind: input, shape index: {}]   ;;  %s12779_s3 = inlined_call_operand.hbm [shape: bf16[768,1024], index: 3, kind: input, shape index: {}]   ;;  %s12780_s4 = inlined_call_operand.hbm [shape: f32[2,1024], index: 4, kind: input, shape index: {}]   ;;  %s12781_s5 = inlined_call_operand.hbm [shape: bf16[512,256], index: 5, kind: input, shape index: {}]   ;;  %s12782_s6 = inlined_call_operand.hbm [shape: f32[2,256], index: 6, kind: input, shape index: {}]   ;;  %s12783_s7 = inlined_call_operand.hbm [shape: bf16[128,256], index: 7, kind: input, shape index: {}]   ;;  %s12784_s8 = inlined_call_operand.hbm [shape: f32[1,256], index: 8, kind: input, shape index: {}]   ;;  %s12785_s9 = inlined_call_operand.vmem [shape: f32[8,256], index: 9, kind: output, shape index: {}]  }
   0x1   :  { %15 = vsyncpa [#allocation5], 0 }
   0x2   :  { %16 = vsyncpa [#allocation8], 0 }
   0x3   :  { %17 = vsyncpa [#allocation11], 0 }
   0x4   :  { %18 = vsyncpa [#allocation14], 0  ;;  %s12308_s30 = smov [#allocation4]   ;;  %s12309_s11 = smov [#allocation7]  }
   0x5   :  { %s39_s10 = sshll.u32 %s12308_s30, 4  ;;  %s61_s12 = sshll.u32 %s12309_s11, 4  ;;  %s40_s10 = int_to_ptr.vmem [resolvable:$true] %s39_s10  ;;  %s62_s12 = int_to_ptr.vmem [resolvable:$true] %s61_s12 }
   0x6   :  { %s12122_s15 = scalar_lea.hbm %s12778_s2, 384 }
   0x7   :  { %p12123_p0 = scmp.ne.s32.totalorder %s12778_s2, %s12122_s15  ;;  %p12126_p1 = scmp.lt.u32.totalorder %s12122_s15, %s12778_s2 }
   0x9   :  { %p12128_p2 = pnand %p12126_p1, %p12123_p0 }
   0xb   :  { %12131 = shalt.err (!%p12128_p2)
}
   0xc   :  { %s12132_s20 = scalar_lea.vmem %s40_s10, 384  ;;  %p12137_p4 = scmp.lt.s32.totalorder %s40_s10, %s40_s10 }
   0xd   :  { %p12133_p3 = scmp.ne.s32.totalorder %s40_s10, %s12132_s20  ;;  %p12138_p5 = scmp.lt.s32.totalorder %s12132_s20, %s12132_s20 }
   0xf   :  { %p12139_p6 = por %p12138_p5, %p12137_p4 }
  0x11   :  { %p12140_p7 = pnand %p12139_p6, %p12133_p3 }
  0x13   :  { %12143 = shalt.err (!%p12140_p7)
}
  0x14   :  { %42 = dma.hbm_to_vmem [thread:$0]  %s12778_s2, 384, %s40_s10, [#allocation5]  }
  0x15   :  { %s12144_s25 = scalar_lea.hbm %s12780_s4, 256 }
  0x16   :  { %p12145_p8 = scmp.ne.s32.totalorder %s12780_s4, %s12144_s25  ;;  %p12148_p9 = scmp.lt.u32.totalorder %s12144_s25, %s12780_s4 }
  0x18   :  { %p12150_p10 = pnand %p12148_p9, %p12145_p8 }
  0x1a   :  { %12153 = shalt.err (!%p12150_p10)
}
  0x1b   :  { %s12154_s30 = scalar_lea.vmem %s62_s12, 256  ;;  %p12159_p12 = scmp.lt.s32.totalorder %s62_s12, %s62_s12 }
  0x1c   :  { %p12155_p11 = scmp.ne.s32.totalorder %s62_s12, %s12154_s30  ;;  %p12160_p13 = scmp.lt.s32.totalorder %s12154_s30, %s12154_s30 }
  0x1e   :  { %p12161_p0 = por %p12160_p13, %p12159_p12 }
  0x20   :  { %p12162_p1 = pnand %p12161_p0, %p12155_p11 }
  0x22   :  { %12165 = shalt.err (!%p12162_p1)
}
  0x23   :  { %64 = dma.hbm_to_vmem [thread:$0]  %s12780_s4, 256, %s62_s12, [#allocation8]  }
  0x24   :  { %s12310_s11 = smov [#allocation10]   ;;  %s12311_s14 = smov [#allocation2]  }
  0x25   :  { %s83_s13 = sshll.u32 %s12310_s11, 4  ;;  %s26_s15 = sshll.u32 %s12311_s14, 4  ;;  %s84_s13 = int_to_ptr.vmem [resolvable:$true] %s83_s13  ;;  %s12397_s15 = int_to_ptr.vmem [resolvable:$true] %s26_s15 }
  0x26   :  { %s12166_s18 = scalar_lea.hbm %s12782_s6, 64 }
  0x27   :  { %p12167_p2 = scmp.ne.s32.totalorder %s12782_s6, %s12166_s18  ;;  %p12170_p3 = scmp.lt.u32.totalorder %s12166_s18, %s12782_s6 }
  0x29   :  { %p12172_p4 = pnand %p12170_p3, %p12167_p2 }
  0x2b   :  { %12175 = shalt.err (!%p12172_p4)
}
  0x2c   :  { %s12176_s4 = scalar_lea.vmem %s84_s13, 64  ;;  %p12181_p6 = scmp.lt.s32.totalorder %s84_s13, %s84_s13 }
  0x2d   :  { %p12177_p5 = scmp.ne.s32.totalorder %s84_s13, %s12176_s4  ;;  %p12182_p7 = scmp.lt.s32.totalorder %s12176_s4, %s12176_s4 }
  0x2f   :  { %p12183_p8 = por %p12182_p7, %p12181_p6 }
  0x31   :  { %p12184_p9 = pnand %p12183_p8, %p12177_p5 }
  0x33   :  { %12187 = shalt.err (!%p12184_p9)
}
  0x34   :  { %86 = dma.hbm_to_vmem [thread:$0]  %s12782_s6, 64, %s84_s13, [#allocation11]  }
  0x35   :  { %s12188_s26 = scalar_lea.hbm %s12777_s1, 98304 }
  0x36   :  { %p12189_p10 = scmp.ne.s32.totalorder %s12777_s1, %s12188_s26  ;;  %p12192_p11 = scmp.lt.u32.totalorder %s12188_s26, %s12777_s1 }
  0x38   :  { %p12194_p12 = pnand %p12192_p11, %p12189_p10 }
  0x3a   :  { %12197 = shalt.err (!%p12194_p12)
}
  0x3b   :  { %s12198_s2 = scalar_lea.vmem %s12397_s15, 98304  ;;  %p12203_p0 = scmp.lt.s32.totalorder %s12397_s15, %s12397_s15 }
  0x3c   :  { %p12199_p13 = scmp.ne.s32.totalorder %s12397_s15, %s12198_s2  ;;  %p12204_p1 = scmp.lt.s32.totalorder %s12198_s2, %s12198_s2 }
  0x3e   :  { %p12205_p2 = por %p12204_p1, %p12203_p0 }
  0x40   :  { %p12206_p3 = pnand %p12205_p2, %p12199_p13 }
  0x42   :  { %12209 = shalt.err (!%p12206_p3)
}
  0x43   :  { %s12312_s6 = smov 768   ;;  %s12313_s10 = smov 48  }
  0x44   :  { %32 = dma.hbm_to_vmem [thread:$0]  %s12777_s1, 98304, %s12397_s15, [#allocation3], %s12312_s6, %s12312_s6, %s12313_s10  }
  0x45   :  { %s12314_s14 = smov [#allocation6]   ;;  %s12210_s19 = scalar_lea.hbm %s12779_s3, 49152 }
  0x46   :  { %s48_s16 = sshll.u32 %s12314_s14, 4  ;;  %p12211_p4 = scmp.ne.s32.totalorder %s12779_s3, %s12210_s19  ;;  %s49_s16 = int_to_ptr.vmem [resolvable:$true] %s48_s16 }
  0x47   :  { %p12214_p5 = scmp.lt.u32.totalorder %s12210_s19, %s12779_s3 }
  0x49   :  { %p12216_p6 = pnand %p12214_p5, %p12211_p4 }
  0x4b   :  { %12219 = shalt.err (!%p12216_p6)
}
  0x4c   :  { %s12220_s12 = scalar_lea.vmem %s49_s16, 49152  ;;  %p12225_p8 = scmp.lt.s32.totalorder %s49_s16, %s49_s16 }
  0x4d   :  { %p12221_p7 = scmp.ne.s32.totalorder %s49_s16, %s12220_s12  ;;  %p12226_p9 = scmp.lt.s32.totalorder %s12220_s12, %s12220_s12 }
  0x4f   :  { %p12227_p10 = por %p12226_p9, %p12225_p8 }
  0x51   :  { %p12228_p11 = pnand %p12227_p10, %p12221_p7 }
  0x53   :  { %12231 = shalt.err (!%p12228_p11)
}
  0x54   :  { %s12315_s1 = smov 512   ;;  %s12316_s15 = smov 32  }
  0x55   :  { %54 = dma.hbm_to_vmem [thread:$0]  %s12779_s3, 49152, %s49_s16, [#allocation5], %s12315_s1, %s12315_s1, %s12316_s15  }
  0x56   :  { %s12317_s25 = smov [#allocation9]   ;;  %s12232_s29 = scalar_lea.hbm %s12781_s5, 8192 }
  0x57   :  { %s70_s26 = sshll.u32 %s12317_s25, 4  ;;  %p12233_p12 = scmp.ne.s32.totalorder %s12781_s5, %s12232_s29  ;;  %s71_s26 = int_to_ptr.vmem [resolvable:$true] %s70_s26 }
  0x58   :  { %p12236_p13 = scmp.lt.u32.totalorder %s12232_s29, %s12781_s5 }
  0x5a   :  { %p12238_p0 = pnand %p12236_p13, %p12233_p12 }
  0x5c   :  { %12241 = shalt.err (!%p12238_p0)
}
  0x5d   :  { %s12242_s11 = scalar_lea.vmem %s71_s26, 8192  ;;  %p12247_p2 = scmp.lt.s32.totalorder %s71_s26, %s71_s26 }
  0x5e   :  { %p12243_p1 = scmp.ne.s32.totalorder %s71_s26, %s12242_s11  ;;  %p12248_p3 = scmp.lt.s32.totalorder %s12242_s11, %s12242_s11 }
  0x60   :  { %p12249_p4 = por %p12248_p3, %p12247_p2 }
  0x62   :  { %p12250_p5 = pnand %p12249_p4, %p12243_p1 }
  0x64   :  { %12253 = shalt.err (!%p12250_p5)
}
  0x65   :  { %s12318_s3 = smov 128   ;;  %s12319_s13 = smov 8  }
  0x66   :  { %76 = dma.hbm_to_vmem [thread:$0]  %s12781_s5, 8192, %s71_s26, [#allocation8], %s12318_s3, %s12318_s3, %s12319_s13  }
  0x67   :  { %s12320_s17 = smov [#allocation12]   ;;  %s12321_s19 = smov [#allocation13]  }
  0x68   :  { %s92_s18 = sshll.u32 %s12320_s17, 4  ;;  %s105_s20 = sshll.u32 %s12321_s19, 4  ;;  %s93_s18 = int_to_ptr.vmem [resolvable:$true] %s92_s18  ;;  %s106_s20 = int_to_ptr.vmem [resolvable:$true] %s105_s20 }
  0x69   :  { %s12254_s4 = scalar_lea.hbm %s12783_s7, 2048 }
  0x6a   :  { %p12255_p6 = scmp.ne.s32.totalorder %s12783_s7, %s12254_s4  ;;  %p12258_p7 = scmp.lt.u32.totalorder %s12254_s4, %s12783_s7 }
  0x6c   :  { %p12260_p8 = pnand %p12258_p7, %p12255_p6 }
  0x6e   :  { %12263 = shalt.err (!%p12260_p8)
}
  0x6f   :  { %s12264_s5 = scalar_lea.vmem %s93_s18, 2048  ;;  %p12269_p10 = scmp.lt.s32.totalorder %s93_s18, %s93_s18 }
  0x70   :  { %p12265_p9 = scmp.ne.s32.totalorder %s93_s18, %s12264_s5  ;;  %p12270_p11 = scmp.lt.s32.totalorder %s12264_s5, %s12264_s5 }
  0x72   :  { %p12271_p12 = por %p12270_p11, %p12269_p10 }
  0x74   :  { %p12272_p13 = pnand %p12271_p12, %p12265_p9 }
  0x76   :  { %12275 = shalt.err (!%p12272_p13)
}
  0x77   :  { %98 = dma.hbm_to_vmem [thread:$0]  %s12783_s7, 2048, %s93_s18, [#allocation11], %s12318_s3, %s12318_s3, %s12319_s13  }
  0x78   :  { %s12276_s28 = scalar_lea.hbm %s12784_s8, 32 }
  0x79   :  { %p12277_p0 = scmp.ne.s32.totalorder %s12784_s8, %s12276_s28  ;;  %p12280_p1 = scmp.lt.u32.totalorder %s12276_s28, %s12784_s8 }
  0x7b   :  { %p12282_p2 = pnand %p12280_p1, %p12277_p0 }
  0x7d   :  { %12285 = shalt.err (!%p12282_p2)
}
  0x7e   :  { %s12286_s10 = scalar_lea.vmem %s106_s20, 32  ;;  %p12291_p4 = scmp.lt.s32.totalorder %s106_s20, %s106_s20 }
  0x7f   :  { %p12287_p3 = scmp.ne.s32.totalorder %s106_s20, %s12286_s10  ;;  %p12292_p5 = scmp.lt.s32.totalorder %s12286_s10, %s12286_s10 }
  0x81   :  { %p12293_p6 = por %p12292_p5, %p12291_p4 }
  0x83   :  { %p12294_p7 = pnand %p12293_p6, %p12287_p3 }
  0x85   :  { %12297 = shalt.err (!%p12294_p7)
}
  0x86   :  { %108 = dma.hbm_to_vmem [thread:$0]  %s12784_s8, 32, %s106_s20, [#allocation14]  }
  0x87   :  { %12298 = dma.done.wait [#allocation3], 98304  }
  0x88   :  { %12299 = vsyncadd [#allocation3], 4294868992 }
  0x89   :  { %12300 = dma.done.wait [#allocation5], 49536  }
  0x8a   :  { %12301 = vsyncadd [#allocation5], 4294917760 }
  0x8b   :  { %12302 = dma.done.wait [#allocation8], 8448  }
  0x8c   :  { %12303 = vsyncadd [#allocation8], 4294958848 }
  0x8d   :  { %12304 = dma.done.wait [#allocation11], 2112  }
  0x8e   :  { %12305 = vsyncadd [#allocation11], 4294965184 }
  0x8f   :  { %12306 = dma.done.wait [#allocation14], 32  }
  0x90   :  { %12307 = vsyncadd [#allocation14], 4294967264  ;;  %v10848_v0 = vld [vmem:[#allocation2 + $0x4] ss:$48 sps:$4 sm:$0xff]   ;;  %v10852_v2 = vld [vmem:[#allocation2] ss:$48 sps:$4 sm:$0xff]  }
  0x91   :  { %v10850_v1 = vld [vmem:[#allocation2 + $0x604] ss:$48 sps:$4 sm:$0xff]   ;;  %4758 = vmatprep.subr.bf16.mxu1 %v10848_v0  ;;  %v10853_v3 = vld [vmem:[#allocation2 + $0x600] ss:$48 sps:$4 sm:$0xff]   ;;  %v135_v46 = vld [vmem:[%s12776_s0 + $0x8] sm:$0xff] }
  0x92   :  { %4799 = vmatprep.subr.bf16.mxu0 %v10850_v1  ;;  %v10854_v4 = vld [vmem:[#allocation2 + $0x64] ss:$48 sps:$4 sm:$0xff]   ;;  %4759 = vmatpush1.bf16.msra.mxu1 %v10852_v2  ;;  %v10858_v6 = vld [vmem:[#allocation2 + $0x60] ss:$48 sps:$4 sm:$0xff]   ;;  %v12479_v48 = vpack.c.bf16 %v135_v46, %v135_v46  ;;  %v137_v49 = vld [vmem:[%s12776_s0 + $0x18] sm:$0xff] }
  0x93   :  { %4800 = vmatpush1.bf16.msra.mxu0 %v10853_v3  ;;  %v10856_v5 = vld [vmem:[#allocation2 + $0x664] ss:$48 sps:$4 sm:$0xff]   ;;  %4760 = vmatprep.subr.bf16.mxu1 %v10854_v4  ;;  %v10859_v7 = vld [vmem:[#allocation2 + $0x660] ss:$48 sps:$4 sm:$0xff]   ;;  %v12484_v52 = vpack.c.bf16 %v137_v49, %v137_v49 }
  0x94   :  { %4801 = vmatprep.subr.bf16.mxu0 %v10856_v5  ;;  %v10860_v8 = vld [vmem:[#allocation2 + $0xc4] ss:$48 sps:$4 sm:$0xff]   ;;  %v10864_v10 = vld [vmem:[#allocation2 + $0xc0] ss:$48 sps:$4 sm:$0xff]   ;;  %4790 = vmatprep.mubr.bf16.mxu1 %v12479_v48 }
  0x95   :  { %v10862_v9 = vld [vmem:[#allocation2 + $0x6c4] ss:$48 sps:$4 sm:$0xff]   ;;  %v10865_v11 = vld [vmem:[#allocation2 + $0x6c0] ss:$48 sps:$4 sm:$0xff]   ;;  %4831 = vmatprep.mubr.bf16.mxu0 %v12484_v52 }
  0x96   :  { %4761 = vmatpush1.bf16.msra.mxu1 %v10858_v6  ;;  %v10866_v12 = vld [vmem:[#allocation2 + $0x124] ss:$48 sps:$4 sm:$0xff]   ;;  %v10870_v14 = vld [vmem:[#allocation2 + $0x120] ss:$48 sps:$4 sm:$0xff]  }
  0x97   :  { %4802 = vmatpush1.bf16.msra.mxu0 %v10859_v7  ;;  %4762 = vmatprep.subr.bf16.mxu1 %v10860_v8  ;;  %v10868_v13 = vld [vmem:[#allocation2 + $0x724] ss:$48 sps:$4 sm:$0xff]   ;;  %v10871_v15 = vld [vmem:[#allocation2 + $0x720] ss:$48 sps:$4 sm:$0xff]   ;;  %v10949_v7 = vld [vmem:[#allocation2 + $0xc] ss:$48 sps:$4 sm:$0xff]  }
  0x98   :  { %4803 = vmatprep.subr.bf16.mxu0 %v10862_v9  ;;  %v10872_v16 = vld [vmem:[#allocation2 + $0x184] ss:$48 sps:$4 sm:$0xff]   ;;  %v10876_v18 = vld [vmem:[#allocation2 + $0x180] ss:$48 sps:$4 sm:$0xff]  }
  0x99   :  { %v10874_v17 = vld [vmem:[#allocation2 + $0x784] ss:$48 sps:$4 sm:$0xff]   ;;  %v10877_v19 = vld [vmem:[#allocation2 + $0x780] ss:$48 sps:$4 sm:$0xff]  }
  0x9a   :  { %4763 = vmatpush1.bf16.msra.mxu1 %v10864_v10  ;;  %v10878_v20 = vld [vmem:[#allocation2 + $0x1e4] ss:$48 sps:$4 sm:$0xff]   ;;  %v10882_v22 = vld [vmem:[#allocation2 + $0x1e0] ss:$48 sps:$4 sm:$0xff]   ;;  %v10947_v10 = vld [vmem:[#allocation2 + $0x8] ss:$48 sps:$4 sm:$0xff]  }
  0x9b   :  { %4804 = vmatpush1.bf16.msra.mxu0 %v10865_v11  ;;  %4764 = vmatprep.subr.bf16.mxu1 %v10866_v12  ;;  %v10880_v21 = vld [vmem:[#allocation2 + $0x7e4] ss:$48 sps:$4 sm:$0xff]   ;;  %v10883_v23 = vld [vmem:[#allocation2 + $0x7e0] ss:$48 sps:$4 sm:$0xff]  }
  0x9c   :  { %4805 = vmatprep.subr.bf16.mxu0 %v10868_v13  ;;  %v10884_v24 = vld [vmem:[#allocation2 + $0x244] ss:$48 sps:$4 sm:$0xff]   ;;  %v10888_v26 = vld [vmem:[#allocation2 + $0x240] ss:$48 sps:$4 sm:$0xff]   ;;  %v10955_v13 = vld [vmem:[#allocation2 + $0x6c] ss:$48 sps:$4 sm:$0xff]  }
  0x9d   :  { %v10886_v25 = vld [vmem:[#allocation2 + $0x844] ss:$48 sps:$4 sm:$0xff]   ;;  %v10889_v27 = vld [vmem:[#allocation2 + $0x840] ss:$48 sps:$4 sm:$0xff]  }
  0x9e   :  { %4765 = vmatpush1.bf16.msra.mxu1 %v10870_v14  ;;  %v10890_v28 = vld [vmem:[#allocation2 + $0x2a4] ss:$48 sps:$4 sm:$0xff]   ;;  %v10894_v30 = vld [vmem:[#allocation2 + $0x2a0] ss:$48 sps:$4 sm:$0xff]  }
  0x9f   :  { %4806 = vmatpush1.bf16.msra.mxu0 %v10871_v15  ;;  %4766 = vmatprep.subr.bf16.mxu1 %v10872_v16  ;;  %v10892_v29 = vld [vmem:[#allocation2 + $0x8a4] ss:$48 sps:$4 sm:$0xff]   ;;  %v10895_v31 = vld [vmem:[#allocation2 + $0x8a0] ss:$48 sps:$4 sm:$0xff]   ;;  %v10953_v15 = vld [vmem:[#allocation2 + $0x68] ss:$48 sps:$4 sm:$0xff]  }
  0xa0   :  { %4807 = vmatprep.subr.bf16.mxu0 %v10874_v17  ;;  %v10896_v32 = vld [vmem:[#allocation2 + $0x304] ss:$48 sps:$4 sm:$0xff]   ;;  %v10900_v34 = vld [vmem:[#allocation2 + $0x300] ss:$48 sps:$4 sm:$0xff]   ;;  %v10961_v17 = vld [vmem:[#allocation2 + $0xcc] ss:$48 sps:$4 sm:$0xff]  }
  0xa1   :  { %v10898_v33 = vld [vmem:[#allocation2 + $0x904] ss:$48 sps:$4 sm:$0xff]   ;;  %v10901_v35 = vld [vmem:[#allocation2 + $0x900] ss:$48 sps:$4 sm:$0xff]  }
  0xa2   :  { %4767 = vmatpush1.bf16.msra.mxu1 %v10876_v18  ;;  %v10902_v36 = vld [vmem:[#allocation2 + $0x364] ss:$48 sps:$4 sm:$0xff]   ;;  %v10906_v38 = vld [vmem:[#allocation2 + $0x360] ss:$48 sps:$4 sm:$0xff]  }
  0xa3   :  { %4808 = vmatpush1.bf16.msra.mxu0 %v10877_v19  ;;  %4768 = vmatprep.subr.bf16.mxu1 %v10878_v20  ;;  %v10904_v37 = vld [vmem:[#allocation2 + $0x964] ss:$48 sps:$4 sm:$0xff]   ;;  %v10907_v39 = vld [vmem:[#allocation2 + $0x960] ss:$48 sps:$4 sm:$0xff]   ;;  %v10959_v19 = vld [vmem:[#allocation2 + $0xc8] ss:$48 sps:$4 sm:$0xff]  }
  0xa4   :  { %4809 = vmatprep.subr.bf16.mxu0 %v10880_v21  ;;  %v10908_v40 = vld [vmem:[#allocation2 + $0x3c4] ss:$48 sps:$4 sm:$0xff]   ;;  %v10912_v42 = vld [vmem:[#allocation2 + $0x3c0] ss:$48 sps:$4 sm:$0xff]   ;;  %v10967_v21 = vld [vmem:[#allocation2 + $0x12c] ss:$48 sps:$4 sm:$0xff]  }
  0xa5   :  { %v10910_v41 = vld [vmem:[#allocation2 + $0x9c4] ss:$48 sps:$4 sm:$0xff]   ;;  %v10913_v43 = vld [vmem:[#allocation2 + $0x9c0] ss:$48 sps:$4 sm:$0xff]  }
  0xa6   :  { %4769 = vmatpush1.bf16.msra.mxu1 %v10882_v22  ;;  %v10914_v44 = vld [vmem:[#allocation2 + $0x424] ss:$48 sps:$4 sm:$0xff]   ;;  %v10918_v47 = vld [vmem:[#allocation2 + $0x420] ss:$48 sps:$4 sm:$0xff]  }
  0xa7   :  { %4810 = vmatpush1.bf16.msra.mxu0 %v10883_v23  ;;  %4770 = vmatprep.subr.bf16.mxu1 %v10884_v24  ;;  %v10916_v45 = vld [vmem:[#allocation2 + $0xa24] ss:$48 sps:$4 sm:$0xff]   ;;  %v10919_v50 = vld [vmem:[#allocation2 + $0xa20] ss:$48 sps:$4 sm:$0xff]   ;;  %v10965_v23 = vld [vmem:[#allocation2 + $0x128] ss:$48 sps:$4 sm:$0xff]  }
  0xa8   :  { %4811 = vmatprep.subr.bf16.mxu0 %v10886_v25  ;;  %v10920_v51 = vld [vmem:[#allocation2 + $0x484] ss:$48 sps:$4 sm:$0xff]   ;;  %v10924_v54 = vld [vmem:[#allocation2 + $0x480] ss:$48 sps:$4 sm:$0xff]   ;;  %v10973_v25 = vld [vmem:[#allocation2 + $0x18c] ss:$48 sps:$4 sm:$0xff]  }
  0xa9   :  { %v10922_v53 = vld [vmem:[#allocation2 + $0xa84] ss:$48 sps:$4 sm:$0xff]   ;;  %v10925_v55 = vld [vmem:[#allocation2 + $0xa80] ss:$48 sps:$4 sm:$0xff]  }
  0xaa   :  { %4771 = vmatpush1.bf16.msra.mxu1 %v10888_v26  ;;  %v10926_v56 = vld [vmem:[#allocation2 + $0x4e4] ss:$48 sps:$4 sm:$0xff]   ;;  %v10930_v58 = vld [vmem:[#allocation2 + $0x4e0] ss:$48 sps:$4 sm:$0xff]  }
  0xab   :  { %4812 = vmatpush1.bf16.msra.mxu0 %v10889_v27  ;;  %4772 = vmatprep.subr.bf16.mxu1 %v10890_v28  ;;  %v10928_v57 = vld [vmem:[#allocation2 + $0xae4] ss:$48 sps:$4 sm:$0xff]   ;;  %v10931_v59 = vld [vmem:[#allocation2 + $0xae0] ss:$48 sps:$4 sm:$0xff]   ;;  %v10971_v27 = vld [vmem:[#allocation2 + $0x188] ss:$48 sps:$4 sm:$0xff]  }
  0xac   :  { %4813 = vmatprep.subr.bf16.mxu0 %v10892_v29  ;;  %v10932_v60 = vld [vmem:[#allocation2 + $0x544] ss:$48 sps:$4 sm:$0xff]   ;;  %v10936_v62 = vld [vmem:[#allocation2 + $0x540] ss:$48 sps:$4 sm:$0xff]   ;;  %v10979_v29 = vld [vmem:[#allocation2 + $0x1ec] ss:$48 sps:$4 sm:$0xff]  }
  0xad   :  { %v10934_v61 = vld [vmem:[#allocation2 + $0xb44] ss:$48 sps:$4 sm:$0xff]   ;;  %v10937_v63 = vld [vmem:[#allocation2 + $0xb40] ss:$48 sps:$4 sm:$0xff]  }
  0xae   :  { %4773 = vmatpush1.bf16.msra.mxu1 %v10894_v30  ;;  %v10938_v0 = vld [vmem:[#allocation2 + $0x5a4] ss:$48 sps:$4 sm:$0xff]   ;;  %v10942_v2 = vld [vmem:[#allocation2 + $0x5a0] ss:$48 sps:$4 sm:$0xff]  }
  0xaf   :  { %4814 = vmatpush1.bf16.msra.mxu0 %v10895_v31  ;;  %4774 = vmatprep.subr.bf16.mxu1 %v10896_v32  ;;  %v10940_v1 = vld [vmem:[#allocation2 + $0xba4] ss:$48 sps:$4 sm:$0xff]   ;;  %v10943_v3 = vld [vmem:[#allocation2 + $0xba0] ss:$48 sps:$4 sm:$0xff]   ;;  %v10977_v31 = vld [vmem:[#allocation2 + $0x1e8] ss:$48 sps:$4 sm:$0xff]  }
  0xb0   :  { %4815 = vmatprep.subr.bf16.mxu0 %v10898_v33  ;;  %v134_v4 = vld [vmem:[%s12776_s0] sm:$0xff]  ;;  %v136_v6 = vld [vmem:[%s12776_s0 + $0x10] sm:$0xff]  ;;  %v10985_v33 = vld [vmem:[#allocation2 + $0x24c] ss:$48 sps:$4 sm:$0xff]  }
  0xb1   :  { %v10946_v5 = vld [vmem:[#allocation2 + $0xc04] ss:$48 sps:$4 sm:$0xff]   ;;  %v12494_v8 = vpack.c.bf16 %v134_v4, %v134_v4  ;;  %v10944_v9 = vld [vmem:[#allocation2 + $0xc00] ss:$48 sps:$4 sm:$0xff]   ;;  %v12496_v11 = vpack.c.bf16 %v136_v6, %v136_v6 }
  0xb2   :  { %4775 = vmatpush1.bf16.msra.mxu1 %v10900_v34  ;;  %v10952_v12 = vld [vmem:[#allocation2 + $0xc64] ss:$48 sps:$4 sm:$0xff]   ;;  %v10950_v14 = vld [vmem:[#allocation2 + $0xc60] ss:$48 sps:$4 sm:$0xff]   ;;  %v139_v34 = vld [vmem:[%s12776_s0 + $0x28] sm:$0xff] }
  0xb3   :  { %4816 = vmatpush1.bf16.msra.mxu0 %v10901_v35  ;;  %4776 = vmatprep.subr.bf16.mxu1 %v10902_v36  ;;  %v10958_v16 = vld [vmem:[#allocation2 + $0xcc4] ss:$48 sps:$4 sm:$0xff]   ;;  %v10956_v18 = vld [vmem:[#allocation2 + $0xcc0] ss:$48 sps:$4 sm:$0xff]   ;;  %v12504_v36 = vpack.c.bf16 %v139_v34, %v139_v34 }
  0xb4   :  { %4817 = vmatprep.subr.bf16.mxu0 %v10904_v37  ;;  %v10964_v20 = vld [vmem:[#allocation2 + $0xd24] ss:$48 sps:$4 sm:$0xff]   ;;  %v10962_v22 = vld [vmem:[#allocation2 + $0xd20] ss:$48 sps:$4 sm:$0xff]   ;;  %v10983_v37 = vld [vmem:[#allocation2 + $0x248] ss:$48 sps:$4 sm:$0xff]  }
  0xb5   :  { %v10970_v24 = vld [vmem:[#allocation2 + $0xd84] ss:$48 sps:$4 sm:$0xff]   ;;  %v10968_v26 = vld [vmem:[#allocation2 + $0xd80] ss:$48 sps:$4 sm:$0xff]  }
  0xb6   :  { %4777 = vmatpush1.bf16.msra.mxu1 %v10906_v38  ;;  %v10976_v28 = vld [vmem:[#allocation2 + $0xde4] ss:$48 sps:$4 sm:$0xff]   ;;  %v10974_v30 = vld [vmem:[#allocation2 + $0xde0] ss:$48 sps:$4 sm:$0xff]  }
  0xb7   :  { %4818 = vmatpush1.bf16.msra.mxu0 %v10907_v39  ;;  %4778 = vmatprep.subr.bf16.mxu1 %v10908_v40  ;;  %v10982_v32 = vld [vmem:[#allocation2 + $0xe44] ss:$48 sps:$4 sm:$0xff]   ;;  %v10980_v35 = vld [vmem:[#allocation2 + $0xe40] ss:$48 sps:$4 sm:$0xff]   ;;  %v10991_v39 = vld [vmem:[#allocation2 + $0x2ac] ss:$48 sps:$4 sm:$0xff]  }
  0xb8   :  { %4819 = vmatprep.subr.bf16.mxu0 %v10910_v41  ;;  %v10988_v38 = vld [vmem:[#allocation2 + $0xea4] ss:$48 sps:$4 sm:$0xff]   ;;  %v10986_v40 = vld [vmem:[#allocation2 + $0xea0] ss:$48 sps:$4 sm:$0xff]   ;;  %v10989_v41 = vld [vmem:[#allocation2 + $0x2a8] ss:$48 sps:$4 sm:$0xff]  }
  0xb9   :  { %v11000_v46 = vld [vmem:[#allocation2 + $0xf64] ss:$48 sps:$4 sm:$0xff]   ;;  %v10998_v49 = vld [vmem:[#allocation2 + $0xf60] ss:$48 sps:$4 sm:$0xff]  }
  0xba   :  { %4779 = vmatpush1.bf16.msra.mxu1 %v10912_v42  ;;  %v10994_v42 = vld [vmem:[#allocation2 + $0xf04] ss:$48 sps:$4 sm:$0xff]   ;;  %v11028_v6 = vld [vmem:[#allocation2 + $0x1140] ss:$48 sps:$4 sm:$0xff]  }
  0xbb   :  { %4820 = vmatpush1.bf16.msra.mxu0 %v10913_v43  ;;  %4780 = vmatprep.subr.bf16.mxu1 %v10914_v44  ;;  %v10997_v43 = vld [vmem:[#allocation2 + $0x30c] ss:$48 sps:$4 sm:$0xff]   ;;  %v10992_v44 = vld [vmem:[#allocation2 + $0xf00] ss:$48 sps:$4 sm:$0xff]   ;;  %v11030_v4 = vld [vmem:[#allocation2 + $0x1144] ss:$48 sps:$4 sm:$0xff]  }
  0xbc   :  { %4821 = vmatprep.subr.bf16.mxu0 %v10916_v45  ;;  %v10995_v45 = vld [vmem:[#allocation2 + $0x308] ss:$48 sps:$4 sm:$0xff]   ;;  %v11066_v34 = vld [vmem:[#allocation2 + $0x1384] ss:$48 sps:$4 sm:$0xff]  }
  0xbe   :  { %4781 = vmatpush1.bf16.msra.mxu1 %v10918_v47  ;;  %v11003_v47 = vld [vmem:[#allocation2 + $0x36c] ss:$48 sps:$4 sm:$0xff]  }
  0xbf   :  { %4822 = vmatpush1.bf16.msra.mxu0 %v10919_v50  ;;  %4782 = vmatprep.subr.bf16.mxu1 %v10920_v51  ;;  %v11001_v50 = vld [vmem:[#allocation2 + $0x368] ss:$48 sps:$4 sm:$0xff]   ;;  %v11006_v51 = vld [vmem:[#allocation2 + $0xfc4] ss:$48 sps:$4 sm:$0xff]  }
  0xc0   :  { %4823 = vmatprep.subr.bf16.mxu0 %v10922_v53  ;;  %v11009_v53 = vld [vmem:[#allocation2 + $0x3cc] ss:$48 sps:$4 sm:$0xff]  }
  0xc2   :  { %4783 = vmatpush1.bf16.msra.mxu1 %v10924_v54  ;;  %v11004_v54 = vld [vmem:[#allocation2 + $0xfc0] ss:$48 sps:$4 sm:$0xff]  }
  0xc3   :  { %4824 = vmatpush1.bf16.msra.mxu0 %v10925_v55  ;;  %4784 = vmatprep.subr.bf16.mxu1 %v10926_v56  ;;  %v11007_v55 = vld [vmem:[#allocation2 + $0x3c8] ss:$48 sps:$4 sm:$0xff]   ;;  %v11012_v56 = vld [vmem:[#allocation2 + $0x1024] ss:$48 sps:$4 sm:$0xff]  }
  0xc4   :  { %4825 = vmatprep.subr.bf16.mxu0 %v10928_v57  ;;  %v11015_v57 = vld [vmem:[#allocation2 + $0x42c] ss:$48 sps:$4 sm:$0xff]  }
  0xc6   :  { %4785 = vmatpush1.bf16.msra.mxu1 %v10930_v58  ;;  %v11010_v58 = vld [vmem:[#allocation2 + $0x1020] ss:$48 sps:$4 sm:$0xff]  }
  0xc7   :  { %4826 = vmatpush1.bf16.msra.mxu0 %v10931_v59  ;;  %4786 = vmatprep.subr.bf16.mxu1 %v10932_v60  ;;  %v11013_v59 = vld [vmem:[#allocation2 + $0x428] ss:$48 sps:$4 sm:$0xff]   ;;  %v11018_v60 = vld [vmem:[#allocation2 + $0x1084] ss:$48 sps:$4 sm:$0xff]  }
  0xc8   :  { %4827 = vmatprep.subr.bf16.mxu0 %v10934_v61  ;;  %v11021_v61 = vld [vmem:[#allocation2 + $0x48c] ss:$48 sps:$4 sm:$0xff]  }
  0xca   :  { %4787 = vmatpush1.bf16.msra.mxu1 %v10936_v62  ;;  %v11016_v62 = vld [vmem:[#allocation2 + $0x1080] ss:$48 sps:$4 sm:$0xff]  }
  0xcb   :  { %4828 = vmatpush1.bf16.msra.mxu0 %v10937_v63  ;;  %4788 = vmatprep.subr.bf16.mxu1 %v10938_v0  ;;  %v11019_v63 = vld [vmem:[#allocation2 + $0x488] ss:$48 sps:$4 sm:$0xff]   ;;  %v11024_v0 = vld [vmem:[#allocation2 + $0x10e4] ss:$48 sps:$4 sm:$0xff]  }
  0xcc   :  { %4829 = vmatprep.subr.bf16.mxu0 %v10940_v1  ;;  %v11027_v1 = vld [vmem:[#allocation2 + $0x4ec] ss:$48 sps:$4 sm:$0xff]  }
  0xce   :  { %4789 = vmatpush1.bf16.msra.mxu1 %v10942_v2  ;;  %v11022_v2 = vld [vmem:[#allocation2 + $0x10e0] ss:$48 sps:$4 sm:$0xff]  }
  0xcf   :  { %4830 = vmatpush1.bf16.msra.mxu0 %v10943_v3  ;;  %4922 = vmatprep.subr.bf16.mxu1 %v10949_v7  ;;  %v11025_v3 = vld [vmem:[#allocation2 + $0x4e8] ss:$48 sps:$4 sm:$0xff]  }
  0xd0   :  { %4840 = vmatprep.subr.bf16.mxu0 %v10946_v5  ;;  %v11033_v5 = vld [vmem:[#allocation2 + $0x54c] ss:$48 sps:$4 sm:$0xff]   ;;  %v11031_v7 = vld [vmem:[#allocation2 + $0x548] ss:$48 sps:$4 sm:$0xff]  }
  0xd1   :  { %4791 = vmatmul.mubr.bf16.vlgmr.msra.gmra.mrb[0].mxu1 %v12494_v8 }
  0xd2   :  { %4832 = vmatmul.mubr.bf16.vlgmr.msra.gmra.mrb[0].mxu0 %v12496_v11  ;;  %4923 = vmatpush1.bf16.msra.mxu1 %v10947_v10  ;;  %v11039_v10 = vld [vmem:[#allocation2 + $0x5ac] ss:$48 sps:$4 sm:$0xff]  }
  0xd3   :  { %4841 = vmatpush1.bf16.msra.mxu0 %v10944_v9  ;;  %4924 = vmatprep.subr.bf16.mxu1 %v10955_v13  ;;  %v11036_v9 = vld [vmem:[#allocation2 + $0x11a4] ss:$48 sps:$4 sm:$0xff]   ;;  %v11037_v13 = vld [vmem:[#allocation2 + $0x5a8] ss:$48 sps:$4 sm:$0xff]  }
  0xd4   :  { %4842 = vmatprep.subr.bf16.mxu0 %v10952_v12  ;;  %4954 = vmatprep.mubr.bf16.mxu1 %v12479_v48  ;;  %v11034_v12 = vld [vmem:[#allocation2 + $0x11a0] ss:$48 sps:$4 sm:$0xff]  }
  0xd5   :  { %4872 = vmatprep.mubr.bf16.mxu0 %v12504_v36 }
  0xd6   :  { %4925 = vmatpush1.bf16.msra.mxu1 %v10953_v15  ;;  %v11042_v15 = vld [vmem:[#allocation2 + $0x1204] ss:$48 sps:$4 sm:$0xff]  }
  0xd7   :  { %4843 = vmatpush1.bf16.msra.mxu0 %v10950_v14  ;;  %4926 = vmatprep.subr.bf16.mxu1 %v10961_v17  ;;  %v138_v14 = vld [vmem:[%s12776_s0 + $0x20] sm:$0xff] }
  0xd8   :  { %4844 = vmatprep.subr.bf16.mxu0 %v10958_v16  ;;  %v11045_v16 = vld [vmem:[#allocation2 + $0x60c] ss:$48 sps:$4 sm:$0xff]   ;;  %v12510_v17 = vpack.c.bf16 %v138_v14, %v138_v14  ;;  %v11121_v14 = vld [vmem:[#allocation2 + $0xae8] ss:$48 sps:$4 sm:$0xff]  }
  0xda   :  { %4927 = vmatpush1.bf16.msra.mxu1 %v10959_v19  ;;  %v11043_v19 = vld [vmem:[#allocation2 + $0x608] ss:$48 sps:$4 sm:$0xff]  }
  0xdb   :  { %4845 = vmatpush1.bf16.msra.mxu0 %v10956_v18  ;;  %4928 = vmatprep.subr.bf16.mxu1 %v10967_v21  ;;  %v11040_v18 = vld [vmem:[#allocation2 + $0x1200] ss:$48 sps:$4 sm:$0xff]   ;;  %v11051_v21 = vld [vmem:[#allocation2 + $0x66c] ss:$48 sps:$4 sm:$0xff]  }
  0xdc   :  { %4846 = vmatprep.subr.bf16.mxu0 %v10964_v20  ;;  %v11048_v20 = vld [vmem:[#allocation2 + $0x1264] ss:$48 sps:$4 sm:$0xff]  }
  0xde   :  { %4929 = vmatpush1.bf16.msra.mxu1 %v10965_v23  ;;  %v11046_v23 = vld [vmem:[#allocation2 + $0x1260] ss:$48 sps:$4 sm:$0xff]  }
  0xdf   :  { %4847 = vmatpush1.bf16.msra.mxu0 %v10962_v22  ;;  %4930 = vmatprep.subr.bf16.mxu1 %v10973_v25  ;;  %v141_v22 = vld [vmem:[%s12776_s0 + $0x38] sm:$0xff] }
  0xe0   :  { %4848 = vmatprep.subr.bf16.mxu0 %v10970_v24  ;;  %v11049_v24 = vld [vmem:[#allocation2 + $0x668] ss:$48 sps:$4 sm:$0xff]   ;;  %v12517_v25 = vpack.c.bf16 %v141_v22, %v141_v22  ;;  %v11130_v22 = vld [vmem:[#allocation2 + $0x17a0] ss:$48 sps:$4 sm:$0xff]  }
  0xe2   :  { %4931 = vmatpush1.bf16.msra.mxu1 %v10971_v27  ;;  %v11057_v27 = vld [vmem:[#allocation2 + $0x6cc] ss:$48 sps:$4 sm:$0xff]  }
  0xe3   :  { %4849 = vmatpush1.bf16.msra.mxu0 %v10968_v26  ;;  %4932 = vmatprep.subr.bf16.mxu1 %v10979_v29  ;;  %v11054_v26 = vld [vmem:[#allocation2 + $0x12c4] ss:$48 sps:$4 sm:$0xff]   ;;  %v11055_v29 = vld [vmem:[#allocation2 + $0x6c8] ss:$48 sps:$4 sm:$0xff]  }
  0xe4   :  { %4850 = vmatprep.subr.bf16.mxu0 %v10976_v28  ;;  %v11052_v28 = vld [vmem:[#allocation2 + $0x12c0] ss:$48 sps:$4 sm:$0xff]  }
  0xe6   :  { %4933 = vmatpush1.bf16.msra.mxu1 %v10977_v31  ;;  %v11063_v31 = vld [vmem:[#allocation2 + $0x72c] ss:$48 sps:$4 sm:$0xff]  }
  0xe7   :  { %4851 = vmatpush1.bf16.msra.mxu0 %v10974_v30  ;;  %4934 = vmatprep.subr.bf16.mxu1 %v10985_v33  ;;  %v11060_v30 = vld [vmem:[#allocation2 + $0x1324] ss:$48 sps:$4 sm:$0xff]   ;;  %v11061_v33 = vld [vmem:[#allocation2 + $0x728] ss:$48 sps:$4 sm:$0xff]  }
  0xe8   :  { %4852 = vmatprep.subr.bf16.mxu0 %v10982_v32  ;;  %v11058_v32 = vld [vmem:[#allocation2 + $0x1320] ss:$48 sps:$4 sm:$0xff]  }
  0xea   :  { %4935 = vmatpush1.bf16.msra.mxu1 %v10983_v37  ;;  %v11064_v37 = vld [vmem:[#allocation2 + $0x1380] ss:$48 sps:$4 sm:$0xff]  }
  0xeb   :  { %4853 = vmatpush1.bf16.msra.mxu0 %v10980_v35  ;;  %4936 = vmatprep.subr.bf16.mxu1 %v10991_v39  ;;  %v11069_v35 = vld [vmem:[#allocation2 + $0x78c] ss:$48 sps:$4 sm:$0xff]   ;;  %v11072_v39 = vld [vmem:[#allocation2 + $0x13e4] ss:$48 sps:$4 sm:$0xff]  }
  0xec   :  { %4854 = vmatprep.subr.bf16.mxu0 %v10988_v38  ;;  %v11067_v38 = vld [vmem:[#allocation2 + $0x788] ss:$48 sps:$4 sm:$0xff]  }
  0xee   :  { %4937 = vmatpush1.bf16.msra.mxu1 %v10989_v41  ;;  %v11070_v41 = vld [vmem:[#allocation2 + $0x13e0] ss:$48 sps:$4 sm:$0xff]  }
  0xef   :  { %4855 = vmatpush1.bf16.msra.mxu0 %v10986_v40  ;;  %4938 = vmatprep.subr.bf16.mxu1 %v10997_v43  ;;  %v11075_v40 = vld [vmem:[#allocation2 + $0x7ec] ss:$48 sps:$4 sm:$0xff]   ;;  %v11078_v43 = vld [vmem:[#allocation2 + $0x1444] ss:$48 sps:$4 sm:$0xff]  }
  0xf0   :  { %4856 = vmatprep.subr.bf16.mxu0 %v10994_v42  ;;  %v11073_v42 = vld [vmem:[#allocation2 + $0x7e8] ss:$48 sps:$4 sm:$0xff]  }
  0xf2   :  { %4939 = vmatpush1.bf16.msra.mxu1 %v10995_v45  ;;  %v11076_v45 = vld [vmem:[#allocation2 + $0x1440] ss:$48 sps:$4 sm:$0xff]  }
  0xf3   :  { %4857 = vmatpush1.bf16.msra.mxu0 %v10992_v44  ;;  %4940 = vmatprep.subr.bf16.mxu1 %v11003_v47  ;;  %v11081_v44 = vld [vmem:[#allocation2 + $0x84c] ss:$48 sps:$4 sm:$0xff]   ;;  %v11084_v47 = vld [vmem:[#allocation2 + $0x14a4] ss:$48 sps:$4 sm:$0xff]  }
  0xf4   :  { %4858 = vmatprep.subr.bf16.mxu0 %v11000_v46  ;;  %v11079_v46 = vld [vmem:[#allocation2 + $0x848] ss:$48 sps:$4 sm:$0xff]  }
  0xf6   :  { %4941 = vmatpush1.bf16.msra.mxu1 %v11001_v50  ;;  %v11082_v50 = vld [vmem:[#allocation2 + $0x14a0] ss:$48 sps:$4 sm:$0xff]  }
  0xf7   :  { %4859 = vmatpush1.bf16.msra.mxu0 %v10998_v49  ;;  %4942 = vmatprep.subr.bf16.mxu1 %v11009_v53  ;;  %v11087_v49 = vld [vmem:[#allocation2 + $0x8ac] ss:$48 sps:$4 sm:$0xff]   ;;  %v11090_v53 = vld [vmem:[#allocation2 + $0x1504] ss:$48 sps:$4 sm:$0xff]  }
  0xf8   :  { %4860 = vmatprep.subr.bf16.mxu0 %v11006_v51  ;;  %v11085_v51 = vld [vmem:[#allocation2 + $0x8a8] ss:$48 sps:$4 sm:$0xff]  }
  0xfa   :  { %4943 = vmatpush1.bf16.msra.mxu1 %v11007_v55  ;;  %v11088_v55 = vld [vmem:[#allocation2 + $0x1500] ss:$48 sps:$4 sm:$0xff]  }
  0xfb   :  { %4861 = vmatpush1.bf16.msra.mxu0 %v11004_v54  ;;  %4944 = vmatprep.subr.bf16.mxu1 %v11015_v57  ;;  %v11093_v54 = vld [vmem:[#allocation2 + $0x90c] ss:$48 sps:$4 sm:$0xff]   ;;  %v11096_v57 = vld [vmem:[#allocation2 + $0x1564] ss:$48 sps:$4 sm:$0xff]  }
  0xfc   :  { %4862 = vmatprep.subr.bf16.mxu0 %v11012_v56  ;;  %v11091_v56 = vld [vmem:[#allocation2 + $0x908] ss:$48 sps:$4 sm:$0xff]  }
  0xfe   :  { %4945 = vmatpush1.bf16.msra.mxu1 %v11013_v59  ;;  %v11094_v59 = vld [vmem:[#allocation2 + $0x1560] ss:$48 sps:$4 sm:$0xff]  }
  0xff   :  { %4863 = vmatpush1.bf16.msra.mxu0 %v11010_v58  ;;  %4946 = vmatprep.subr.bf16.mxu1 %v11021_v61  ;;  %v11099_v58 = vld [vmem:[#allocation2 + $0x96c] ss:$48 sps:$4 sm:$0xff]   ;;  %v11102_v61 = vld [vmem:[#allocation2 + $0x15c4] ss:$48 sps:$4 sm:$0xff]  }
 0x100   :  { %4864 = vmatprep.subr.bf16.mxu0 %v11018_v60  ;;  %v11097_v60 = vld [vmem:[#allocation2 + $0x968] ss:$48 sps:$4 sm:$0xff]  }
 0x102   :  { %4947 = vmatpush1.bf16.msra.mxu1 %v11019_v63  ;;  %v11100_v63 = vld [vmem:[#allocation2 + $0x15c0] ss:$48 sps:$4 sm:$0xff]  }
 0x103   :  { %4865 = vmatpush1.bf16.msra.mxu0 %v11016_v62  ;;  %4948 = vmatprep.subr.bf16.mxu1 %v11027_v1  ;;  %v11105_v62 = vld [vmem:[#allocation2 + $0x9cc] ss:$48 sps:$4 sm:$0xff]   ;;  %v11108_v1 = vld [vmem:[#allocation2 + $0x1624] ss:$48 sps:$4 sm:$0xff]  }
 0x104   :  { %4866 = vmatprep.subr.bf16.mxu0 %v11024_v0  ;;  %v11103_v0 = vld [vmem:[#allocation2 + $0x9c8] ss:$48 sps:$4 sm:$0xff]  }
 0x106   :  { %4949 = vmatpush1.bf16.msra.mxu1 %v11025_v3  ;;  %v11106_v3 = vld [vmem:[#allocation2 + $0x1620] ss:$48 sps:$4 sm:$0xff]  }
 0x107   :  { %4867 = vmatpush1.bf16.msra.mxu0 %v11022_v2  ;;  %4950 = vmatprep.subr.bf16.mxu1 %v11033_v5  ;;  %v11111_v2 = vld [vmem:[#allocation2 + $0xa2c] ss:$48 sps:$4 sm:$0xff]   ;;  %v11114_v5 = vld [vmem:[#allocation2 + $0x1684] ss:$48 sps:$4 sm:$0xff]  }
 0x108   :  { %4868 = vmatprep.subr.bf16.mxu0 %v11030_v4  ;;  %v11109_v4 = vld [vmem:[#allocation2 + $0xa28] ss:$48 sps:$4 sm:$0xff]  }
 0x10a   :  { %4951 = vmatpush1.bf16.msra.mxu1 %v11031_v7  ;;  %v11112_v7 = vld [vmem:[#allocation2 + $0x1680] ss:$48 sps:$4 sm:$0xff]  }
 0x10b   :  { %4869 = vmatpush1.bf16.msra.mxu0 %v11028_v6  ;;  %4952 = vmatprep.subr.bf16.mxu1 %v11039_v10  ;;  %v11117_v6 = vld [vmem:[#allocation2 + $0xa8c] ss:$48 sps:$4 sm:$0xff]   ;;  %v11120_v10 = vld [vmem:[#allocation2 + $0x16e4] ss:$48 sps:$4 sm:$0xff]  }
 0x10c   :  { %4870 = vmatprep.subr.bf16.mxu0 %v11036_v9  ;;  %v11115_v9 = vld [vmem:[#allocation2 + $0xa88] ss:$48 sps:$4 sm:$0xff]  }
 0x10e   :  { %4953 = vmatpush1.bf16.msra.mxu1 %v11037_v13  ;;  %v11118_v13 = vld [vmem:[#allocation2 + $0x16e0] ss:$48 sps:$4 sm:$0xff]  }
 0x10f   :  { %4871 = vmatpush1.bf16.msra.mxu0 %v11034_v12  ;;  %4963 = vmatprep.subr.bf16.mxu1 %v11045_v16  ;;  %v11123_v12 = vld [vmem:[#allocation2 + $0xaec] ss:$48 sps:$4 sm:$0xff]  }
 0x110   :  { %4881 = vmatprep.subr.bf16.mxu0 %v11042_v15  ;;  %v11126_v15 = vld [vmem:[#allocation2 + $0x1744] ss:$48 sps:$4 sm:$0xff]   ;;  %v11129_v16 = vld [vmem:[#allocation2 + $0xb4c] ss:$48 sps:$4 sm:$0xff]  }
 0x111   :  { %4955 = vmatmul.mubr.bf16.vlgmr.msra.gmra.mrb[4].mxu1 %v12494_v8 }
 0x112   :  { %4873 = vmatmul.mubr.bf16.vlgmr.msra.gmra.mrb[0].mxu0 %v12510_v17  ;;  %4964 = vmatpush1.bf16.msra.mxu1 %v11043_v19  ;;  %v11127_v19 = vld [vmem:[#allocation2 + $0xb48] ss:$48 sps:$4 sm:$0xff]  }
 0x113   :  { %4882 = vmatpush1.bf16.msra.mxu0 %v11040_v18  ;;  %4965 = vmatprep.subr.bf16.mxu1 %v11051_v21  ;;  %v11124_v18 = vld [vmem:[#allocation2 + $0x1740] ss:$48 sps:$4 sm:$0xff]   ;;  %v11135_v21 = vld [vmem:[#allocation2 + $0xbac] ss:$48 sps:$4 sm:$0xff]  }
 0x114   :  { %4883 = vmatprep.subr.bf16.mxu0 %v11048_v20  ;;  %4913 = vmatprep.mubr.bf16.mxu0 %v12517_v25  ;;  %v11132_v20 = vld [vmem:[#allocation2 + $0x17a4] ss:$48 sps:$4 sm:$0xff]  }
 0x115   :  { %4995 = vmatprep.mubr.bf16.mxu1 %v12484_v52 }
 0x116   :  { %4966 = vmatpush1.bf16.msra.mxu1 %v11049_v24  ;;  %v140_v24 = vld [vmem:[%s12776_s0 + $0x30] sm:$0xff] }
 0x117   :  { %4884 = vmatpush1.bf16.msra.mxu0 %v11046_v23  ;;  %4967 = vmatprep.subr.bf16.mxu1 %v11057_v27  ;;  %v11133_v23 = vld [vmem:[#allocation2 + $0xba8] ss:$48 sps:$4 sm:$0xff]   ;;  %v11141_v27 = vld [vmem:[#allocation2 + $0x14] ss:$48 sps:$4 sm:$0xff]  }
 0x118   :  { %4885 = vmatprep.subr.bf16.mxu0 %v11054_v26  ;;  %v11138_v26 = vld [vmem:[#allocation2 + $0xc0c] ss:$48 sps:$4 sm:$0xff]  }
 0x11a   :  { %4968 = vmatpush1.bf16.msra.mxu1 %v11055_v29  ;;  %v11136_v29 = vld [vmem:[#allocation2 + $0xc08] ss:$48 sps:$4 sm:$0xff]  }
 0x11b   :  { %4886 = vmatpush1.bf16.msra.mxu0 %v11052_v28  ;;  %4969 = vmatprep.subr.bf16.mxu1 %v11063_v31  ;;  %v12524_v28 = vpack.c.bf16 %v140_v24, %v140_v24  ;;  %v11144_v31 = vld [vmem:[#allocation2 + $0xc6c] ss:$48 sps:$4 sm:$0xff]   ;;  %v11217_v24 = vld [vmem:[#allocation2 + $0x4f0] ss:$48 sps:$4 sm:$0xff]  }
 0x11c   :  { %4887 = vmatprep.subr.bf16.mxu0 %v11060_v30  ;;  %v11139_v30 = vld [vmem:[#allocation2 + $0x10] ss:$48 sps:$4 sm:$0xff]  }
 0x11e   :  { %4970 = vmatpush1.bf16.msra.mxu1 %v11061_v33  ;;  %v11142_v33 = vld [vmem:[#allocation2 + $0xc68] ss:$48 sps:$4 sm:$0xff]  }
 0x11f   :  { %4888 = vmatpush1.bf16.msra.mxu0 %v11058_v32  ;;  %4971 = vmatprep.subr.bf16.mxu1 %v11069_v35  ;;  %v11147_v32 = vld [vmem:[#allocation2 + $0x74] ss:$48 sps:$4 sm:$0xff]   ;;  %v11150_v35 = vld [vmem:[#allocation2 + $0xccc] ss:$48 sps:$4 sm:$0xff]  }
 0x120   :  { %4889 = vmatprep.subr.bf16.mxu0 %v11066_v34  ;;  %v11145_v34 = vld [vmem:[#allocation2 + $0x70] ss:$48 sps:$4 sm:$0xff]  }
 0x122   :  { %4972 = vmatpush1.bf16.msra.mxu1 %v11067_v38  ;;  %v11148_v38 = vld [vmem:[#allocation2 + $0xcc8] ss:$48 sps:$4 sm:$0xff]  }
 0x123   :  { %4890 = vmatpush1.bf16.msra.mxu0 %v11064_v37  ;;  %4973 = vmatprep.subr.bf16.mxu1 %v11075_v40  ;;  %v11153_v37 = vld [vmem:[#allocation2 + $0xd4] ss:$48 sps:$4 sm:$0xff]   ;;  %v11156_v40 = vld [vmem:[#allocation2 + $0xd2c] ss:$48 sps:$4 sm:$0xff]  }
 0x124   :  { %4891 = vmatprep.subr.bf16.mxu0 %v11072_v39  ;;  %v11151_v39 = vld [vmem:[#allocation2 + $0xd0] ss:$48 sps:$4 sm:$0xff]  }
 0x126   :  { %4974 = vmatpush1.bf16.msra.mxu1 %v11073_v42  ;;  %v11154_v42 = vld [vmem:[#allocation2 + $0xd28] ss:$48 sps:$4 sm:$0xff]  }
 0x127   :  { %4892 = vmatpush1.bf16.msra.mxu0 %v11070_v41  ;;  %4975 = vmatprep.subr.bf16.mxu1 %v11081_v44  ;;  %v11159_v41 = vld [vmem:[#allocation2 + $0x134] ss:$48 sps:$4 sm:$0xff]   ;;  %v11162_v44 = vld [vmem:[#allocation2 + $0xd8c] ss:$48 sps:$4 sm:$0xff]  }
 0x128   :  { %4893 = vmatprep.subr.bf16.mxu0 %v11078_v43  ;;  %v11157_v43 = vld [vmem:[#allocation2 + $0x130] ss:$48 sps:$4 sm:$0xff]  }
 0x12a   :  { %4976 = vmatpush1.bf16.msra.mxu1 %v11079_v46  ;;  %v11160_v46 = vld [vmem:[#allocation2 + $0xd88] ss:$48 sps:$4 sm:$0xff]  }
 0x12b   :  { %4894 = vmatpush1.bf16.msra.mxu0 %v11076_v45  ;;  %4977 = vmatprep.subr.bf16.mxu1 %v11087_v49  ;;  %v11165_v45 = vld [vmem:[#allocation2 + $0x194] ss:$48 sps:$4 sm:$0xff]   ;;  %v11168_v49 = vld [vmem:[#allocation2 + $0xdec] ss:$48 sps:$4 sm:$0xff]  }
 0x12c   :  { %4895 = vmatprep.subr.bf16.mxu0 %v11084_v47  ;;  %v11163_v47 = vld [vmem:[#allocation2 + $0x190] ss:$48 sps:$4 sm:$0xff]  }
 0x12e   :  { %4978 = vmatpush1.bf16.msra.mxu1 %v11085_v51  ;;  %v11166_v51 = vld [vmem:[#allocation2 + $0xde8] ss:$48 sps:$4 sm:$0xff]  }
 0x12f   :  { %4896 = vmatpush1.bf16.msra.mxu0 %v11082_v50  ;;  %4979 = vmatprep.subr.bf16.mxu1 %v11093_v54  ;;  %v11171_v50 = vld [vmem:[#allocation2 + $0x1f4] ss:$48 sps:$4 sm:$0xff]   ;;  %v11174_v54 = vld [vmem:[#allocation2 + $0xe4c] ss:$48 sps:$4 sm:$0xff]  }
 0x130   :  { %4897 = vmatprep.subr.bf16.mxu0 %v11090_v53  ;;  %v11169_v53 = vld [vmem:[#allocation2 + $0x1f0] ss:$48 sps:$4 sm:$0xff]  }
 0x132   :  { %4980 = vmatpush1.bf16.msra.mxu1 %v11091_v56  ;;  %v11172_v56 = vld [vmem:[#allocation2 + $0xe48] ss:$48 sps:$4 sm:$0xff]  }
 0x133   :  { %4898 = vmatpush1.bf16.msra.mxu0 %v11088_v55  ;;  %4981 = vmatprep.subr.bf16.mxu1 %v11099_v58  ;;  %v11177_v55 = vld [vmem:[#allocation2 + $0x254] ss:$48 sps:$4 sm:$0xff]   ;;  %v11180_v58 = vld [vmem:[#allocation2 + $0xeac] ss:$48 sps:$4 sm:$0xff]  }
 0x134   :  { %4899 = vmatprep.subr.bf16.mxu0 %v11096_v57  ;;  %v11175_v57 = vld [vmem:[#allocation2 + $0x250] ss:$48 sps:$4 sm:$0xff]  }
 0x136   :  { %4982 = vmatpush1.bf16.msra.mxu1 %v11097_v60  ;;  %v11178_v60 = vld [vmem:[#allocation2 + $0xea8] ss:$48 sps:$4 sm:$0xff]  }
 0x137   :  { %4900 = vmatpush1.bf16.msra.mxu0 %v11094_v59  ;;  %4983 = vmatprep.subr.bf16.mxu1 %v11105_v62  ;;  %v11183_v59 = vld [vmem:[#allocation2 + $0x2b4] ss:$48 sps:$4 sm:$0xff]   ;;  %v11186_v62 = vld [vmem:[#allocation2 + $0xf0c] ss:$48 sps:$4 sm:$0xff]  }
 0x138   :  { %4901 = vmatprep.subr.bf16.mxu0 %v11102_v61  ;;  %v11181_v61 = vld [vmem:[#allocation2 + $0x2b0] ss:$48 sps:$4 sm:$0xff]  }
 0x13a   :  { %4984 = vmatpush1.bf16.msra.mxu1 %v11103_v0  ;;  %v11184_v0 = vld [vmem:[#allocation2 + $0xf08] ss:$48 sps:$4 sm:$0xff]  }
 0x13b   :  { %4902 = vmatpush1.bf16.msra.mxu0 %v11100_v63  ;;  %4985 = vmatprep.subr.bf16.mxu1 %v11111_v2  ;;  %v11189_v63 = vld [vmem:[#allocation2 + $0x314] ss:$48 sps:$4 sm:$0xff]   ;;  %v11192_v2 = vld [vmem:[#allocation2 + $0xf6c] ss:$48 sps:$4 sm:$0xff]  }
 0x13c   :  { %4903 = vmatprep.subr.bf16.mxu0 %v11108_v1  ;;  %v11187_v1 = vld [vmem:[#allocation2 + $0x310] ss:$48 sps:$4 sm:$0xff]  }
 0x13e   :  { %4986 = vmatpush1.bf16.msra.mxu1 %v11109_v4  ;;  %v11190_v4 = vld [vmem:[#allocation2 + $0xf68] ss:$48 sps:$4 sm:$0xff]  }
 0x13f   :  { %4904 = vmatpush1.bf16.msra.mxu0 %v11106_v3  ;;  %4987 = vmatprep.subr.bf16.mxu1 %v11117_v6  ;;  %v11195_v3 = vld [vmem:[#allocation2 + $0x374] ss:$48 sps:$4 sm:$0xff]   ;;  %v11198_v6 = vld [vmem:[#allocation2 + $0xfcc] ss:$48 sps:$4 sm:$0xff]  }
 0x140   :  { %4905 = vmatprep.subr.bf16.mxu0 %v11114_v5  ;;  %v11193_v5 = vld [vmem:[#allocation2 + $0x370] ss:$48 sps:$4 sm:$0xff]  }
 0x142   :  { %4988 = vmatpush1.bf16.msra.mxu1 %v11115_v9  ;;  %v11196_v9 = vld [vmem:[#allocation2 + $0xfc8] ss:$48 sps:$4 sm:$0xff]  }
 0x143   :  { %4906 = vmatpush1.bf16.msra.mxu0 %v11112_v7  ;;  %4989 = vmatprep.subr.bf16.mxu1 %v11123_v12  ;;  %v11201_v7 = vld [vmem:[#allocation2 + $0x3d4] ss:$48 sps:$4 sm:$0xff]   ;;  %v11204_v12 = vld [vmem:[#allocation2 + $0x102c] ss:$48 sps:$4 sm:$0xff]  }
 0x144   :  { %4907 = vmatprep.subr.bf16.mxu0 %v11120_v10  ;;  %v11199_v10 = vld [vmem:[#allocation2 + $0x3d0] ss:$48 sps:$4 sm:$0xff]  }
 0x146   :  { %4990 = vmatpush1.bf16.msra.mxu1 %v11121_v14  ;;  %v11202_v14 = vld [vmem:[#allocation2 + $0x1028] ss:$48 sps:$4 sm:$0xff]  }
 0x147   :  { %4908 = vmatpush1.bf16.msra.mxu0 %v11118_v13  ;;  %4991 = vmatprep.subr.bf16.mxu1 %v11129_v16  ;;  %v11207_v13 = vld [vmem:[#allocation2 + $0x434] ss:$48 sps:$4 sm:$0xff]   ;;  %v11210_v16 = vld [vmem:[#allocation2 + $0x108c] ss:$48 sps:$4 sm:$0xff]  }
 0x148   :  { %4909 = vmatprep.subr.bf16.mxu0 %v11126_v15  ;;  %v11205_v15 = vld [vmem:[#allocation2 + $0x430] ss:$48 sps:$4 sm:$0xff]  }
 0x14a   :  { %4992 = vmatpush1.bf16.msra.mxu1 %v11127_v19  ;;  %v11208_v19 = vld [vmem:[#allocation2 + $0x1088] ss:$48 sps:$4 sm:$0xff]  }
 0x14b   :  { %4910 = vmatpush1.bf16.msra.mxu0 %v11124_v18  ;;  %4993 = vmatprep.subr.bf16.mxu1 %v11135_v21  ;;  %v11213_v18 = vld [vmem:[#allocation2 + $0x494] ss:$48 sps:$4 sm:$0xff]   ;;  %v11216_v21 = vld [vmem:[#allocation2 + $0x10ec] ss:$48 sps:$4 sm:$0xff]  }
 0x14c   :  { %4911 = vmatprep.subr.bf16.mxu0 %v11132_v20  ;;  %v11211_v20 = vld [vmem:[#allocation2 + $0x490] ss:$48 sps:$4 sm:$0xff]  }
 0x14e   :  { %4994 = vmatpush1.bf16.msra.mxu1 %v11133_v23  ;;  %v11214_v23 = vld [vmem:[#allocation2 + $0x10e8] ss:$48 sps:$4 sm:$0xff]  }
 0x14f   :  { %4912 = vmatpush1.bf16.msra.mxu0 %v11130_v22  ;;  %5004 = vmatprep.subr.bf16.mxu1 %v11138_v26  ;;  %v11219_v22 = vld [vmem:[#allocation2 + $0x4f4] ss:$48 sps:$4 sm:$0xff]   ;;  %v11222_v26 = vld [vmem:[#allocation2 + $0x114c] ss:$48 sps:$4 sm:$0xff]  }
 0x150   :  { %5086 = vmatprep.subr.bf16.mxu0 %v11141_v27  ;;  %v11225_v27 = vld [vmem:[#allocation2 + $0x554] ss:$48 sps:$4 sm:$0xff]  }
 0x151   :  { %4996 = vmatmul.mubr.bf16.vlgmr.msra.gmra.mrb[4].mxu1 %v12496_v11 }
 0x152   :  { %4914 = vmatmul.mubr.bf16.vlgmr.msra.gmra.mrb[0].mxu0 %v12524_v28  ;;  %5005 = vmatpush1.bf16.msra.mxu1 %v11136_v29  ;;  %v11220_v29 = vld [vmem:[#allocation2 + $0x1148] ss:$48 sps:$4 sm:$0xff]  }
 0x153   :  { %5087 = vmatpush1.bf16.msra.mxu0 %v11139_v30  ;;  %5006 = vmatprep.subr.bf16.mxu1 %v11144_v31  ;;  %v11223_v30 = vld [vmem:[#allocation2 + $0x550] ss:$48 sps:$4 sm:$0xff]   ;;  %v11228_v31 = vld [vmem:[#allocation2 + $0x11ac] ss:$48 sps:$4 sm:$0xff]  }
 0x154   :  { %5088 = vmatprep.subr.bf16.mxu0 %v11147_v32  ;;  %5036 = vmatprep.mubr.bf16.mxu1 %v12504_v36  ;;  %v11231_v32 = vld [vmem:[#allocation2 + $0x5b4] ss:$48 sps:$4 sm:$0xff]  }
 0x155   :  { %5118 = vmatprep.mubr.bf16.mxu0 %v12479_v48 }
 0x156   :  { %5007 = vmatpush1.bf16.msra.mxu1 %v11142_v33  ;;  %v11226_v33 = vld [vmem:[#allocation2 + $0x11a8] ss:$48 sps:$4 sm:$0xff]  }
 0x157   :  { %5089 = vmatpush1.bf16.msra.mxu0 %v11145_v34  ;;  %5008 = vmatprep.subr.bf16.mxu1 %v11150_v35  ;;  %v11229_v34 = vld [vmem:[#allocation2 + $0x5b0] ss:$48 sps:$4 sm:$0xff]   ;;  %v11234_v35 = vld [vmem:[#allocation2 + $0x120c] ss:$48 sps:$4 sm:$0xff]  }
 0x158   :  { %5090 = vmatprep.subr.bf16.mxu0 %v11153_v37  ;;  %v11237_v37 = vld [vmem:[#allocation2 + $0x614] ss:$48 sps:$4 sm:$0xff]  }
 0x15a   :  { %5009 = vmatpush1.bf16.msra.mxu1 %v11148_v38  ;;  %v11232_v38 = vld [vmem:[#allocation2 + $0x1208] ss:$48 sps:$4 sm:$0xff]  }
 0x15b   :  { %5091 = vmatpush1.bf16.msra.mxu0 %v11151_v39  ;;  %5010 = vmatprep.subr.bf16.mxu1 %v11156_v40  ;;  %v11235_v39 = vld [vmem:[#allocation2 + $0x610] ss:$48 sps:$4 sm:$0xff]   ;;  %v11240_v40 = vld [vmem:[#allocation2 + $0x126c] ss:$48 sps:$4 sm:$0xff]  }
 0x15c   :  { %5092 = vmatprep.subr.bf16.mxu0 %v11159_v41  ;;  %v11243_v41 = vld [vmem:[#allocation2 + $0x674] ss:$48 sps:$4 sm:$0xff]  }
 0x15e   :  { %5011 = vmatpush1.bf16.msra.mxu1 %v11154_v42  ;;  %v11238_v42 = vld [vmem:[#allocation2 + $0x1268] ss:$48 sps:$4 sm:$0xff]  }
 0x15f   :  { %5093 = vmatpush1.bf16.msra.mxu0 %v11157_v43  ;;  %5012 = vmatprep.subr.bf16.mxu1 %v11162_v44  ;;  %v11241_v43 = vld [vmem:[#allocation2 + $0x670] ss:$48 sps:$4 sm:$0xff]   ;;  %v11246_v44 = vld [vmem:[#allocation2 + $0x12cc] ss:$48 sps:$4 sm:$0xff]  }
 0x160   :  { %5094 = vmatprep.subr.bf16.mxu0 %v11165_v45  ;;  %v11249_v45 = vld [vmem:[#allocation2 + $0x6d4] ss:$48 sps:$4 sm:$0xff]  }
 0x162   :  { %5013 = vmatpush1.bf16.msra.mxu1 %v11160_v46  ;;  %v11244_v46 = vld [vmem:[#allocation2 + $0x12c8] ss:$48 sps:$4 sm:$0xff]  }
 0x163   :  { %5095 = vmatpush1.bf16.msra.mxu0 %v11163_v47  ;;  %5014 = vmatprep.subr.bf16.mxu1 %v11168_v49  ;;  %v11247_v47 = vld [vmem:[#allocation2 + $0x6d0] ss:$48 sps:$4 sm:$0xff]   ;;  %v11252_v49 = vld [vmem:[#allocation2 + $0x132c] ss:$48 sps:$4 sm:$0xff]  }
 0x164   :  { %5096 = vmatprep.subr.bf16.mxu0 %v11171_v50  ;;  %v11255_v50 = vld [vmem:[#allocation2 + $0x734] ss:$48 sps:$4 sm:$0xff]  }
 0x166   :  { %5015 = vmatpush1.bf16.msra.mxu1 %v11166_v51  ;;  %v11250_v51 = vld [vmem:[#allocation2 + $0x1328] ss:$48 sps:$4 sm:$0xff]  }
 0x167   :  { %5097 = vmatpush1.bf16.msra.mxu0 %v11169_v53  ;;  %5016 = vmatprep.subr.bf16.mxu1 %v11174_v54  ;;  %v11253_v53 = vld [vmem:[#allocation2 + $0x730] ss:$48 sps:$4 sm:$0xff]   ;;  %v11258_v54 = vld [vmem:[#allocation2 + $0x138c] ss:$48 sps:$4 sm:$0xff]  }
 0x168   :  { %5098 = vmatprep.subr.bf16.mxu0 %v11177_v55  ;;  %v11261_v55 = vld [vmem:[#allocation2 + $0x794] ss:$48 sps:$4 sm:$0xff]  }
 0x16a   :  { %5017 = vmatpush1.bf16.msra.mxu1 %v11172_v56  ;;  %v11256_v56 = vld [vmem:[#allocation2 + $0x1388] ss:$48 sps:$4 sm:$0xff]  }
 0x16b   :  { %5099 = vmatpush1.bf16.msra.mxu0 %v11175_v57  ;;  %5018 = vmatprep.subr.bf16.mxu1 %v11180_v58  ;;  %v11259_v57 = vld [vmem:[#allocation2 + $0x790] ss:$48 sps:$4 sm:$0xff]   ;;  %v11264_v58 = vld [vmem:[#allocation2 + $0x13ec] ss:$48 sps:$4 sm:$0xff]  }
 0x16c   :  { %5100 = vmatprep.subr.bf16.mxu0 %v11183_v59  ;;  %v11267_v59 = vld [vmem:[#allocation2 + $0x7f4] ss:$48 sps:$4 sm:$0xff]  }
 0x16e   :  { %5019 = vmatpush1.bf16.msra.mxu1 %v11178_v60  ;;  %v11262_v60 = vld [vmem:[#allocation2 + $0x13e8] ss:$48 sps:$4 sm:$0xff]  }
 0x16f   :  { %5101 = vmatpush1.bf16.msra.mxu0 %v11181_v61  ;;  %5020 = vmatprep.subr.bf16.mxu1 %v11186_v62  ;;  %v11265_v61 = vld [vmem:[#allocation2 + $0x7f0] ss:$48 sps:$4 sm:$0xff]   ;;  %v11270_v62 = vld [vmem:[#allocation2 + $0x144c] ss:$48 sps:$4 sm:$0xff]  }
 0x170   :  { %5102 = vmatprep.subr.bf16.mxu0 %v11189_v63  ;;  %v11273_v63 = vld [vmem:[#allocation2 + $0x854] ss:$48 sps:$4 sm:$0xff]  }
 0x172   :  { %5021 = vmatpush1.bf16.msra.mxu1 %v11184_v0 }
 0x173   :  { %5103 = vmatpush1.bf16.msra.mxu0 %v11187_v1  ;;  %5022 = vmatprep.subr.bf16.mxu1 %v11192_v2  ;;  %v11268_v2 = vld [vmem:[#allocation2 + $0x1448] ss:$48 sps:$4 sm:$0xff]  }
 0x174   :  { %5104 = vmatprep.subr.bf16.mxu0 %v11195_v3 }
 0x176   :  { %5023 = vmatpush1.bf16.msra.mxu1 %v11190_v4  ;;  %v11271_v4 = vld [vmem:[#allocation2 + $0x850] ss:$48 sps:$4 sm:$0xff]  }
 0x177   :  { %5105 = vmatpush1.bf16.msra.mxu0 %v11193_v5  ;;  %5024 = vmatprep.subr.bf16.mxu1 %v11198_v6  ;;  %v11276_v6 = vld [vmem:[#allocation2 + $0x14ac] ss:$48 sps:$4 sm:$0xff]  }
 0x178   :  { %5106 = vmatprep.subr.bf16.mxu0 %v11201_v7  ;;  %v11279_v7 = vld [vmem:[#allocation2 + $0x8b4] ss:$48 sps:$4 sm:$0xff]  }
 0x17a   :  { %5025 = vmatpush1.bf16.msra.mxu1 %v11196_v9  ;;  %v11274_v9 = vld [vmem:[#allocation2 + $0x14a8] ss:$48 sps:$4 sm:$0xff]  }
 0x17b   :  { %5107 = vmatpush1.bf16.msra.mxu0 %v11199_v10  ;;  %5026 = vmatprep.subr.bf16.mxu1 %v11204_v12  ;;  %v11277_v10 = vld [vmem:[#allocation2 + $0x8b0] ss:$48 sps:$4 sm:$0xff]   ;;  %v11282_v12 = vld [vmem:[#allocation2 + $0x150c] ss:$48 sps:$4 sm:$0xff]  }
 0x17c   :  { %5108 = vmatprep.subr.bf16.mxu0 %v11207_v13  ;;  %v11285_v13 = vld [vmem:[#allocation2 + $0x914] ss:$48 sps:$4 sm:$0xff]  }
 0x17e   :  { %5027 = vmatpush1.bf16.msra.mxu1 %v11202_v14  ;;  %v11280_v14 = vld [vmem:[#allocation2 + $0x1508] ss:$48 sps:$4 sm:$0xff]  }
 0x17f   :  { %5109 = vmatpush1.bf16.msra.mxu0 %v11205_v15  ;;  %5028 = vmatprep.subr.bf16.mxu1 %v11210_v16  ;;  %v11283_v15 = vld [vmem:[#allocation2 + $0x910] ss:$48 sps:$4 sm:$0xff]   ;;  %v11288_v16 = vld [vmem:[#allocation2 + $0x156c] ss:$48 sps:$4 sm:$0xff]  }
 0x180   :  { %5110 = vmatprep.subr.bf16.mxu0 %v11213_v18  ;;  %v11291_v18 = vld [vmem:[#allocation2 + $0x974] ss:$48 sps:$4 sm:$0xff]  }
 0x182   :  { %5029 = vmatpush1.bf16.msra.mxu1 %v11208_v19  ;;  %v11286_v19 = vld [vmem:[#allocation2 + $0x1568] ss:$48 sps:$4 sm:$0xff]  }
 0x183   :  { %5111 = vmatpush1.bf16.msra.mxu0 %v11211_v20  ;;  %5030 = vmatprep.subr.bf16.mxu1 %v11216_v21  ;;  %v11289_v20 = vld [vmem:[#allocation2 + $0x970] ss:$48 sps:$4 sm:$0xff]   ;;  %v11294_v21 = vld [vmem:[#allocation2 + $0x15cc] ss:$48 sps:$4 sm:$0xff]  }
 0x184   :  { %5112 = vmatprep.subr.bf16.mxu0 %v11219_v22  ;;  %v11297_v22 = vld [vmem:[#allocation2 + $0x9d4] ss:$48 sps:$4 sm:$0xff]  }
 0x186   :  { %5031 = vmatpush1.bf16.msra.mxu1 %v11214_v23  ;;  %v11292_v23 = vld [vmem:[#allocation2 + $0x15c8] ss:$48 sps:$4 sm:$0xff]  }
 0x187   :  { %5113 = vmatpush1.bf16.msra.mxu0 %v11217_v24  ;;  %5032 = vmatprep.subr.bf16.mxu1 %v11222_v26  ;;  %v11295_v24 = vld [vmem:[#allocation2 + $0x9d0] ss:$48 sps:$4 sm:$0xff]   ;;  %v11300_v26 = vld [vmem:[#allocation2 + $0x162c] ss:$48 sps:$4 sm:$0xff]  }
 0x188   :  { %5114 = vmatprep.subr.bf16.mxu0 %v11225_v27  ;;  %v11303_v27 = vld [vmem:[#allocation2 + $0xa34] ss:$48 sps:$4 sm:$0xff]  }
 0x18a   :  { %5033 = vmatpush1.bf16.msra.mxu1 %v11220_v29  ;;  %v11298_v29 = vld [vmem:[#allocation2 + $0x1628] ss:$48 sps:$4 sm:$0xff]  }
 0x18b   :  { %5115 = vmatpush1.bf16.msra.mxu0 %v11223_v30  ;;  %5034 = vmatprep.subr.bf16.mxu1 %v11228_v31  ;;  %v11301_v30 = vld [vmem:[#allocation2 + $0xa30] ss:$48 sps:$4 sm:$0xff]   ;;  %v11306_v31 = vld [vmem:[#allocation2 + $0x168c] ss:$48 sps:$4 sm:$0xff]  }
 0x18c   :  { %5116 = vmatprep.subr.bf16.mxu0 %v11231_v32  ;;  %v11309_v32 = vld [vmem:[#allocation2 + $0xa94] ss:$48 sps:$4 sm:$0xff]  }
 0x18e   :  { %5035 = vmatpush1.bf16.msra.mxu1 %v11226_v33  ;;  %v11304_v33 = vld [vmem:[#allocation2 + $0x1688] ss:$48 sps:$4 sm:$0xff]  }
 0x18f   :  { %5117 = vmatpush1.bf16.msra.mxu0 %v11229_v34  ;;  %5045 = vmatprep.subr.bf16.mxu1 %v11234_v35  ;;  %v11307_v34 = vld [vmem:[#allocation2 + $0xa90] ss:$48 sps:$4 sm:$0xff]   ;;  %v11312_v35 = vld [vmem:[#allocation2 + $0x16ec] ss:$48 sps:$4 sm:$0xff]  }
 0x190   :  { %5127 = vmatprep.subr.bf16.mxu0 %v11237_v37  ;;  %v11315_v37 = vld [vmem:[#allocation2 + $0xaf4] ss:$48 sps:$4 sm:$0xff]  }
 0x191   :  { %5037 = vmatmul.mubr.bf16.vlgmr.msra.gmra.mrb[4].mxu1 %v12510_v17 }
 0x192   :  { %5119 = vmatmul.mubr.bf16.vlgmr.msra.gmra.mrb[4].mxu0 %v12494_v8  ;;  %5046 = vmatpush1.bf16.msra.mxu1 %v11232_v38  ;;  %v11310_v38 = vld [vmem:[#allocation2 + $0x16e8] ss:$48 sps:$4 sm:$0xff]  }
 0x193   :  { %5128 = vmatpush1.bf16.msra.mxu0 %v11235_v39  ;;  %5047 = vmatprep.subr.bf16.mxu1 %v11240_v40  ;;  %v11313_v39 = vld [vmem:[#allocation2 + $0xaf0] ss:$48 sps:$4 sm:$0xff]   ;;  %v11318_v40 = vld [vmem:[#allocation2 + $0x174c] ss:$48 sps:$4 sm:$0xff]  }
 0x194   :  { %5129 = vmatprep.subr.bf16.mxu0 %v11243_v41  ;;  %5077 = vmatprep.mubr.bf16.mxu1 %v12517_v25  ;;  %v11321_v41 = vld [vmem:[#allocation2 + $0xb54] ss:$48 sps:$4 sm:$0xff]  }
 0x195   :  { %5159 = vmatprep.mubr.bf16.mxu0 %v12484_v52 }
 0x196   :  { %5048 = vmatpush1.bf16.msra.mxu1 %v11238_v42  ;;  %v11316_v42 = vld [vmem:[#allocation2 + $0x1748] ss:$48 sps:$4 sm:$0xff]  }
 0x197   :  { %5130 = vmatpush1.bf16.msra.mxu0 %v11241_v43  ;;  %5049 = vmatprep.subr.bf16.mxu1 %v11246_v44  ;;  %v11319_v43 = vld [vmem:[#allocation2 + $0xb50] ss:$48 sps:$4 sm:$0xff]   ;;  %v11324_v44 = vld [vmem:[#allocation2 + $0x17ac] ss:$48 sps:$4 sm:$0xff]  }
 0x198   :  { %5131 = vmatprep.subr.bf16.mxu0 %v11249_v45  ;;  %v11327_v45 = vld [vmem:[#allocation2 + $0xbb4] ss:$48 sps:$4 sm:$0xff]  }
 0x19a   :  { %5050 = vmatpush1.bf16.msra.mxu1 %v11244_v46  ;;  %v11322_v46 = vld [vmem:[#allocation2 + $0x17a8] ss:$48 sps:$4 sm:$0xff]  }
 0x19b   :  { %5132 = vmatpush1.bf16.msra.mxu0 %v11247_v47  ;;  %5051 = vmatprep.subr.bf16.mxu1 %v11252_v49  ;;  %v11325_v47 = vld [vmem:[#allocation2 + $0xbb0] ss:$48 sps:$4 sm:$0xff]   ;;  %v11330_v49 = vld [vmem:[#allocation2 + $0xc14] ss:$48 sps:$4 sm:$0xff]  }
 0x19c   :  { %5133 = vmatprep.subr.bf16.mxu0 %v11255_v50  ;;  %v11333_v50 = vld [vmem:[#allocation2 + $0x1c] ss:$48 sps:$4 sm:$0xff]  }
 0x19e   :  { %5052 = vmatpush1.bf16.msra.mxu1 %v11250_v51  ;;  %v11328_v51 = vld [vmem:[#allocation2 + $0xc10] ss:$48 sps:$4 sm:$0xff]  }
 0x19f   :  { %5134 = vmatpush1.bf16.msra.mxu0 %v11253_v53  ;;  %5053 = vmatprep.subr.bf16.mxu1 %v11258_v54  ;;  %v11331_v53 = vld [vmem:[#allocation2 + $0x18] ss:$48 sps:$4 sm:$0xff]   ;;  %v11336_v54 = vld [vmem:[#allocation2 + $0xc74] ss:$48 sps:$4 sm:$0xff]  }
 0x1a0   :  { %5135 = vmatprep.subr.bf16.mxu0 %v11261_v55  ;;  %v11339_v55 = vld [vmem:[#allocation2 + $0x7c] ss:$48 sps:$4 sm:$0xff]  }
 0x1a2   :  { %5054 = vmatpush1.bf16.msra.mxu1 %v11256_v56  ;;  %v11334_v56 = vld [vmem:[#allocation2 + $0xc70] ss:$48 sps:$4 sm:$0xff]  }
 0x1a3   :  { %5136 = vmatpush1.bf16.msra.mxu0 %v11259_v57  ;;  %5055 = vmatprep.subr.bf16.mxu1 %v11264_v58  ;;  %v11337_v57 = vld [vmem:[#allocation2 + $0x78] ss:$48 sps:$4 sm:$0xff]   ;;  %v11342_v58 = vld [vmem:[#allocation2 + $0xcd4] ss:$48 sps:$4 sm:$0xff]  }
 0x1a4   :  { %5137 = vmatprep.subr.bf16.mxu0 %v11267_v59  ;;  %v12534_v0 = vpop.f32.mrb[0].mxu1  ;;  %v11345_v59 = vld [vmem:[#allocation2 + $0xdc] ss:$48 sps:$4 sm:$0xff]  }
 0x1a5   :  { %v12536_v1 = vpop.f32.mrb[1].mxu1 }
 0x1a6   :  { %v4796_v3 = vpop.f32.mrb[2].mxu1  ;;  %5056 = vmatpush1.bf16.msra.mxu1 %v11262_v60  ;;  %v11340_v60 = vld [vmem:[#allocation2 + $0xcd0] ss:$48 sps:$4 sm:$0xff]  }
 0x1a7   :  { %5138 = vmatpush1.bf16.msra.mxu0 %v11265_v61  ;;  %v4797_v5 = vpop.f32.mrb[3].mxu1  ;;  %5057 = vmatprep.subr.bf16.mxu1 %v11270_v62  ;;  %v11343_v61 = vld [vmem:[#allocation2 + $0xd8] ss:$48 sps:$4 sm:$0xff]   ;;  %v11348_v62 = vld [vmem:[#allocation2 + $0xd34] ss:$48 sps:$4 sm:$0xff]  }
 0x1a8   :  { %5139 = vmatprep.subr.bf16.mxu0 %v11273_v63  ;;  %v11351_v63 = vld [vmem:[#allocation2 + $0x13c] ss:$48 sps:$4 sm:$0xff]   ;;  %v11349_v3 = vld [vmem:[#allocation2 + $0x138] ss:$48 sps:$4 sm:$0xff]  }
 0x1a9   :  { %v11357_v5 = vld [vmem:[#allocation2 + $0x19c] ss:$48 sps:$4 sm:$0xff]  }
 0x1aa   :  { %5058 = vmatpush1.bf16.msra.mxu1 %v11268_v2  ;;  %v11346_v2 = vld [vmem:[#allocation2 + $0xd30] ss:$48 sps:$4 sm:$0xff]  }
 0x1ab   :  { %5140 = vmatpush1.bf16.msra.mxu0 %v11271_v4  ;;  %5059 = vmatprep.subr.bf16.mxu1 %v11276_v6  ;;  %v11354_v4 = vld [vmem:[#allocation2 + $0xd94] ss:$48 sps:$4 sm:$0xff]   ;;  %v11352_v6 = vld [vmem:[#allocation2 + $0xd90] ss:$48 sps:$4 sm:$0xff]  }
 0x1ac   :  { %5141 = vmatprep.subr.bf16.mxu0 %v11279_v7  ;;  %v11355_v7 = vld [vmem:[#allocation2 + $0x198] ss:$48 sps:$4 sm:$0xff]  }
 0x1ae   :  { %5060 = vmatpush1.bf16.msra.mxu1 %v11274_v9  ;;  %v11360_v9 = vld [vmem:[#allocation2 + $0xdf4] ss:$48 sps:$4 sm:$0xff]  }
 0x1af   :  { %5142 = vmatpush1.bf16.msra.mxu0 %v11277_v10  ;;  %5061 = vmatprep.subr.bf16.mxu1 %v11282_v12  ;;  %v11363_v10 = vld [vmem:[#allocation2 + $0x1fc] ss:$48 sps:$4 sm:$0xff]   ;;  %v11358_v12 = vld [vmem:[#allocation2 + $0xdf0] ss:$48 sps:$4 sm:$0xff]  }
 0x1b0   :  { %5143 = vmatprep.subr.bf16.mxu0 %v11285_v13  ;;  %v11361_v13 = vld [vmem:[#allocation2 + $0x1f8] ss:$48 sps:$4 sm:$0xff]  }
 0x1b2   :  { %5062 = vmatpush1.bf16.msra.mxu1 %v11280_v14  ;;  %v11366_v14 = vld [vmem:[#allocation2 + $0xe54] ss:$48 sps:$4 sm:$0xff]  }
 0x1b3   :  { %5144 = vmatpush1.bf16.msra.mxu0 %v11283_v15  ;;  %5063 = vmatprep.subr.bf16.mxu1 %v11288_v16  ;;  %v11369_v15 = vld [vmem:[#allocation2 + $0x25c] ss:$48 sps:$4 sm:$0xff]   ;;  %v11364_v16 = vld [vmem:[#allocation2 + $0xe50] ss:$48 sps:$4 sm:$0xff]  }
 0x1b4   :  { %5145 = vmatprep.subr.bf16.mxu0 %v11291_v18  ;;  %v11367_v18 = vld [vmem:[#allocation2 + $0x258] ss:$48 sps:$4 sm:$0xff]  }
 0x1b6   :  { %5064 = vmatpush1.bf16.msra.mxu1 %v11286_v19  ;;  %v11372_v19 = vld [vmem:[#allocation2 + $0xeb4] ss:$48 sps:$4 sm:$0xff]  }
 0x1b7   :  { %5146 = vmatpush1.bf16.msra.mxu0 %v11289_v20  ;;  %5065 = vmatprep.subr.bf16.mxu1 %v11294_v21  ;;  %v11375_v20 = vld [vmem:[#allocation2 + $0x2bc] ss:$48 sps:$4 sm:$0xff]   ;;  %v11370_v21 = vld [vmem:[#allocation2 + $0xeb0] ss:$48 sps:$4 sm:$0xff]  }
 0x1b8   :  { %5147 = vmatprep.subr.bf16.mxu0 %v11297_v22  ;;  %v11373_v22 = vld [vmem:[#allocation2 + $0x2b8] ss:$48 sps:$4 sm:$0xff]  }
 0x1ba   :  { %5066 = vmatpush1.bf16.msra.mxu1 %v11292_v23  ;;  %v11378_v23 = vld [vmem:[#allocation2 + $0xf14] ss:$48 sps:$4 sm:$0xff]  }
 0x1bb   :  { %5148 = vmatpush1.bf16.msra.mxu0 %v11295_v24  ;;  %5067 = vmatprep.subr.bf16.mxu1 %v11300_v26  ;;  %v11381_v24 = vld [vmem:[#allocation2 + $0x31c] ss:$48 sps:$4 sm:$0xff]   ;;  %v11376_v26 = vld [vmem:[#allocation2 + $0xf10] ss:$48 sps:$4 sm:$0xff]  }
 0x1bc   :  { %5149 = vmatprep.subr.bf16.mxu0 %v11303_v27  ;;  %v11379_v27 = vld [vmem:[#allocation2 + $0x318] ss:$48 sps:$4 sm:$0xff]  }
 0x1be   :  { %5068 = vmatpush1.bf16.msra.mxu1 %v11298_v29  ;;  %v11384_v29 = vld [vmem:[#allocation2 + $0xf74] ss:$48 sps:$4 sm:$0xff]  }
 0x1bf   :  { %5150 = vmatpush1.bf16.msra.mxu0 %v11301_v30  ;;  %5069 = vmatprep.subr.bf16.mxu1 %v11306_v31  ;;  %v11387_v30 = vld [vmem:[#allocation2 + $0x37c] ss:$48 sps:$4 sm:$0xff]   ;;  %v11382_v31 = vld [vmem:[#allocation2 + $0xf70] ss:$48 sps:$4 sm:$0xff]  }
 0x1c0   :  { %5151 = vmatprep.subr.bf16.mxu0 %v11309_v32  ;;  %v11385_v32 = vld [vmem:[#allocation2 + $0x378] ss:$48 sps:$4 sm:$0xff]  }
 0x1c2   :  { %5070 = vmatpush1.bf16.msra.mxu1 %v11304_v33  ;;  %v11390_v33 = vld [vmem:[#allocation2 + $0xfd4] ss:$48 sps:$4 sm:$0xff]  }
 0x1c3   :  { %5152 = vmatpush1.bf16.msra.mxu0 %v11307_v34  ;;  %5071 = vmatprep.subr.bf16.mxu1 %v11312_v35  ;;  %v11393_v34 = vld [vmem:[#allocation2 + $0x3dc] ss:$48 sps:$4 sm:$0xff]   ;;  %v11388_v35 = vld [vmem:[#allocation2 + $0xfd0] ss:$48 sps:$4 sm:$0xff]  }
 0x1c4   :  { %5153 = vmatprep.subr.bf16.mxu0 %v11315_v37  ;;  %v11391_v37 = vld [vmem:[#allocation2 + $0x3d8] ss:$48 sps:$4 sm:$0xff]  }
 0x1c6   :  { %5072 = vmatpush1.bf16.msra.mxu1 %v11310_v38  ;;  %v11396_v38 = vld [vmem:[#allocation2 + $0x1034] ss:$48 sps:$4 sm:$0xff]  }
 0x1c7   :  { %5154 = vmatpush1.bf16.msra.mxu0 %v11313_v39  ;;  %5073 = vmatprep.subr.bf16.mxu1 %v11318_v40  ;;  %v11399_v39 = vld [vmem:[#allocation2 + $0x43c] ss:$48 sps:$4 sm:$0xff]   ;;  %v11394_v40 = vld [vmem:[#allocation2 + $0x1030] ss:$48 sps:$4 sm:$0xff]  }
 0x1c8   :  { %5155 = vmatprep.subr.bf16.mxu0 %v11321_v41  ;;  %v11397_v41 = vld [vmem:[#allocation2 + $0x438] ss:$48 sps:$4 sm:$0xff]  }
 0x1ca   :  { %5074 = vmatpush1.bf16.msra.mxu1 %v11316_v42  ;;  %v11402_v42 = vld [vmem:[#allocation2 + $0x1094] ss:$48 sps:$4 sm:$0xff]  }
 0x1cb   :  { %5156 = vmatpush1.bf16.msra.mxu0 %v11319_v43  ;;  %5075 = vmatprep.subr.bf16.mxu1 %v11324_v44  ;;  %v11405_v43 = vld [vmem:[#allocation2 + $0x49c] ss:$48 sps:$4 sm:$0xff]   ;;  %v11400_v44 = vld [vmem:[#allocation2 + $0x1090] ss:$48 sps:$4 sm:$0xff]  }
 0x1cc   :  { %5157 = vmatprep.subr.bf16.mxu0 %v11327_v45  ;;  %v11403_v45 = vld [vmem:[#allocation2 + $0x498] ss:$48 sps:$4 sm:$0xff]  }
 0x1ce   :  { %5076 = vmatpush1.bf16.msra.mxu1 %v11322_v46  ;;  %v11408_v46 = vld [vmem:[#allocation2 + $0x10f4] ss:$48 sps:$4 sm:$0xff]  }
 0x1cf   :  { %5158 = vmatpush1.bf16.msra.mxu0 %v11325_v47  ;;  %5250 = vmatprep.subr.bf16.mxu1 %v11333_v50  ;;  %v11411_v47 = vld [vmem:[#allocation2 + $0x4fc] ss:$48 sps:$4 sm:$0xff]   ;;  %v11409_v50 = vld [vmem:[#allocation2 + $0x4f8] ss:$48 sps:$4 sm:$0xff]  }
 0x1d0   :  { %5168 = vmatprep.subr.bf16.mxu0 %v11330_v49  ;;  %v11406_v49 = vld [vmem:[#allocation2 + $0x10f0] ss:$48 sps:$4 sm:$0xff]  }
 0x1d1   :  { %5078 = vmatmul.mubr.bf16.vlgmr.msra.gmra.mrb[4].mxu1 %v12524_v28 }
 0x1d2   :  { %5160 = vmatmul.mubr.bf16.vlgmr.msra.gmra.mrb[4].mxu0 %v12496_v11  ;;  %5251 = vmatpush1.bf16.msra.mxu1 %v11331_v53  ;;  %v11417_v53 = vld [vmem:[#allocation2 + $0x55c] ss:$48 sps:$4 sm:$0xff]  }
 0x1d3   :  { %5169 = vmatpush1.bf16.msra.mxu0 %v11328_v51  ;;  %5252 = vmatprep.subr.bf16.mxu1 %v11339_v55  ;;  %v11414_v51 = vld [vmem:[#allocation2 + $0x1154] ss:$48 sps:$4 sm:$0xff]   ;;  %v11415_v55 = vld [vmem:[#allocation2 + $0x558] ss:$48 sps:$4 sm:$0xff]  }
 0x1d4   :  { %5170 = vmatprep.subr.bf16.mxu0 %v11336_v54  ;;  %5200 = vmatprep.mubr.bf16.mxu0 %v12504_v36  ;;  %v11412_v54 = vld [vmem:[#allocation2 + $0x1150] ss:$48 sps:$4 sm:$0xff]  }
 0x1d5   :  { %5282 = vmatprep.mubr.bf16.mxu1 %v12479_v48 }
 0x1d6   :  { %5253 = vmatpush1.bf16.msra.mxu1 %v11337_v57  ;;  %v11423_v57 = vld [vmem:[#allocation2 + $0x5bc] ss:$48 sps:$4 sm:$0xff]  }
 0x1d7   :  { %5171 = vmatpush1.bf16.msra.mxu0 %v11334_v56  ;;  %5254 = vmatprep.subr.bf16.mxu1 %v11345_v59  ;;  %v11420_v56 = vld [vmem:[#allocation2 + $0x11b4] ss:$48 sps:$4 sm:$0xff]   ;;  %v11421_v59 = vld [vmem:[#allocation2 + $0x5b8] ss:$48 sps:$4 sm:$0xff]  }
 0x1d8   :  { %5172 = vmatprep.subr.bf16.mxu0 %v11342_v58  ;;  %v11418_v58 = vld [vmem:[#allocation2 + $0x11b0] ss:$48 sps:$4 sm:$0xff]  }
 0x1da   :  { %5255 = vmatpush1.bf16.msra.mxu1 %v11343_v61  ;;  %v11429_v61 = vld [vmem:[#allocation2 + $0x61c] ss:$48 sps:$4 sm:$0xff]  }
 0x1db   :  { %5173 = vmatpush1.bf16.msra.mxu0 %v11340_v60  ;;  %5256 = vmatprep.subr.bf16.mxu1 %v11351_v63  ;;  %v11426_v60 = vld [vmem:[#allocation2 + $0x1214] ss:$48 sps:$4 sm:$0xff]   ;;  %v11427_v63 = vld [vmem:[#allocation2 + $0x618] ss:$48 sps:$4 sm:$0xff]  }
 0x1dc   :  { %5174 = vmatprep.subr.bf16.mxu0 %v11348_v62  ;;  %v11424_v62 = vld [vmem:[#allocation2 + $0x1210] ss:$48 sps:$4 sm:$0xff]  }
 0x1de   :  { %5257 = vmatpush1.bf16.msra.mxu1 %v11349_v3  ;;  %v11435_v3 = vld [vmem:[#allocation2 + $0x67c] ss:$48 sps:$4 sm:$0xff]  }
 0x1df   :  { %5175 = vmatpush1.bf16.msra.mxu0 %v11346_v2  ;;  %5258 = vmatprep.subr.bf16.mxu1 %v11357_v5  ;;  %v11432_v2 = vld [vmem:[#allocation2 + $0x1274] ss:$48 sps:$4 sm:$0xff]   ;;  %v11433_v5 = vld [vmem:[#allocation2 + $0x678] ss:$48 sps:$4 sm:$0xff]  }
 0x1e0   :  { %5176 = vmatprep.subr.bf16.mxu0 %v11354_v4  ;;  %v11430_v4 = vld [vmem:[#allocation2 + $0x1270] ss:$48 sps:$4 sm:$0xff]  }
 0x1e2   :  { %5259 = vmatpush1.bf16.msra.mxu1 %v11355_v7  ;;  %v11441_v7 = vld [vmem:[#allocation2 + $0x6dc] ss:$48 sps:$4 sm:$0xff]  }
 0x1e3   :  { %5177 = vmatpush1.bf16.msra.mxu0 %v11352_v6  ;;  %5260 = vmatprep.subr.bf16.mxu1 %v11363_v10  ;;  %v11438_v6 = vld [vmem:[#allocation2 + $0x12d4] ss:$48 sps:$4 sm:$0xff]   ;;  %v11439_v10 = vld [vmem:[#allocation2 + $0x6d8] ss:$48 sps:$4 sm:$0xff]  }
 0x1e4   :  { %5178 = vmatprep.subr.bf16.mxu0 %v11360_v9  ;;  %v11436_v9 = vld [vmem:[#allocation2 + $0x12d0] ss:$48 sps:$4 sm:$0xff]  }
 0x1e6   :  { %5261 = vmatpush1.bf16.msra.mxu1 %v11361_v13  ;;  %v11447_v13 = vld [vmem:[#allocation2 + $0x73c] ss:$48 sps:$4 sm:$0xff]  }
 0x1e7   :  { %5179 = vmatpush1.bf16.msra.mxu0 %v11358_v12  ;;  %5262 = vmatprep.subr.bf16.mxu1 %v11369_v15  ;;  %v11444_v12 = vld [vmem:[#allocation2 + $0x1334] ss:$48 sps:$4 sm:$0xff]   ;;  %v11445_v15 = vld [vmem:[#allocation2 + $0x738] ss:$48 sps:$4 sm:$0xff]  }
 0x1e8   :  { %5180 = vmatprep.subr.bf16.mxu0 %v11366_v14  ;;  %v11442_v14 = vld [vmem:[#allocation2 + $0x1330] ss:$48 sps:$4 sm:$0xff]  }
 0x1ea   :  { %5263 = vmatpush1.bf16.msra.mxu1 %v11367_v18  ;;  %v11453_v18 = vld [vmem:[#allocation2 + $0x79c] ss:$48 sps:$4 sm:$0xff]  }
 0x1eb   :  { %5181 = vmatpush1.bf16.msra.mxu0 %v11364_v16  ;;  %5264 = vmatprep.subr.bf16.mxu1 %v11375_v20  ;;  %v11450_v16 = vld [vmem:[#allocation2 + $0x1394] ss:$48 sps:$4 sm:$0xff]   ;;  %v11451_v20 = vld [vmem:[#allocation2 + $0x798] ss:$48 sps:$4 sm:$0xff]  }
 0x1ec   :  { %5182 = vmatprep.subr.bf16.mxu0 %v11372_v19  ;;  %v11448_v19 = vld [vmem:[#allocation2 + $0x1390] ss:$48 sps:$4 sm:$0xff]  }
 0x1ee   :  { %5265 = vmatpush1.bf16.msra.mxu1 %v11373_v22  ;;  %v11459_v22 = vld [vmem:[#allocation2 + $0x7fc] ss:$48 sps:$4 sm:$0xff]  }
 0x1ef   :  { %5183 = vmatpush1.bf16.msra.mxu0 %v11370_v21  ;;  %5266 = vmatprep.subr.bf16.mxu1 %v11381_v24  ;;  %v11456_v21 = vld [vmem:[#allocation2 + $0x13f4] ss:$48 sps:$4 sm:$0xff]   ;;  %v11457_v24 = vld [vmem:[#allocation2 + $0x7f8] ss:$48 sps:$4 sm:$0xff]  }
 0x1f0   :  { %5184 = vmatprep.subr.bf16.mxu0 %v11378_v23  ;;  %v11454_v23 = vld [vmem:[#allocation2 + $0x13f0] ss:$48 sps:$4 sm:$0xff]  }
 0x1f2   :  { %5267 = vmatpush1.bf16.msra.mxu1 %v11379_v27  ;;  %v11465_v27 = vld [vmem:[#allocation2 + $0x85c] ss:$48 sps:$4 sm:$0xff]  }
 0x1f3   :  { %5185 = vmatpush1.bf16.msra.mxu0 %v11376_v26  ;;  %5268 = vmatprep.subr.bf16.mxu1 %v11387_v30  ;;  %v11462_v26 = vld [vmem:[#allocation2 + $0x1454] ss:$48 sps:$4 sm:$0xff]   ;;  %v11460_v30 = vld [vmem:[#allocation2 + $0x1450] ss:$48 sps:$4 sm:$0xff]  }
 0x1f4   :  { %5186 = vmatprep.subr.bf16.mxu0 %v11384_v29 }
 0x1f6   :  { %5269 = vmatpush1.bf16.msra.mxu1 %v11385_v32 }
 0x1f7   :  { %5187 = vmatpush1.bf16.msra.mxu0 %v11382_v31  ;;  %5270 = vmatprep.subr.bf16.mxu1 %v11393_v34  ;;  %v11463_v31 = vld [vmem:[#allocation2 + $0x858] ss:$48 sps:$4 sm:$0xff]  }
 0x1f8   :  { %5188 = vmatprep.subr.bf16.mxu0 %v11390_v33 }
 0x1fa   :  { %5271 = vmatpush1.bf16.msra.mxu1 %v11391_v37 }
 0x1fb   :  { %5189 = vmatpush1.bf16.msra.mxu0 %v11388_v35  ;;  %5272 = vmatprep.subr.bf16.mxu1 %v11399_v39  ;;  %v11471_v39 = vld [vmem:[#allocation2 + $0x8bc] ss:$48 sps:$4 sm:$0xff]  }
 0x1fc   :  { %5190 = vmatprep.subr.bf16.mxu0 %v11396_v38  ;;  %v11468_v38 = vld [vmem:[#allocation2 + $0x14b4] ss:$48 sps:$4 sm:$0xff]  }
 0x1fe   :  { %5273 = vmatpush1.bf16.msra.mxu1 %v11397_v41  ;;  %v11469_v41 = vld [vmem:[#allocation2 + $0x8b8] ss:$48 sps:$4 sm:$0xff]  }
 0x1ff   :  { %5191 = vmatpush1.bf16.msra.mxu0 %v11394_v40  ;;  %5274 = vmatprep.subr.bf16.mxu1 %v11405_v43  ;;  %v11466_v40 = vld [vmem:[#allocation2 + $0x14b0] ss:$48 sps:$4 sm:$0xff]   ;;  %v11475_v43 = vld [vmem:[#allocation2 + $0x918] ss:$48 sps:$4 sm:$0xff]  }
 0x200   :  { %5192 = vmatprep.subr.bf16.mxu0 %v11402_v42  ;;  %v11477_v42 = vld [vmem:[#allocation2 + $0x91c] ss:$48 sps:$4 sm:$0xff]  }
 0x202   :  { %5275 = vmatpush1.bf16.msra.mxu1 %v11403_v45  ;;  %v11483_v45 = vld [vmem:[#allocation2 + $0x97c] ss:$48 sps:$4 sm:$0xff]  }
 0x203   :  { %5193 = vmatpush1.bf16.msra.mxu0 %v11400_v44  ;;  %5276 = vmatprep.subr.bf16.mxu1 %v11411_v47  ;;  %v11480_v44 = vld [vmem:[#allocation2 + $0x1574] ss:$48 sps:$4 sm:$0xff]   ;;  %v11481_v47 = vld [vmem:[#allocation2 + $0x978] ss:$48 sps:$4 sm:$0xff]  }
 0x204   :  { %5194 = vmatprep.subr.bf16.mxu0 %v11408_v46  ;;  %v11478_v46 = vld [vmem:[#allocation2 + $0x1570] ss:$48 sps:$4 sm:$0xff]  }
 0x206   :  { %5277 = vmatpush1.bf16.msra.mxu1 %v11409_v50  ;;  %v11489_v50 = vld [vmem:[#allocation2 + $0x9dc] ss:$48 sps:$4 sm:$0xff]  }
 0x207   :  { %5195 = vmatpush1.bf16.msra.mxu0 %v11406_v49  ;;  %5278 = vmatprep.subr.bf16.mxu1 %v11417_v53  ;;  %v11486_v49 = vld [vmem:[#allocation2 + $0x15d4] ss:$48 sps:$4 sm:$0xff]   ;;  %v11487_v53 = vld [vmem:[#allocation2 + $0x9d8] ss:$48 sps:$4 sm:$0xff]  }
 0x208   :  { %5196 = vmatprep.subr.bf16.mxu0 %v11414_v51  ;;  %v11484_v51 = vld [vmem:[#allocation2 + $0x15d0] ss:$48 sps:$4 sm:$0xff]  }
 0x20a   :  { %5279 = vmatpush1.bf16.msra.mxu1 %v11415_v55  ;;  %v11495_v55 = vld [vmem:[#allocation2 + $0xa3c] ss:$48 sps:$4 sm:$0xff]  }
 0x20b   :  { %5197 = vmatpush1.bf16.msra.mxu0 %v11412_v54  ;;  %5280 = vmatprep.subr.bf16.mxu1 %v11423_v57  ;;  %v11492_v54 = vld [vmem:[#allocation2 + $0x1634] ss:$48 sps:$4 sm:$0xff]   ;;  %v11493_v57 = vld [vmem:[#allocation2 + $0xa38] ss:$48 sps:$4 sm:$0xff]  }
 0x20c   :  { %5198 = vmatprep.subr.bf16.mxu0 %v11420_v56  ;;  %v11490_v56 = vld [vmem:[#allocation2 + $0x1630] ss:$48 sps:$4 sm:$0xff]  }
 0x20e   :  { %5281 = vmatpush1.bf16.msra.mxu1 %v11421_v59  ;;  %v11501_v59 = vld [vmem:[#allocation2 + $0xa9c] ss:$48 sps:$4 sm:$0xff]  }
 0x20f   :  { %5199 = vmatpush1.bf16.msra.mxu0 %v11418_v58  ;;  %5291 = vmatprep.subr.bf16.mxu1 %v11429_v61  ;;  %v11498_v58 = vld [vmem:[#allocation2 + $0x1694] ss:$48 sps:$4 sm:$0xff]   ;;  %v11499_v61 = vld [vmem:[#allocation2 + $0xa98] ss:$48 sps:$4 sm:$0xff]  }
 0x210   :  { %5209 = vmatprep.subr.bf16.mxu0 %v11426_v60  ;;  %v11496_v60 = vld [vmem:[#allocation2 + $0x1690] ss:$48 sps:$4 sm:$0xff]  }
 0x211   :  { %5283 = vmatmul.mubr.bf16.vlgmr.msra.gmra.mrb[8].mxu1 %v12494_v8 }
 0x212   :  { %5201 = vmatmul.mubr.bf16.vlgmr.msra.gmra.mrb[4].mxu0 %v12510_v17  ;;  %5292 = vmatpush1.bf16.msra.mxu1 %v11427_v63  ;;  %v11507_v63 = vld [vmem:[#allocation2 + $0xafc] ss:$48 sps:$4 sm:$0xff]  }
 0x213   :  { %5210 = vmatpush1.bf16.msra.mxu0 %v11424_v62  ;;  %5293 = vmatprep.subr.bf16.mxu1 %v11435_v3  ;;  %v11504_v62 = vld [vmem:[#allocation2 + $0x16f4] ss:$48 sps:$4 sm:$0xff]   ;;  %v11505_v3 = vld [vmem:[#allocation2 + $0xaf8] ss:$48 sps:$4 sm:$0xff]  }
 0x214   :  { %5211 = vmatprep.subr.bf16.mxu0 %v11432_v2  ;;  %5241 = vmatprep.mubr.bf16.mxu0 %v12517_v25  ;;  %v11502_v2 = vld [vmem:[#allocation2 + $0x16f0] ss:$48 sps:$4 sm:$0xff]  }
 0x215   :  { %5323 = vmatprep.mubr.bf16.mxu1 %v12484_v52 }
 0x216   :  { %5294 = vmatpush1.bf16.msra.mxu1 %v11433_v5  ;;  %v11513_v5 = vld [vmem:[#allocation2 + $0xb5c] ss:$48 sps:$4 sm:$0xff]  }
 0x217   :  { %5212 = vmatpush1.bf16.msra.mxu0 %v11430_v4  ;;  %5295 = vmatprep.subr.bf16.mxu1 %v11441_v7  ;;  %v11510_v4 = vld [vmem:[#allocation2 + $0x1754] ss:$48 sps:$4 sm:$0xff]   ;;  %v11511_v7 = vld [vmem:[#allocation2 + $0xb58] ss:$48 sps:$4 sm:$0xff]  }
 0x218   :  { %5213 = vmatprep.subr.bf16.mxu0 %v11438_v6  ;;  %v11508_v6 = vld [vmem:[#allocation2 + $0x1750] ss:$48 sps:$4 sm:$0xff]  }
 0x21a   :  { %5296 = vmatpush1.bf16.msra.mxu1 %v11439_v10  ;;  %v11519_v10 = vld [vmem:[#allocation2 + $0xbbc] ss:$48 sps:$4 sm:$0xff]  }
 0x21b   :  { %5214 = vmatpush1.bf16.msra.mxu0 %v11436_v9  ;;  %5297 = vmatprep.subr.bf16.mxu1 %v11447_v13  ;;  %v11516_v9 = vld [vmem:[#allocation2 + $0x17b4] ss:$48 sps:$4 sm:$0xff]   ;;  %v11517_v13 = vld [vmem:[#allocation2 + $0xbb8] ss:$48 sps:$4 sm:$0xff]  }
 0x21c   :  { %5215 = vmatprep.subr.bf16.mxu0 %v11444_v12  ;;  %v11514_v12 = vld [vmem:[#allocation2 + $0x17b0] ss:$48 sps:$4 sm:$0xff]  }
 0x21e   :  { %5298 = vmatpush1.bf16.msra.mxu1 %v11445_v15  ;;  %v11525_v15 = vld [vmem:[#allocation2 + $0x24] ss:$48 sps:$4 sm:$0xff]  }
 0x21f   :  { %5216 = vmatpush1.bf16.msra.mxu0 %v11442_v14  ;;  %5299 = vmatprep.subr.bf16.mxu1 %v11453_v18  ;;  %v11522_v14 = vld [vmem:[#allocation2 + $0xc1c] ss:$48 sps:$4 sm:$0xff]   ;;  %v11523_v18 = vld [vmem:[#allocation2 + $0x20] ss:$48 sps:$4 sm:$0xff]  }
 0x220   :  { %5217 = vmatprep.subr.bf16.mxu0 %v11450_v16  ;;  %v11520_v16 = vld [vmem:[#allocation2 + $0xc18] ss:$48 sps:$4 sm:$0xff]  }
 0x222   :  { %5300 = vmatpush1.bf16.msra.mxu1 %v11451_v20  ;;  %v11531_v20 = vld [vmem:[#allocation2 + $0x84] ss:$48 sps:$4 sm:$0xff]  }
 0x223   :  { %5218 = vmatpush1.bf16.msra.mxu0 %v11448_v19  ;;  %5301 = vmatprep.subr.bf16.mxu1 %v11459_v22  ;;  %v11528_v19 = vld [vmem:[#allocation2 + $0xc7c] ss:$48 sps:$4 sm:$0xff]   ;;  %v11529_v22 = vld [vmem:[#allocation2 + $0x80] ss:$48 sps:$4 sm:$0xff]  }
 0x224   :  { %5219 = vmatprep.subr.bf16.mxu0 %v11456_v21  ;;  %v11526_v21 = vld [vmem:[#allocation2 + $0xc78] ss:$48 sps:$4 sm:$0xff]  }
 0x225   :  { %v4915_v29 = vpop.f32.mrb[0].mxu0 }
 0x226   :  { %v12547_v32 = vadd.f32 %v4915_v29, %v12534_v0  ;;  %v4917_v33 = vpop.f32.mrb[1].mxu0  ;;  %5302 = vmatpush1.bf16.msra.mxu1 %v11457_v24  ;;  %v11474_v0 = vld [vmem:[#allocation2 + $0x1514] ss:$48 sps:$4 sm:$0xff]   ;;  %v11540_v29 = vld [vmem:[#allocation2 + $0xd3c] ss:$48 sps:$4 sm:$0xff]  }
 0x227   :  { %v12550_v34 = vadd.f32 %v4917_v33, %v12536_v1  ;;  %v4919_v35 = vpop.f32.mrb[2].mxu0  ;;  %5220 = vmatpush1.bf16.msra.mxu0 %v11454_v23  ;;  %5303 = vmatprep.subr.bf16.mxu1 %v11465_v27  ;;  %v11472_v1 = vld [vmem:[#allocation2 + $0x1510] ss:$48 sps:$4 sm:$0xff]   ;;  %v11534_v23 = vld [vmem:[#allocation2 + $0xcdc] ss:$48 sps:$4 sm:$0xff]  }
 0x228   :  { %v4920_v37 = vpop.f32.mrb[3].mxu0  ;;  %5221 = vmatprep.subr.bf16.mxu0 %v11462_v26  ;;  %v11537_v24 = vld [vmem:[#allocation2 + $0xe4] ss:$48 sps:$4 sm:$0xff]   ;;  %v11532_v26 = vld [vmem:[#allocation2 + $0xcd8] ss:$48 sps:$4 sm:$0xff]  }
 0x229   :  { %v11535_v27 = vld [vmem:[#allocation2 + $0xe0] ss:$48 sps:$4 sm:$0xff]   ;;  %v11546_v35 = vld [vmem:[#allocation2 + $0xd9c] ss:$48 sps:$4 sm:$0xff]   ;;  %v11549_v37 = vld [vmem:[#allocation2 + $0x1a4] ss:$48 sps:$4 sm:$0xff]  }
 0x22a   :  { %5304 = vmatpush1.bf16.msra.mxu1 %v11463_v31  ;;  %v11538_v31 = vld [vmem:[#allocation2 + $0xd38] ss:$48 sps:$4 sm:$0xff]   ;;  %v11541_v33 = vld [vmem:[#allocation2 + $0x140] ss:$48 sps:$4 sm:$0xff]  }
 0x22b   :  { %5222 = vmatpush1.bf16.msra.mxu0 %v11460_v30  ;;  %5305 = vmatprep.subr.bf16.mxu1 %v11471_v39  ;;  %v11543_v30 = vld [vmem:[#allocation2 + $0x144] ss:$48 sps:$4 sm:$0xff]   ;;  %v11547_v39 = vld [vmem:[#allocation2 + $0x1a0] ss:$48 sps:$4 sm:$0xff]  }
 0x22c   :  { %5223 = vmatprep.subr.bf16.mxu0 %v11468_v38  ;;  %v11544_v38 = vld [vmem:[#allocation2 + $0xd98] ss:$48 sps:$4 sm:$0xff]  }
 0x22e   :  { %5306 = vmatpush1.bf16.msra.mxu1 %v11469_v41  ;;  %v11555_v41 = vld [vmem:[#allocation2 + $0x204] ss:$48 sps:$4 sm:$0xff]  }
 0x22f   :  { %5224 = vmatpush1.bf16.msra.mxu0 %v11466_v40  ;;  %5307 = vmatprep.subr.bf16.mxu1 %v11477_v42  ;;  %v11552_v40 = vld [vmem:[#allocation2 + $0xdfc] ss:$48 sps:$4 sm:$0xff]   ;;  %v11553_v42 = vld [vmem:[#allocation2 + $0x200] ss:$48 sps:$4 sm:$0xff]  }
 0x230   :  { %5225 = vmatprep.subr.bf16.mxu0 %v11474_v0  ;;  %v11550_v0 = vld [vmem:[#allocation2 + $0xdf8] ss:$48 sps:$4 sm:$0xff]  }
 0x232   :  { %5308 = vmatpush1.bf16.msra.mxu1 %v11475_v43  ;;  %v11561_v43 = vld [vmem:[#allocation2 + $0x264] ss:$48 sps:$4 sm:$0xff]  }
 0x233   :  { %5226 = vmatpush1.bf16.msra.mxu0 %v11472_v1  ;;  %5309 = vmatprep.subr.bf16.mxu1 %v11483_v45  ;;  %v11558_v1 = vld [vmem:[#allocation2 + $0xe5c] ss:$48 sps:$4 sm:$0xff]   ;;  %v11559_v45 = vld [vmem:[#allocation2 + $0x260] ss:$48 sps:$4 sm:$0xff]  }
 0x234   :  { %5227 = vmatprep.subr.bf16.mxu0 %v11480_v44  ;;  %v11556_v44 = vld [vmem:[#allocation2 + $0xe58] ss:$48 sps:$4 sm:$0xff]  }
 0x236   :  { %5310 = vmatpush1.bf16.msra.mxu1 %v11481_v47  ;;  %v11567_v47 = vld [vmem:[#allocation2 + $0x2c4] ss:$48 sps:$4 sm:$0xff]  }
 0x237   :  { %5228 = vmatpush1.bf16.msra.mxu0 %v11478_v46  ;;  %5311 = vmatprep.subr.bf16.mxu1 %v11489_v50  ;;  %v11564_v46 = vld [vmem:[#allocation2 + $0xebc] ss:$48 sps:$4 sm:$0xff]   ;;  %v11565_v50 = vld [vmem:[#allocation2 + $0x2c0] ss:$48 sps:$4 sm:$0xff]  }
 0x238   :  { %5229 = vmatprep.subr.bf16.mxu0 %v11486_v49  ;;  %v11562_v49 = vld [vmem:[#allocation2 + $0xeb8] ss:$48 sps:$4 sm:$0xff]  }
 0x23a   :  { %5312 = vmatpush1.bf16.msra.mxu1 %v11487_v53  ;;  %v11573_v53 = vld [vmem:[#allocation2 + $0x324] ss:$48 sps:$4 sm:$0xff]  }
 0x23b   :  { %5230 = vmatpush1.bf16.msra.mxu0 %v11484_v51  ;;  %5313 = vmatprep.subr.bf16.mxu1 %v11495_v55  ;;  %v11570_v51 = vld [vmem:[#allocation2 + $0xf1c] ss:$48 sps:$4 sm:$0xff]   ;;  %v11571_v55 = vld [vmem:[#allocation2 + $0x320] ss:$48 sps:$4 sm:$0xff]  }
 0x23c   :  { %5231 = vmatprep.subr.bf16.mxu0 %v11492_v54  ;;  %v11568_v54 = vld [vmem:[#allocation2 + $0xf18] ss:$48 sps:$4 sm:$0xff]  }
 0x23e   :  { %5314 = vmatpush1.bf16.msra.mxu1 %v11493_v57  ;;  %v11579_v57 = vld [vmem:[#allocation2 + $0x384] ss:$48 sps:$4 sm:$0xff]  }
 0x23f   :  { %5232 = vmatpush1.bf16.msra.mxu0 %v11490_v56  ;;  %5315 = vmatprep.subr.bf16.mxu1 %v11501_v59  ;;  %v11576_v56 = vld [vmem:[#allocation2 + $0xf7c] ss:$48 sps:$4 sm:$0xff]   ;;  %v11577_v59 = vld [vmem:[#allocation2 + $0x380] ss:$48 sps:$4 sm:$0xff]  }
 0x240   :  { %5233 = vmatprep.subr.bf16.mxu0 %v11498_v58  ;;  %v11574_v58 = vld [vmem:[#allocation2 + $0xf78] ss:$48 sps:$4 sm:$0xff]  }
 0x242   :  { %5316 = vmatpush1.bf16.msra.mxu1 %v11499_v61  ;;  %v11585_v61 = vld [vmem:[#allocation2 + $0x3e4] ss:$48 sps:$4 sm:$0xff]  }
 0x243   :  { %5234 = vmatpush1.bf16.msra.mxu0 %v11496_v60  ;;  %5317 = vmatprep.subr.bf16.mxu1 %v11507_v63  ;;  %v11582_v60 = vld [vmem:[#allocation2 + $0xfdc] ss:$48 sps:$4 sm:$0xff]   ;;  %v11583_v63 = vld [vmem:[#allocation2 + $0x3e0] ss:$48 sps:$4 sm:$0xff]  }
 0x244   :  { %5235 = vmatprep.subr.bf16.mxu0 %v11504_v62  ;;  %v11580_v62 = vld [vmem:[#allocation2 + $0xfd8] ss:$48 sps:$4 sm:$0xff]  }
 0x246   :  { %5318 = vmatpush1.bf16.msra.mxu1 %v11505_v3  ;;  %v11591_v3 = vld [vmem:[#allocation2 + $0x444] ss:$48 sps:$4 sm:$0xff]  }
 0x247   :  { %5236 = vmatpush1.bf16.msra.mxu0 %v11502_v2  ;;  %5319 = vmatprep.subr.bf16.mxu1 %v11513_v5  ;;  %v11588_v2 = vld [vmem:[#allocation2 + $0x103c] ss:$48 sps:$4 sm:$0xff]   ;;  %v11589_v5 = vld [vmem:[#allocation2 + $0x440] ss:$48 sps:$4 sm:$0xff]  }
 0x248   :  { %5237 = vmatprep.subr.bf16.mxu0 %v11510_v4  ;;  %v11586_v4 = vld [vmem:[#allocation2 + $0x1038] ss:$48 sps:$4 sm:$0xff]  }
 0x24a   :  { %5320 = vmatpush1.bf16.msra.mxu1 %v11511_v7  ;;  %v11597_v7 = vld [vmem:[#allocation2 + $0x4a4] ss:$48 sps:$4 sm:$0xff]  }
 0x24b   :  { %5238 = vmatpush1.bf16.msra.mxu0 %v11508_v6  ;;  %5321 = vmatprep.subr.bf16.mxu1 %v11519_v10  ;;  %v11594_v6 = vld [vmem:[#allocation2 + $0x109c] ss:$48 sps:$4 sm:$0xff]   ;;  %v11595_v10 = vld [vmem:[#allocation2 + $0x4a0] ss:$48 sps:$4 sm:$0xff]  }
 0x24c   :  { %5239 = vmatprep.subr.bf16.mxu0 %v11516_v9  ;;  %v11592_v9 = vld [vmem:[#allocation2 + $0x1098] ss:$48 sps:$4 sm:$0xff]  }
 0x24e   :  { %5322 = vmatpush1.bf16.msra.mxu1 %v11517_v13  ;;  %v11603_v13 = vld [vmem:[#allocation2 + $0x504] ss:$48 sps:$4 sm:$0xff]  }
 0x24f   :  { %5240 = vmatpush1.bf16.msra.mxu0 %v11514_v12  ;;  %5332 = vmatprep.subr.bf16.mxu1 %v11522_v14  ;;  %v11600_v12 = vld [vmem:[#allocation2 + $0x10fc] ss:$48 sps:$4 sm:$0xff]   ;;  %v11598_v14 = vld [vmem:[#allocation2 + $0x10f8] ss:$48 sps:$4 sm:$0xff]  }
 0x250   :  { %5414 = vmatprep.subr.bf16.mxu0 %v11525_v15  ;;  %v11601_v15 = vld [vmem:[#allocation2 + $0x500] ss:$48 sps:$4 sm:$0xff]  }
 0x251   :  { %5324 = vmatmul.mubr.bf16.vlgmr.msra.gmra.mrb[8].mxu1 %v12496_v11 }
 0x252   :  { %5242 = vmatmul.mubr.bf16.vlgmr.msra.gmra.mrb[4].mxu0 %v12524_v28  ;;  %5333 = vmatpush1.bf16.msra.mxu1 %v11520_v16  ;;  %v11606_v16 = vld [vmem:[#allocation2 + $0x115c] ss:$48 sps:$4 sm:$0xff]  }
 0x253   :  { %5415 = vmatpush1.bf16.msra.mxu0 %v11523_v18  ;;  %5334 = vmatprep.subr.bf16.mxu1 %v11528_v19  ;;  %v11609_v18 = vld [vmem:[#allocation2 + $0x564] ss:$48 sps:$4 sm:$0xff]   ;;  %v11604_v19 = vld [vmem:[#allocation2 + $0x1158] ss:$48 sps:$4 sm:$0xff]  }
 0x254   :  { %5416 = vmatprep.subr.bf16.mxu0 %v11531_v20  ;;  %5364 = vmatprep.mubr.bf16.mxu1 %v12504_v36  ;;  %v11607_v20 = vld [vmem:[#allocation2 + $0x560] ss:$48 sps:$4 sm:$0xff]  }
 0x255   :  { %5446 = vmatprep.mubr.bf16.mxu0 %v12479_v48 }
 0x256   :  { %5335 = vmatpush1.bf16.msra.mxu1 %v11526_v21  ;;  %v11612_v21 = vld [vmem:[#allocation2 + $0x11bc] ss:$48 sps:$4 sm:$0xff]  }
 0x257   :  { %5417 = vmatpush1.bf16.msra.mxu0 %v11529_v22  ;;  %5336 = vmatprep.subr.bf16.mxu1 %v11534_v23  ;;  %v11615_v22 = vld [vmem:[#allocation2 + $0x5c4] ss:$48 sps:$4 sm:$0xff]   ;;  %v11610_v23 = vld [vmem:[#allocation2 + $0x11b8] ss:$48 sps:$4 sm:$0xff]  }
 0x258   :  { %5418 = vmatprep.subr.bf16.mxu0 %v11537_v24  ;;  %v11613_v24 = vld [vmem:[#allocation2 + $0x5c0] ss:$48 sps:$4 sm:$0xff]  }
 0x25a   :  { %5337 = vmatpush1.bf16.msra.mxu1 %v11532_v26  ;;  %v11618_v26 = vld [vmem:[#allocation2 + $0x121c] ss:$48 sps:$4 sm:$0xff]  }
 0x25b   :  { %5419 = vmatpush1.bf16.msra.mxu0 %v11535_v27  ;;  %5338 = vmatprep.subr.bf16.mxu1 %v11540_v29  ;;  %v11621_v27 = vld [vmem:[#allocation2 + $0x624] ss:$48 sps:$4 sm:$0xff]   ;;  %v11616_v29 = vld [vmem:[#allocation2 + $0x1218] ss:$48 sps:$4 sm:$0xff]  }
 0x25c   :  { %5420 = vmatprep.subr.bf16.mxu0 %v11543_v30  ;;  %v11619_v30 = vld [vmem:[#allocation2 + $0x620] ss:$48 sps:$4 sm:$0xff]  }
 0x25e   :  { %5339 = vmatpush1.bf16.msra.mxu1 %v11538_v31  ;;  %v11624_v31 = vld [vmem:[#allocation2 + $0x127c] ss:$48 sps:$4 sm:$0xff]  }
 0x25f   :  { %5421 = vmatpush1.bf16.msra.mxu0 %v11541_v33  ;;  %5340 = vmatprep.subr.bf16.mxu1 %v11546_v35  ;;  %v11627_v33 = vld [vmem:[#allocation2 + $0x684] ss:$48 sps:$4 sm:$0xff]   ;;  %v11622_v35 = vld [vmem:[#allocation2 + $0x1278] ss:$48 sps:$4 sm:$0xff]  }
 0x260   :  { %5422 = vmatprep.subr.bf16.mxu0 %v11549_v37  ;;  %v11625_v37 = vld [vmem:[#allocation2 + $0x680] ss:$48 sps:$4 sm:$0xff]  }
 0x262   :  { %5341 = vmatpush1.bf16.msra.mxu1 %v11544_v38  ;;  %v11630_v38 = vld [vmem:[#allocation2 + $0x12dc] ss:$48 sps:$4 sm:$0xff]  }
 0x263   :  { %5423 = vmatpush1.bf16.msra.mxu0 %v11547_v39  ;;  %5342 = vmatprep.subr.bf16.mxu1 %v11552_v40  ;;  %v11633_v39 = vld [vmem:[#allocation2 + $0x6e4] ss:$48 sps:$4 sm:$0xff]   ;;  %v11628_v40 = vld [vmem:[#allocation2 + $0x12d8] ss:$48 sps:$4 sm:$0xff]  }
 0x264   :  { %5424 = vmatprep.subr.bf16.mxu0 %v11555_v41  ;;  %v11631_v41 = vld [vmem:[#allocation2 + $0x6e0] ss:$48 sps:$4 sm:$0xff]  }
 0x266   :  { %5343 = vmatpush1.bf16.msra.mxu1 %v11550_v0  ;;  %v11636_v0 = vld [vmem:[#allocation2 + $0x133c] ss:$48 sps:$4 sm:$0xff]  }
 0x267   :  { %5425 = vmatpush1.bf16.msra.mxu0 %v11553_v42  ;;  %5344 = vmatprep.subr.bf16.mxu1 %v11558_v1  ;;  %v11639_v42 = vld [vmem:[#allocation2 + $0x744] ss:$48 sps:$4 sm:$0xff]   ;;  %v11634_v1 = vld [vmem:[#allocation2 + $0x1338] ss:$48 sps:$4 sm:$0xff]  }
 0x268   :  { %5426 = vmatprep.subr.bf16.mxu0 %v11561_v43  ;;  %v11637_v43 = vld [vmem:[#allocation2 + $0x740] ss:$48 sps:$4 sm:$0xff]  }
 0x26a   :  { %5345 = vmatpush1.bf16.msra.mxu1 %v11556_v44  ;;  %v11642_v44 = vld [vmem:[#allocation2 + $0x139c] ss:$48 sps:$4 sm:$0xff]  }
 0x26b   :  { %5427 = vmatpush1.bf16.msra.mxu0 %v11559_v45  ;;  %5346 = vmatprep.subr.bf16.mxu1 %v11564_v46  ;;  %v11645_v45 = vld [vmem:[#allocation2 + $0x7a4] ss:$48 sps:$4 sm:$0xff]   ;;  %v11640_v46 = vld [vmem:[#allocation2 + $0x1398] ss:$48 sps:$4 sm:$0xff]  }
 0x26c   :  { %5428 = vmatprep.subr.bf16.mxu0 %v11567_v47  ;;  %v11643_v47 = vld [vmem:[#allocation2 + $0x7a0] ss:$48 sps:$4 sm:$0xff]  }
 0x26e   :  { %5347 = vmatpush1.bf16.msra.mxu1 %v11562_v49  ;;  %v11648_v49 = vld [vmem:[#allocation2 + $0x13fc] ss:$48 sps:$4 sm:$0xff]  }
 0x26f   :  { %5429 = vmatpush1.bf16.msra.mxu0 %v11565_v50  ;;  %5348 = vmatprep.subr.bf16.mxu1 %v11570_v51  ;;  %v11651_v50 = vld [vmem:[#allocation2 + $0x804] ss:$48 sps:$4 sm:$0xff]   ;;  %v11646_v51 = vld [vmem:[#allocation2 + $0x13f8] ss:$48 sps:$4 sm:$0xff]  }
 0x270   :  { %5430 = vmatprep.subr.bf16.mxu0 %v11573_v53  ;;  %v11649_v53 = vld [vmem:[#allocation2 + $0x800] ss:$48 sps:$4 sm:$0xff]  }
 0x272   :  { %5349 = vmatpush1.bf16.msra.mxu1 %v11568_v54  ;;  %v11654_v54 = vld [vmem:[#allocation2 + $0x145c] ss:$48 sps:$4 sm:$0xff]  }
 0x273   :  { %5431 = vmatpush1.bf16.msra.mxu0 %v11571_v55  ;;  %5350 = vmatprep.subr.bf16.mxu1 %v11576_v56  ;;  %v11657_v55 = vld [vmem:[#allocation2 + $0x864] ss:$48 sps:$4 sm:$0xff]  }
 0x274   :  { %5432 = vmatprep.subr.bf16.mxu0 %v11579_v57 }
 0x276   :  { %5351 = vmatpush1.bf16.msra.mxu1 %v11574_v58 }
 0x277   :  { %5433 = vmatpush1.bf16.msra.mxu0 %v11577_v59  ;;  %5352 = vmatprep.subr.bf16.mxu1 %v11582_v60  ;;  %v11652_v59 = vld [vmem:[#allocation2 + $0x1458] ss:$48 sps:$4 sm:$0xff]   ;;  %v11655_v60 = vld [vmem:[#allocation2 + $0x860] ss:$48 sps:$4 sm:$0xff]  }
 0x278   :  { %5434 = vmatprep.subr.bf16.mxu0 %v11585_v61 }
 0x27a   :  { %5353 = vmatpush1.bf16.msra.mxu1 %v11580_v62  ;;  %v11660_v62 = vld [vmem:[#allocation2 + $0x14bc] ss:$48 sps:$4 sm:$0xff]  }
 0x27b   :  { %5435 = vmatpush1.bf16.msra.mxu0 %v11583_v63  ;;  %5354 = vmatprep.subr.bf16.mxu1 %v11588_v2  ;;  %v11663_v63 = vld [vmem:[#allocation2 + $0x8c4] ss:$48 sps:$4 sm:$0xff]   ;;  %v11658_v2 = vld [vmem:[#allocation2 + $0x14b8] ss:$48 sps:$4 sm:$0xff]  }
 0x27c   :  { %5436 = vmatprep.subr.bf16.mxu0 %v11591_v3  ;;  %v11661_v3 = vld [vmem:[#allocation2 + $0x8c0] ss:$48 sps:$4 sm:$0xff]  }
 0x27e   :  { %5355 = vmatpush1.bf16.msra.mxu1 %v11586_v4  ;;  %v11666_v4 = vld [vmem:[#allocation2 + $0x151c] ss:$48 sps:$4 sm:$0xff]  }
 0x27f   :  { %5437 = vmatpush1.bf16.msra.mxu0 %v11589_v5  ;;  %5356 = vmatprep.subr.bf16.mxu1 %v11594_v6  ;;  %v11669_v5 = vld [vmem:[#allocation2 + $0x924] ss:$48 sps:$4 sm:$0xff]   ;;  %v11664_v6 = vld [vmem:[#allocation2 + $0x1518] ss:$48 sps:$4 sm:$0xff]  }
 0x280   :  { %5438 = vmatprep.subr.bf16.mxu0 %v11597_v7  ;;  %v11667_v7 = vld [vmem:[#allocation2 + $0x920] ss:$48 sps:$4 sm:$0xff]  }
 0x282   :  { %5357 = vmatpush1.bf16.msra.mxu1 %v11592_v9  ;;  %v11672_v9 = vld [vmem:[#allocation2 + $0x157c] ss:$48 sps:$4 sm:$0xff]  }
 0x283   :  { %5439 = vmatpush1.bf16.msra.mxu0 %v11595_v10  ;;  %5358 = vmatprep.subr.bf16.mxu1 %v11600_v12  ;;  %v11675_v10 = vld [vmem:[#allocation2 + $0x984] ss:$48 sps:$4 sm:$0xff]   ;;  %v11670_v12 = vld [vmem:[#allocation2 + $0x1578] ss:$48 sps:$4 sm:$0xff]  }
 0x284   :  { %5440 = vmatprep.subr.bf16.mxu0 %v11603_v13  ;;  %v11673_v13 = vld [vmem:[#allocation2 + $0x980] ss:$48 sps:$4 sm:$0xff]  }
 0x286   :  { %5359 = vmatpush1.bf16.msra.mxu1 %v11598_v14  ;;  %v11678_v14 = vld [vmem:[#allocation2 + $0x15dc] ss:$48 sps:$4 sm:$0xff]  }
 0x287   :  { %5441 = vmatpush1.bf16.msra.mxu0 %v11601_v15  ;;  %5360 = vmatprep.subr.bf16.mxu1 %v11606_v16  ;;  %v11681_v15 = vld [vmem:[#allocation2 + $0x9e4] ss:$48 sps:$4 sm:$0xff]   ;;  %v11676_v16 = vld [vmem:[#allocation2 + $0x15d8] ss:$48 sps:$4 sm:$0xff]  }
 0x288   :  { %5442 = vmatprep.subr.bf16.mxu0 %v11609_v18  ;;  %v11679_v18 = vld [vmem:[#allocation2 + $0x9e0] ss:$48 sps:$4 sm:$0xff]  }
 0x28a   :  { %5361 = vmatpush1.bf16.msra.mxu1 %v11604_v19  ;;  %v11684_v19 = vld [vmem:[#allocation2 + $0x163c] ss:$48 sps:$4 sm:$0xff]  }
 0x28b   :  { %5443 = vmatpush1.bf16.msra.mxu0 %v11607_v20  ;;  %5362 = vmatprep.subr.bf16.mxu1 %v11612_v21  ;;  %v11687_v20 = vld [vmem:[#allocation2 + $0xa44] ss:$48 sps:$4 sm:$0xff]   ;;  %v11682_v21 = vld [vmem:[#allocation2 + $0x1638] ss:$48 sps:$4 sm:$0xff]  }
 0x28c   :  { %5444 = vmatprep.subr.bf16.mxu0 %v11615_v22  ;;  %v11685_v22 = vld [vmem:[#allocation2 + $0xa40] ss:$48 sps:$4 sm:$0xff]  }
 0x28e   :  { %5363 = vmatpush1.bf16.msra.mxu1 %v11610_v23  ;;  %v11690_v23 = vld [vmem:[#allocation2 + $0x169c] ss:$48 sps:$4 sm:$0xff]  }
 0x28f   :  { %5445 = vmatpush1.bf16.msra.mxu0 %v11613_v24  ;;  %5373 = vmatprep.subr.bf16.mxu1 %v11618_v26  ;;  %v11693_v24 = vld [vmem:[#allocation2 + $0xaa4] ss:$48 sps:$4 sm:$0xff]   ;;  %v11688_v26 = vld [vmem:[#allocation2 + $0x1698] ss:$48 sps:$4 sm:$0xff]  }
 0x290   :  { %5455 = vmatprep.subr.bf16.mxu0 %v11621_v27  ;;  %v11691_v27 = vld [vmem:[#allocation2 + $0xaa0] ss:$48 sps:$4 sm:$0xff]  }
 0x291   :  { %5365 = vmatmul.mubr.bf16.vlgmr.msra.gmra.mrb[8].mxu1 %v12510_v17 }
 0x292   :  { %5447 = vmatmul.mubr.bf16.vlgmr.msra.gmra.mrb[8].mxu0 %v12494_v8  ;;  %5374 = vmatpush1.bf16.msra.mxu1 %v11616_v29  ;;  %v11696_v29 = vld [vmem:[#allocation2 + $0x16fc] ss:$48 sps:$4 sm:$0xff]  }
 0x293   :  { %5456 = vmatpush1.bf16.msra.mxu0 %v11619_v30  ;;  %5375 = vmatprep.subr.bf16.mxu1 %v11624_v31  ;;  %v11699_v30 = vld [vmem:[#allocation2 + $0xb04] ss:$48 sps:$4 sm:$0xff]   ;;  %v11694_v31 = vld [vmem:[#allocation2 + $0x16f8] ss:$48 sps:$4 sm:$0xff]  }
 0x294   :  { %5457 = vmatprep.subr.bf16.mxu0 %v11627_v33  ;;  %5405 = vmatprep.mubr.bf16.mxu1 %v12517_v25  ;;  %v11697_v33 = vld [vmem:[#allocation2 + $0xb00] ss:$48 sps:$4 sm:$0xff]  }
 0x295   :  { %5487 = vmatprep.mubr.bf16.mxu0 %v12484_v52 }
 0x296   :  { %5376 = vmatpush1.bf16.msra.mxu1 %v11622_v35  ;;  %v11702_v35 = vld [vmem:[#allocation2 + $0x175c] ss:$48 sps:$4 sm:$0xff]  }
 0x297   :  { %5458 = vmatpush1.bf16.msra.mxu0 %v11625_v37  ;;  %5377 = vmatprep.subr.bf16.mxu1 %v11630_v38  ;;  %v11705_v37 = vld [vmem:[#allocation2 + $0xb64] ss:$48 sps:$4 sm:$0xff]   ;;  %v11700_v38 = vld [vmem:[#allocation2 + $0x1758] ss:$48 sps:$4 sm:$0xff]  }
 0x298   :  { %5459 = vmatprep.subr.bf16.mxu0 %v11633_v39  ;;  %v11703_v39 = vld [vmem:[#allocation2 + $0xb60] ss:$48 sps:$4 sm:$0xff]  }
 0x29a   :  { %5378 = vmatpush1.bf16.msra.mxu1 %v11628_v40  ;;  %v11708_v40 = vld [vmem:[#allocation2 + $0x17bc] ss:$48 sps:$4 sm:$0xff]  }
 0x29b   :  { %5460 = vmatpush1.bf16.msra.mxu0 %v11631_v41  ;;  %5379 = vmatprep.subr.bf16.mxu1 %v11636_v0  ;;  %v11711_v41 = vld [vmem:[#allocation2 + $0xbc4] ss:$48 sps:$4 sm:$0xff]   ;;  %v11706_v0 = vld [vmem:[#allocation2 + $0x17b8] ss:$48 sps:$4 sm:$0xff]  }
 0x29c   :  { %5461 = vmatprep.subr.bf16.mxu0 %v11639_v42  ;;  %v11709_v42 = vld [vmem:[#allocation2 + $0xbc0] ss:$48 sps:$4 sm:$0xff]  }
 0x29e   :  { %5380 = vmatpush1.bf16.msra.mxu1 %v11634_v1  ;;  %v11714_v1 = vld [vmem:[#allocation2 + $0xc24] ss:$48 sps:$4 sm:$0xff]  }
 0x29f   :  { %5462 = vmatpush1.bf16.msra.mxu0 %v11637_v43  ;;  %5381 = vmatprep.subr.bf16.mxu1 %v11642_v44  ;;  %v11717_v43 = vld [vmem:[#allocation2 + $0x2c] ss:$48 sps:$4 sm:$0xff]   ;;  %v11712_v44 = vld [vmem:[#allocation2 + $0xc20] ss:$48 sps:$4 sm:$0xff]  }
 0x2a0   :  { %5463 = vmatprep.subr.bf16.mxu0 %v11645_v45  ;;  %v11715_v45 = vld [vmem:[#allocation2 + $0x28] ss:$48 sps:$4 sm:$0xff]  }
 0x2a2   :  { %5382 = vmatpush1.bf16.msra.mxu1 %v11640_v46  ;;  %v11720_v46 = vld [vmem:[#allocation2 + $0xc84] ss:$48 sps:$4 sm:$0xff]  }
 0x2a3   :  { %5464 = vmatpush1.bf16.msra.mxu0 %v11643_v47  ;;  %5383 = vmatprep.subr.bf16.mxu1 %v11648_v49  ;;  %v11723_v47 = vld [vmem:[#allocation2 + $0x8c] ss:$48 sps:$4 sm:$0xff]   ;;  %v11718_v49 = vld [vmem:[#allocation2 + $0xc80] ss:$48 sps:$4 sm:$0xff]  }
 0x2a4   :  { %5465 = vmatprep.subr.bf16.mxu0 %v11651_v50  ;;  %v12560_v56 = vpop.f32.mrb[4].mxu1  ;;  %v11721_v50 = vld [vmem:[#allocation2 + $0x88] ss:$48 sps:$4 sm:$0xff]  }
 0x2a5   :  { %v12562_v57 = vpop.f32.mrb[5].mxu1 }
 0x2a6   :  { %v5083_v58 = vpop.f32.mrb[6].mxu1  ;;  %5384 = vmatpush1.bf16.msra.mxu1 %v11646_v51  ;;  %v11726_v51 = vld [vmem:[#allocation2 + $0xce4] ss:$48 sps:$4 sm:$0xff]  }
 0x2a7   :  { %5466 = vmatpush1.bf16.msra.mxu0 %v11649_v53  ;;  %v5084_v61 = vpop.f32.mrb[7].mxu1  ;;  %5385 = vmatprep.subr.bf16.mxu1 %v11654_v54  ;;  %v11729_v53 = vld [vmem:[#allocation2 + $0xec] ss:$48 sps:$4 sm:$0xff]   ;;  %v11724_v54 = vld [vmem:[#allocation2 + $0xce0] ss:$48 sps:$4 sm:$0xff]  }
 0x2a8   :  { %5467 = vmatprep.subr.bf16.mxu0 %v11657_v55  ;;  %v11727_v55 = vld [vmem:[#allocation2 + $0xe8] ss:$48 sps:$4 sm:$0xff]   ;;  %v11732_v58 = vld [vmem:[#allocation2 + $0xd44] ss:$48 sps:$4 sm:$0xff]  }
 0x2a9   :  { %v11733_v61 = vld [vmem:[#allocation2 + $0x148] ss:$48 sps:$4 sm:$0xff]  }
 0x2aa   :  { %5386 = vmatpush1.bf16.msra.mxu1 %v11652_v59  ;;  %v11735_v59 = vld [vmem:[#allocation2 + $0x14c] ss:$48 sps:$4 sm:$0xff]  }
 0x2ab   :  { %5468 = vmatpush1.bf16.msra.mxu0 %v11655_v60  ;;  %5387 = vmatprep.subr.bf16.mxu1 %v11660_v62  ;;  %v11730_v60 = vld [vmem:[#allocation2 + $0xd40] ss:$48 sps:$4 sm:$0xff]   ;;  %v11738_v62 = vld [vmem:[#allocation2 + $0xda4] ss:$48 sps:$4 sm:$0xff]  }
 0x2ac   :  { %5469 = vmatprep.subr.bf16.mxu0 %v11663_v63  ;;  %v11741_v63 = vld [vmem:[#allocation2 + $0x1ac] ss:$48 sps:$4 sm:$0xff]  }
 0x2ae   :  { %5388 = vmatpush1.bf16.msra.mxu1 %v11658_v2  ;;  %v11736_v2 = vld [vmem:[#allocation2 + $0xda0] ss:$48 sps:$4 sm:$0xff]  }
 0x2af   :  { %5470 = vmatpush1.bf16.msra.mxu0 %v11661_v3  ;;  %5389 = vmatprep.subr.bf16.mxu1 %v11666_v4  ;;  %v11744_v3 = vld [vmem:[#allocation2 + $0xe04] ss:$48 sps:$4 sm:$0xff]   ;;  %v11747_v4 = vld [vmem:[#allocation2 + $0x20c] ss:$48 sps:$4 sm:$0xff]  }
 0x2b0   :  { %5471 = vmatprep.subr.bf16.mxu0 %v11669_v5  ;;  %v11742_v5 = vld [vmem:[#allocation2 + $0xe00] ss:$48 sps:$4 sm:$0xff]  }
 0x2b2   :  { %5390 = vmatpush1.bf16.msra.mxu1 %v11664_v6  ;;  %v11745_v6 = vld [vmem:[#allocation2 + $0x208] ss:$48 sps:$4 sm:$0xff]  }
 0x2b3   :  { %5472 = vmatpush1.bf16.msra.mxu0 %v11667_v7  ;;  %5391 = vmatprep.subr.bf16.mxu1 %v11672_v9  ;;  %v11750_v7 = vld [vmem:[#allocation2 + $0xe64] ss:$48 sps:$4 sm:$0xff]   ;;  %v11753_v9 = vld [vmem:[#allocation2 + $0x26c] ss:$48 sps:$4 sm:$0xff]  }
 0x2b4   :  { %5473 = vmatprep.subr.bf16.mxu0 %v11675_v10  ;;  %v11748_v10 = vld [vmem:[#allocation2 + $0xe60] ss:$48 sps:$4 sm:$0xff]  }
 0x2b6   :  { %5392 = vmatpush1.bf16.msra.mxu1 %v11670_v12  ;;  %v11751_v12 = vld [vmem:[#allocation2 + $0x268] ss:$48 sps:$4 sm:$0xff]  }
 0x2b7   :  { %5474 = vmatpush1.bf16.msra.mxu0 %v11673_v13  ;;  %5393 = vmatprep.subr.bf16.mxu1 %v11678_v14  ;;  %v11756_v13 = vld [vmem:[#allocation2 + $0xec4] ss:$48 sps:$4 sm:$0xff]   ;;  %v11759_v14 = vld [vmem:[#allocation2 + $0x2cc] ss:$48 sps:$4 sm:$0xff]  }
 0x2b8   :  { %5475 = vmatprep.subr.bf16.mxu0 %v11681_v15  ;;  %v11754_v15 = vld [vmem:[#allocation2 + $0xec0] ss:$48 sps:$4 sm:$0xff]  }
 0x2ba   :  { %5394 = vmatpush1.bf16.msra.mxu1 %v11676_v16  ;;  %v11757_v16 = vld [vmem:[#allocation2 + $0x2c8] ss:$48 sps:$4 sm:$0xff]  }
 0x2bb   :  { %5476 = vmatpush1.bf16.msra.mxu0 %v11679_v18  ;;  %5395 = vmatprep.subr.bf16.mxu1 %v11684_v19  ;;  %v11762_v18 = vld [vmem:[#allocation2 + $0xf24] ss:$48 sps:$4 sm:$0xff]   ;;  %v11765_v19 = vld [vmem:[#allocation2 + $0x32c] ss:$48 sps:$4 sm:$0xff]  }
 0x2bc   :  { %5477 = vmatprep.subr.bf16.mxu0 %v11687_v20  ;;  %v11760_v20 = vld [vmem:[#allocation2 + $0xf20] ss:$48 sps:$4 sm:$0xff]  }
 0x2be   :  { %5396 = vmatpush1.bf16.msra.mxu1 %v11682_v21  ;;  %v11763_v21 = vld [vmem:[#allocation2 + $0x328] ss:$48 sps:$4 sm:$0xff]  }
 0x2bf   :  { %5478 = vmatpush1.bf16.msra.mxu0 %v11685_v22  ;;  %5397 = vmatprep.subr.bf16.mxu1 %v11690_v23  ;;  %v11768_v22 = vld [vmem:[#allocation2 + $0xf84] ss:$48 sps:$4 sm:$0xff]   ;;  %v11771_v23 = vld [vmem:[#allocation2 + $0x38c] ss:$48 sps:$4 sm:$0xff]  }
 0x2c0   :  { %5479 = vmatprep.subr.bf16.mxu0 %v11693_v24  ;;  %v11766_v24 = vld [vmem:[#allocation2 + $0xf80] ss:$48 sps:$4 sm:$0xff]  }
 0x2c2   :  { %5398 = vmatpush1.bf16.msra.mxu1 %v11688_v26  ;;  %v11769_v26 = vld [vmem:[#allocation2 + $0x388] ss:$48 sps:$4 sm:$0xff]  }
 0x2c3   :  { %5480 = vmatpush1.bf16.msra.mxu0 %v11691_v27  ;;  %5399 = vmatprep.subr.bf16.mxu1 %v11696_v29  ;;  %v11774_v27 = vld [vmem:[#allocation2 + $0xfe4] ss:$48 sps:$4 sm:$0xff]   ;;  %v11777_v29 = vld [vmem:[#allocation2 + $0x3ec] ss:$48 sps:$4 sm:$0xff]  }
 0x2c4   :  { %5481 = vmatprep.subr.bf16.mxu0 %v11699_v30  ;;  %v11772_v30 = vld [vmem:[#allocation2 + $0xfe0] ss:$48 sps:$4 sm:$0xff]  }
 0x2c6   :  { %5400 = vmatpush1.bf16.msra.mxu1 %v11694_v31  ;;  %v11775_v31 = vld [vmem:[#allocation2 + $0x3e8] ss:$48 sps:$4 sm:$0xff]  }
 0x2c7   :  { %5482 = vmatpush1.bf16.msra.mxu0 %v11697_v33  ;;  %5401 = vmatprep.subr.bf16.mxu1 %v11702_v35  ;;  %v11780_v33 = vld [vmem:[#allocation2 + $0x1044] ss:$48 sps:$4 sm:$0xff]   ;;  %v11783_v35 = vld [vmem:[#allocation2 + $0x44c] ss:$48 sps:$4 sm:$0xff]  }
 0x2c8   :  { %5483 = vmatprep.subr.bf16.mxu0 %v11705_v37  ;;  %v11778_v37 = vld [vmem:[#allocation2 + $0x1040] ss:$48 sps:$4 sm:$0xff]  }
 0x2ca   :  { %5402 = vmatpush1.bf16.msra.mxu1 %v11700_v38  ;;  %v11781_v38 = vld [vmem:[#allocation2 + $0x448] ss:$48 sps:$4 sm:$0xff]  }
 0x2cb   :  { %5484 = vmatpush1.bf16.msra.mxu0 %v11703_v39  ;;  %5403 = vmatprep.subr.bf16.mxu1 %v11708_v40  ;;  %v11786_v39 = vld [vmem:[#allocation2 + $0x10a4] ss:$48 sps:$4 sm:$0xff]   ;;  %v11789_v40 = vld [vmem:[#allocation2 + $0x4ac] ss:$48 sps:$4 sm:$0xff]  }
 0x2cc   :  { %5485 = vmatprep.subr.bf16.mxu0 %v11711_v41  ;;  %v11784_v41 = vld [vmem:[#allocation2 + $0x10a0] ss:$48 sps:$4 sm:$0xff]  }
 0x2ce   :  { %5404 = vmatpush1.bf16.msra.mxu1 %v11706_v0  ;;  %v11787_v0 = vld [vmem:[#allocation2 + $0x4a8] ss:$48 sps:$4 sm:$0xff]  }
 0x2cf   :  { %5486 = vmatpush1.bf16.msra.mxu0 %v11709_v42  ;;  %5578 = vmatprep.subr.bf16.mxu1 %v11717_v43  ;;  %v11792_v42 = vld [vmem:[#allocation2 + $0x1104] ss:$48 sps:$4 sm:$0xff]   ;;  %v11790_v43 = vld [vmem:[#allocation2 + $0x1100] ss:$48 sps:$4 sm:$0xff]  }
 0x2d0   :  { %5496 = vmatprep.subr.bf16.mxu0 %v11714_v1  ;;  %v11795_v1 = vld [vmem:[#allocation2 + $0x50c] ss:$48 sps:$4 sm:$0xff]  }
 0x2d1   :  { %5406 = vmatmul.mubr.bf16.vlgmr.msra.gmra.mrb[8].mxu1 %v12524_v28 }
 0x2d2   :  { %5488 = vmatmul.mubr.bf16.vlgmr.msra.gmra.mrb[8].mxu0 %v12496_v11  ;;  %5579 = vmatpush1.bf16.msra.mxu1 %v11715_v45  ;;  %v11798_v45 = vld [vmem:[#allocation2 + $0x1164] ss:$48 sps:$4 sm:$0xff]  }
 0x2d3   :  { %5497 = vmatpush1.bf16.msra.mxu0 %v11712_v44  ;;  %5580 = vmatprep.subr.bf16.mxu1 %v11723_v47  ;;  %v11793_v44 = vld [vmem:[#allocation2 + $0x508] ss:$48 sps:$4 sm:$0xff]   ;;  %v11796_v47 = vld [vmem:[#allocation2 + $0x1160] ss:$48 sps:$4 sm:$0xff]  }
 0x2d4   :  { %5498 = vmatprep.subr.bf16.mxu0 %v11720_v46  ;;  %5528 = vmatprep.mubr.bf16.mxu0 %v12504_v36  ;;  %v11801_v46 = vld [vmem:[#allocation2 + $0x56c] ss:$48 sps:$4 sm:$0xff]  }
 0x2d5   :  { %5610 = vmatprep.mubr.bf16.mxu1 %v12479_v48  ;;  %v11739_v48 = vld [vmem:[#allocation2 + $0x1a8] ss:$48 sps:$4 sm:$0xff]  }
 0x2d6   :  { %5581 = vmatpush1.bf16.msra.mxu1 %v11721_v50  ;;  %v11804_v50 = vld [vmem:[#allocation2 + $0x11c4] ss:$48 sps:$4 sm:$0xff]  }
 0x2d7   :  { %5499 = vmatpush1.bf16.msra.mxu0 %v11718_v49  ;;  %5582 = vmatprep.subr.bf16.mxu1 %v11729_v53  ;;  %v11799_v49 = vld [vmem:[#allocation2 + $0x568] ss:$48 sps:$4 sm:$0xff]   ;;  %v11802_v53 = vld [vmem:[#allocation2 + $0x11c0] ss:$48 sps:$4 sm:$0xff]  }
 0x2d8   :  { %5500 = vmatprep.subr.bf16.mxu0 %v11726_v51  ;;  %v11807_v51 = vld [vmem:[#allocation2 + $0x5cc] ss:$48 sps:$4 sm:$0xff]  }
 0x2da   :  { %5583 = vmatpush1.bf16.msra.mxu1 %v11727_v55  ;;  %v11810_v55 = vld [vmem:[#allocation2 + $0x1224] ss:$48 sps:$4 sm:$0xff]  }
 0x2db   :  { %5501 = vmatpush1.bf16.msra.mxu0 %v11724_v54  ;;  %5584 = vmatprep.subr.bf16.mxu1 %v11735_v59  ;;  %v11805_v54 = vld [vmem:[#allocation2 + $0x5c8] ss:$48 sps:$4 sm:$0xff]   ;;  %v11808_v59 = vld [vmem:[#allocation2 + $0x1220] ss:$48 sps:$4 sm:$0xff]  }
 0x2dc   :  { %5502 = vmatprep.subr.bf16.mxu0 %v11732_v58  ;;  %v11813_v58 = vld [vmem:[#allocation2 + $0x62c] ss:$48 sps:$4 sm:$0xff]  }
 0x2de   :  { %5585 = vmatpush1.bf16.msra.mxu1 %v11733_v61  ;;  %v11816_v61 = vld [vmem:[#allocation2 + $0x1284] ss:$48 sps:$4 sm:$0xff]  }
 0x2df   :  { %5503 = vmatpush1.bf16.msra.mxu0 %v11730_v60  ;;  %5586 = vmatprep.subr.bf16.mxu1 %v11741_v63  ;;  %v11811_v60 = vld [vmem:[#allocation2 + $0x628] ss:$48 sps:$4 sm:$0xff]   ;;  %v11814_v63 = vld [vmem:[#allocation2 + $0x1280] ss:$48 sps:$4 sm:$0xff]  }
 0x2e0   :  { %5504 = vmatprep.subr.bf16.mxu0 %v11738_v62  ;;  %v11819_v62 = vld [vmem:[#allocation2 + $0x68c] ss:$48 sps:$4 sm:$0xff]  }
 0x2e2   :  { %5587 = vmatpush1.bf16.msra.mxu1 %v11739_v48  ;;  %v11822_v48 = vld [vmem:[#allocation2 + $0x12e4] ss:$48 sps:$4 sm:$0xff]  }
 0x2e3   :  { %5505 = vmatpush1.bf16.msra.mxu0 %v11736_v2  ;;  %5588 = vmatprep.subr.bf16.mxu1 %v11747_v4  ;;  %v11817_v2 = vld [vmem:[#allocation2 + $0x688] ss:$48 sps:$4 sm:$0xff]   ;;  %v11820_v4 = vld [vmem:[#allocation2 + $0x12e0] ss:$48 sps:$4 sm:$0xff]  }
 0x2e4   :  { %5506 = vmatprep.subr.bf16.mxu0 %v11744_v3  ;;  %v11825_v3 = vld [vmem:[#allocation2 + $0x6ec] ss:$48 sps:$4 sm:$0xff]  }
 0x2e6   :  { %5589 = vmatpush1.bf16.msra.mxu1 %v11745_v6  ;;  %v11828_v6 = vld [vmem:[#allocation2 + $0x1344] ss:$48 sps:$4 sm:$0xff]  }
 0x2e7   :  { %5507 = vmatpush1.bf16.msra.mxu0 %v11742_v5  ;;  %5590 = vmatprep.subr.bf16.mxu1 %v11753_v9  ;;  %v11823_v5 = vld [vmem:[#allocation2 + $0x6e8] ss:$48 sps:$4 sm:$0xff]  }
 0x2e8   :  { %5508 = vmatprep.subr.bf16.mxu0 %v11750_v7  ;;  %v11826_v7 = vld [vmem:[#allocation2 + $0x1340] ss:$48 sps:$4 sm:$0xff]   ;;  %v11829_v9 = vld [vmem:[#allocation2 + $0x748] ss:$48 sps:$4 sm:$0xff]  }
 0x2ea   :  { %5591 = vmatpush1.bf16.msra.mxu1 %v11751_v12  ;;  %v11837_v12 = vld [vmem:[#allocation2 + $0x7ac] ss:$48 sps:$4 sm:$0xff]  }
 0x2eb   :  { %5509 = vmatpush1.bf16.msra.mxu0 %v11748_v10  ;;  %5592 = vmatprep.subr.bf16.mxu1 %v11759_v14  ;;  %v11834_v10 = vld [vmem:[#allocation2 + $0x13a4] ss:$48 sps:$4 sm:$0xff]  }
 0x2ec   :  { %5510 = vmatprep.subr.bf16.mxu0 %v11756_v13  ;;  %v11832_v13 = vld [vmem:[#allocation2 + $0x13a0] ss:$48 sps:$4 sm:$0xff]   ;;  %v11840_v14 = vld [vmem:[#allocation2 + $0x1404] ss:$48 sps:$4 sm:$0xff]  }
 0x2ee   :  { %5593 = vmatpush1.bf16.msra.mxu1 %v11757_v16  ;;  %v11838_v16 = vld [vmem:[#allocation2 + $0x1400] ss:$48 sps:$4 sm:$0xff]  }
 0x2ef   :  { %5511 = vmatpush1.bf16.msra.mxu0 %v11754_v15  ;;  %5594 = vmatprep.subr.bf16.mxu1 %v11765_v19  ;;  %v11843_v15 = vld [vmem:[#allocation2 + $0x80c] ss:$48 sps:$4 sm:$0xff]   ;;  %v11846_v19 = vld [vmem:[#allocation2 + $0x1464] ss:$48 sps:$4 sm:$0xff]  }
 0x2f0   :  { %5512 = vmatprep.subr.bf16.mxu0 %v11762_v18  ;;  %v11841_v18 = vld [vmem:[#allocation2 + $0x808] ss:$48 sps:$4 sm:$0xff]  }
 0x2f2   :  { %5595 = vmatpush1.bf16.msra.mxu1 %v11763_v21 }
 0x2f3   :  { %5513 = vmatpush1.bf16.msra.mxu0 %v11760_v20  ;;  %5596 = vmatprep.subr.bf16.mxu1 %v11771_v23  ;;  %v11849_v20 = vld [vmem:[#allocation2 + $0x86c] ss:$48 sps:$4 sm:$0xff]  }
 0x2f4   :  { %5514 = vmatprep.subr.bf16.mxu0 %v11768_v22 }
 0x2f6   :  { %5597 = vmatpush1.bf16.msra.mxu1 %v11769_v26  ;;  %v11847_v26 = vld [vmem:[#allocation2 + $0x868] ss:$48 sps:$4 sm:$0xff]  }
 0x2f7   :  { %5515 = vmatpush1.bf16.msra.mxu0 %v11766_v24  ;;  %5598 = vmatprep.subr.bf16.mxu1 %v11777_v29  ;;  %v11844_v24 = vld [vmem:[#allocation2 + $0x1460] ss:$48 sps:$4 sm:$0xff]   ;;  %v11852_v29 = vld [vmem:[#allocation2 + $0x14c4] ss:$48 sps:$4 sm:$0xff]  }
 0x2f8   :  { %5516 = vmatprep.subr.bf16.mxu0 %v11774_v27 }
 0x2fa   :  { %5599 = vmatpush1.bf16.msra.mxu1 %v11775_v31  ;;  %v11850_v31 = vld [vmem:[#allocation2 + $0x14c0] ss:$48 sps:$4 sm:$0xff]  }
 0x2fb   :  { %5517 = vmatpush1.bf16.msra.mxu0 %v11772_v30  ;;  %5600 = vmatprep.subr.bf16.mxu1 %v11783_v35  ;;  %v11855_v30 = vld [vmem:[#allocation2 + $0x8cc] ss:$48 sps:$4 sm:$0xff]   ;;  %v11858_v35 = vld [vmem:[#allocation2 + $0x1524] ss:$48 sps:$4 sm:$0xff]  }
 0x2fc   :  { %5518 = vmatprep.subr.bf16.mxu0 %v11780_v33  ;;  %v11853_v33 = vld [vmem:[#allocation2 + $0x8c8] ss:$48 sps:$4 sm:$0xff]  }
 0x2fe   :  { %5601 = vmatpush1.bf16.msra.mxu1 %v11781_v38  ;;  %v11856_v38 = vld [vmem:[#allocation2 + $0x1520] ss:$48 sps:$4 sm:$0xff]  }
 0x2ff   :  { %5519 = vmatpush1.bf16.msra.mxu0 %v11778_v37  ;;  %5602 = vmatprep.subr.bf16.mxu1 %v11789_v40  ;;  %v11861_v37 = vld [vmem:[#allocation2 + $0x92c] ss:$48 sps:$4 sm:$0xff]   ;;  %v11864_v40 = vld [vmem:[#allocation2 + $0x1584] ss:$48 sps:$4 sm:$0xff]  }
 0x300   :  { %5520 = vmatprep.subr.bf16.mxu0 %v11786_v39  ;;  %v11859_v39 = vld [vmem:[#allocation2 + $0x928] ss:$48 sps:$4 sm:$0xff]  }
 0x302   :  { %5603 = vmatpush1.bf16.msra.mxu1 %v11787_v0  ;;  %v11862_v0 = vld [vmem:[#allocation2 + $0x1580] ss:$48 sps:$4 sm:$0xff]  }
 0x303   :  { %5521 = vmatpush1.bf16.msra.mxu0 %v11784_v41  ;;  %5604 = vmatprep.subr.bf16.mxu1 %v11795_v1  ;;  %v11867_v41 = vld [vmem:[#allocation2 + $0x98c] ss:$48 sps:$4 sm:$0xff]   ;;  %v11870_v1 = vld [vmem:[#allocation2 + $0x15e4] ss:$48 sps:$4 sm:$0xff]  }
 0x304   :  { %5522 = vmatprep.subr.bf16.mxu0 %v11792_v42  ;;  %v11865_v42 = vld [vmem:[#allocation2 + $0x988] ss:$48 sps:$4 sm:$0xff]  }
 0x306   :  { %5605 = vmatpush1.bf16.msra.mxu1 %v11793_v44  ;;  %v11868_v44 = vld [vmem:[#allocation2 + $0x15e0] ss:$48 sps:$4 sm:$0xff]  }
 0x307   :  { %5523 = vmatpush1.bf16.msra.mxu0 %v11790_v43  ;;  %5606 = vmatprep.subr.bf16.mxu1 %v11801_v46  ;;  %v11873_v43 = vld [vmem:[#allocation2 + $0x9ec] ss:$48 sps:$4 sm:$0xff]   ;;  %v11876_v46 = vld [vmem:[#allocation2 + $0x1644] ss:$48 sps:$4 sm:$0xff]  }
 0x308   :  { %5524 = vmatprep.subr.bf16.mxu0 %v11798_v45  ;;  %v11871_v45 = vld [vmem:[#allocation2 + $0x9e8] ss:$48 sps:$4 sm:$0xff]  }
 0x30a   :  { %5607 = vmatpush1.bf16.msra.mxu1 %v11799_v49  ;;  %v11874_v49 = vld [vmem:[#allocation2 + $0x1640] ss:$48 sps:$4 sm:$0xff]  }
 0x30b   :  { %5525 = vmatpush1.bf16.msra.mxu0 %v11796_v47  ;;  %5608 = vmatprep.subr.bf16.mxu1 %v11807_v51  ;;  %v11879_v47 = vld [vmem:[#allocation2 + $0xa4c] ss:$48 sps:$4 sm:$0xff]   ;;  %v11882_v51 = vld [vmem:[#allocation2 + $0x16a4] ss:$48 sps:$4 sm:$0xff]  }
 0x30c   :  { %5526 = vmatprep.subr.bf16.mxu0 %v11804_v50  ;;  %v11877_v50 = vld [vmem:[#allocation2 + $0xa48] ss:$48 sps:$4 sm:$0xff]  }
 0x30e   :  { %5609 = vmatpush1.bf16.msra.mxu1 %v11805_v54  ;;  %v11880_v54 = vld [vmem:[#allocation2 + $0x16a0] ss:$48 sps:$4 sm:$0xff]  }
 0x30f   :  { %5527 = vmatpush1.bf16.msra.mxu0 %v11802_v53  ;;  %5619 = vmatprep.subr.bf16.mxu1 %v11813_v58  ;;  %v11885_v53 = vld [vmem:[#allocation2 + $0xaac] ss:$48 sps:$4 sm:$0xff]   ;;  %v11888_v58 = vld [vmem:[#allocation2 + $0x1704] ss:$48 sps:$4 sm:$0xff]  }
 0x310   :  { %5537 = vmatprep.subr.bf16.mxu0 %v11810_v55  ;;  %v11883_v55 = vld [vmem:[#allocation2 + $0xaa8] ss:$48 sps:$4 sm:$0xff]  }
 0x311   :  { %5611 = vmatmul.mubr.bf16.vlgmr.msra.gmra.mrb[12].mxu1 %v12494_v8  ;;  %v11831_v8 = vld [vmem:[#allocation2 + $0x74c] ss:$48 sps:$4 sm:$0xff]  }
 0x312   :  { %5529 = vmatmul.mubr.bf16.vlgmr.msra.gmra.mrb[8].mxu0 %v12510_v17  ;;  %5620 = vmatpush1.bf16.msra.mxu1 %v11811_v60  ;;  %v11886_v60 = vld [vmem:[#allocation2 + $0x1700] ss:$48 sps:$4 sm:$0xff]  }
 0x313   :  { %5538 = vmatpush1.bf16.msra.mxu0 %v11808_v59  ;;  %5621 = vmatprep.subr.bf16.mxu1 %v11819_v62  ;;  %v11891_v59 = vld [vmem:[#allocation2 + $0xb0c] ss:$48 sps:$4 sm:$0xff]   ;;  %v11894_v62 = vld [vmem:[#allocation2 + $0x1764] ss:$48 sps:$4 sm:$0xff]  }
 0x314   :  { %5539 = vmatprep.subr.bf16.mxu0 %v11816_v61  ;;  %5569 = vmatprep.mubr.bf16.mxu0 %v12517_v25  ;;  %v11889_v61 = vld [vmem:[#allocation2 + $0xb08] ss:$48 sps:$4 sm:$0xff]  }
 0x315   :  { %5651 = vmatprep.mubr.bf16.mxu1 %v12484_v52  ;;  %v11835_v52 = vld [vmem:[#allocation2 + $0x7a8] ss:$48 sps:$4 sm:$0xff]  }
 0x316   :  { %5622 = vmatpush1.bf16.msra.mxu1 %v11817_v2  ;;  %v11892_v2 = vld [vmem:[#allocation2 + $0x1760] ss:$48 sps:$4 sm:$0xff]  }
 0x317   :  { %5540 = vmatpush1.bf16.msra.mxu0 %v11814_v63  ;;  %5623 = vmatprep.subr.bf16.mxu1 %v11825_v3  ;;  %v11897_v63 = vld [vmem:[#allocation2 + $0xb6c] ss:$48 sps:$4 sm:$0xff]   ;;  %v11900_v3 = vld [vmem:[#allocation2 + $0x17c4] ss:$48 sps:$4 sm:$0xff]  }
 0x318   :  { %5541 = vmatprep.subr.bf16.mxu0 %v11822_v48  ;;  %v11895_v48 = vld [vmem:[#allocation2 + $0xb68] ss:$48 sps:$4 sm:$0xff]  }
 0x31a   :  { %5624 = vmatpush1.bf16.msra.mxu1 %v11823_v5  ;;  %v5921_v5 = vld [vmem:[#allocation6] sm:$0xff] }
 0x31b   :  { %5542 = vmatpush1.bf16.msra.mxu0 %v11820_v4  ;;  %5625 = vmatprep.subr.bf16.mxu1 %v11831_v8  ;;  %v11903_v4 = vld [vmem:[#allocation2 + $0xbcc] ss:$48 sps:$4 sm:$0xff]   ;;  %v11898_v8 = vld [vmem:[#allocation2 + $0x17c0] ss:$48 sps:$4 sm:$0xff]  }
 0x31c   :  { %5543 = vmatprep.subr.bf16.mxu0 %v11828_v6  ;;  %v5925_v6 = vld [vmem:[#allocation6 + $0x20] sm:$0xff] }
 0x31e   :  { %5626 = vmatpush1.bf16.msra.mxu1 %v11829_v9  ;;  %v11906_v9 = vld [vmem:[#allocation2 + $0xc2c] ss:$48 sps:$4 sm:$0xff]  }
 0x31f   :  { %5544 = vmatpush1.bf16.msra.mxu0 %v11826_v7  ;;  %5627 = vmatprep.subr.bf16.mxu1 %v11837_v12  ;;  %v11901_v7 = vld [vmem:[#allocation2 + $0xbc8] ss:$48 sps:$4 sm:$0xff]  }
 0x320   :  { %5545 = vmatprep.subr.bf16.mxu0 %v11834_v10  ;;  %v10264_v10 = vcombine.high %v5921_v5, %v5925_v6  ;;  %v5929_v12 = vld [vmem:[#allocation6 + $0x40] sm:$0xff] }
 0x322   :  { %5628 = vmatpush1.bf16.msra.mxu1 %v11835_v52  ;;  %v11904_v52 = vld [vmem:[#allocation2 + $0xc28] ss:$48 sps:$4 sm:$0xff]  }
 0x323   :  { %5546 = vmatpush1.bf16.msra.mxu0 %v11832_v13  ;;  %5629 = vmatprep.subr.bf16.mxu1 %v11843_v15  ;;  %v5933_v13 = vld [vmem:[#allocation6 + $0x60] sm:$0xff] }
 0x324   :  { %5547 = vmatprep.subr.bf16.mxu0 %v11840_v14  ;;  %v10263_v14 = vcombine.low %v5921_v5, %v5925_v6  ;;  %v11909_v15 = vld [vmem:[#allocation2 + $0xc8c] ss:$48 sps:$4 sm:$0xff]   ;;  %v11928_v6 = vld [vmem:[#allocation2 + $0xf28] ss:$48 sps:$4 sm:$0xff]  }
 0x325   :  { %v12572_v21 = vpop.f32.mrb[4].mxu0  ;;  %v5997_v5 = vld [vmem:[#allocation6 + $0x260] sm:$0xff] }
 0x326   :  { %v12574_v22 = vpop.f32.mrb[5].mxu0  ;;  %5630 = vmatpush1.bf16.msra.mxu1 %v11841_v18  ;;  %v5937_v18 = vld [vmem:[#allocation6 + $0x80] sm:$0xff] }
 0x327   :  { %v5247_v23 = vpop.f32.mrb[6].mxu0  ;;  %5548 = vmatpush1.bf16.msra.mxu0 %v11838_v16  ;;  %5631 = vmatprep.subr.bf16.mxu1 %v11849_v20  ;;  %v10272_v16 = vcombine.high %v5929_v12, %v5933_v13  ;;  %v11907_v20 = vld [vmem:[#allocation2 + $0xc88] ss:$48 sps:$4 sm:$0xff]  }
 0x328   :  { %v5248_v27 = vpop.f32.mrb[7].mxu0  ;;  %5549 = vmatprep.subr.bf16.mxu0 %v11846_v19  ;;  %v5941_v19 = vld [vmem:[#allocation6 + $0xa0] sm:$0xff]  ;;  %v10271_v23 = vcombine.low %v5929_v12, %v5933_v13 }
 0x329   :  { %v5945_v27 = vld [vmem:[#allocation6 + $0xc0] sm:$0xff] }
 0x32a   :  { %5632 = vmatpush1.bf16.msra.mxu1 %v11847_v26  ;;  %v10280_v26 = vcombine.high %v5937_v18, %v5941_v19  ;;  %v6005_v12 = vld [vmem:[#allocation6 + $0x2a0] sm:$0xff] }
 0x32b   :  { %5550 = vmatpush1.bf16.msra.mxu0 %v11844_v24  ;;  %5633 = vmatprep.subr.bf16.mxu1 %v11855_v30  ;;  %v11912_v24 = vld [vmem:[#allocation2 + $0xcec] ss:$48 sps:$4 sm:$0xff]   ;;  %v11910_v30 = vld [vmem:[#allocation2 + $0xce8] ss:$48 sps:$4 sm:$0xff]  }
 0x32c   :  { %5551 = vmatprep.subr.bf16.mxu0 %v11852_v29  ;;  %v5949_v29 = vld [vmem:[#allocation6 + $0xe0] sm:$0xff] }
 0x32d   :  { %v11931_v13 = vld [vmem:[#allocation2 + $0xf88] ss:$48 sps:$4 sm:$0xff]  }
 0x32e   :  { %5634 = vmatpush1.bf16.msra.mxu1 %v11853_v33  ;;  %v11915_v33 = vld [vmem:[#allocation2 + $0xd4c] ss:$48 sps:$4 sm:$0xff]  }
 0x32f   :  { %5552 = vmatpush1.bf16.msra.mxu0 %v11850_v31  ;;  %5635 = vmatprep.subr.bf16.mxu1 %v11861_v37  ;;  %v10279_v31 = vcombine.low %v5937_v18, %v5941_v19  ;;  %v5957_v37 = vld [vmem:[#allocation6 + $0x120] sm:$0xff] }
 0x330   :  { %5553 = vmatprep.subr.bf16.mxu0 %v11858_v35  ;;  %v5953_v35 = vld [vmem:[#allocation6 + $0x100] sm:$0xff] }
 0x331   :  { %v6013_v18 = vld [vmem:[#allocation6 + $0x2e0] sm:$0xff] }
 0x332   :  { %5636 = vmatpush1.bf16.msra.mxu1 %v11859_v39  ;;  %v10287_v39 = vcombine.low %v5945_v27, %v5949_v29  ;;  %v11934_v19 = vld [vmem:[#allocation2 + $0xfe8] ss:$48 sps:$4 sm:$0xff]  }
 0x333   :  { %5554 = vmatpush1.bf16.msra.mxu0 %v11856_v38  ;;  %5637 = vmatprep.subr.bf16.mxu1 %v11867_v41  ;;  %v11913_v38 = vld [vmem:[#allocation2 + $0xd48] ss:$48 sps:$4 sm:$0xff]   ;;  %v10296_v41 = vcombine.high %v5953_v35, %v5957_v37 }
 0x334   :  { %5555 = vmatprep.subr.bf16.mxu0 %v11864_v40  ;;  %v11918_v40 = vld [vmem:[#allocation2 + $0xdac] ss:$48 sps:$4 sm:$0xff]  }
 0x336   :  { %5638 = vmatpush1.bf16.msra.mxu1 %v11865_v42  ;;  %v11916_v42 = vld [vmem:[#allocation2 + $0xda8] ss:$48 sps:$4 sm:$0xff]  }
 0x337   :  { %5556 = vmatpush1.bf16.msra.mxu0 %v11862_v0  ;;  %5639 = vmatprep.subr.bf16.mxu1 %v11873_v43  ;;  %v5961_v0 = vld [vmem:[#allocation6 + $0x140] sm:$0xff] }
 0x338   :  { %5557 = vmatprep.subr.bf16.mxu0 %v11870_v1  ;;  %v10295_v1 = vcombine.low %v5953_v35, %v5957_v37  ;;  %v11921_v43 = vld [vmem:[#allocation2 + $0xe0c] ss:$48 sps:$4 sm:$0xff]   ;;  %v11940_v37 = vld [vmem:[#allocation2 + $0x10a8] ss:$48 sps:$4 sm:$0xff]  }
 0x339   :  { %v6029_v35 = vld [vmem:[#allocation6 + $0x360] sm:$0xff] }
 0x33a   :  { %5640 = vmatpush1.bf16.msra.mxu1 %v11871_v45  ;;  %v5969_v45 = vld [vmem:[#allocation6 + $0x180] sm:$0xff] }
 0x33b   :  { %5558 = vmatpush1.bf16.msra.mxu0 %v11868_v44  ;;  %5641 = vmatprep.subr.bf16.mxu1 %v11879_v47  ;;  %v11919_v47 = vld [vmem:[#allocation2 + $0xe08] ss:$48 sps:$4 sm:$0xff]  }
 0x33c   :  { %5559 = vmatprep.subr.bf16.mxu0 %v11876_v46  ;;  %v5973_v46 = vld [vmem:[#allocation6 + $0x1a0] sm:$0xff] }
 0x33e   :  { %5642 = vmatpush1.bf16.msra.mxu1 %v11877_v50  ;;  %v11924_v50 = vld [vmem:[#allocation2 + $0xe6c] ss:$48 sps:$4 sm:$0xff]  }
 0x33f   :  { %5560 = vmatpush1.bf16.msra.mxu0 %v11874_v49  ;;  %5643 = vmatprep.subr.bf16.mxu1 %v11885_v53  ;;  %v5977_v53 = vld [vmem:[#allocation6 + $0x1c0] sm:$0xff] }
 0x340   :  { %5561 = vmatprep.subr.bf16.mxu0 %v11882_v51  ;;  %v10312_v51 = vcombine.high %v5969_v45, %v5973_v46 }
 0x342   :  { %5644 = vmatpush1.bf16.msra.mxu1 %v11883_v55  ;;  %v11922_v55 = vld [vmem:[#allocation2 + $0xe68] ss:$48 sps:$4 sm:$0xff]  }
 0x343   :  { %5562 = vmatpush1.bf16.msra.mxu0 %v11880_v54  ;;  %5645 = vmatprep.subr.bf16.mxu1 %v11891_v59  ;;  %v5981_v54 = vld [vmem:[#allocation6 + $0x1e0] sm:$0xff] }
 0x344   :  { %5563 = vmatprep.subr.bf16.mxu0 %v11888_v58  ;;  %v10311_v58 = vcombine.low %v5969_v45, %v5973_v46  ;;  %v11927_v59 = vld [vmem:[#allocation2 + $0xecc] ss:$48 sps:$4 sm:$0xff]   ;;  %v11946_v46 = vld [vmem:[#allocation2 + $0x1168] ss:$48 sps:$4 sm:$0xff]  }
 0x345   :  { %v6045_v45 = vld [vmem:[#allocation6 + $0x3e0] sm:$0xff] }
 0x346   :  { %5646 = vmatpush1.bf16.msra.mxu1 %v11889_v61  ;;  %v5985_v61 = vld [vmem:[#allocation6 + $0x200] sm:$0xff] }
 0x347   :  { %5564 = vmatpush1.bf16.msra.mxu0 %v11886_v60  ;;  %5647 = vmatprep.subr.bf16.mxu1 %v11897_v63  ;;  %v10320_v60 = vcombine.high %v5977_v53, %v5981_v54  ;;  %v11925_v63 = vld [vmem:[#allocation2 + $0xec8] ss:$48 sps:$4 sm:$0xff]  }
 0x348   :  { %5565 = vmatprep.subr.bf16.mxu0 %v11894_v62  ;;  %v5989_v62 = vld [vmem:[#allocation6 + $0x220] sm:$0xff] }
 0x34a   :  { %5648 = vmatpush1.bf16.msra.mxu1 %v11895_v48  ;;  %v11930_v48 = vld [vmem:[#allocation2 + $0xf2c] ss:$48 sps:$4 sm:$0xff]  }
 0x34b   :  { %5566 = vmatpush1.bf16.msra.mxu0 %v11892_v2  ;;  %5649 = vmatprep.subr.bf16.mxu1 %v11903_v4  ;;  %v10319_v2 = vcombine.low %v5977_v53, %v5981_v54  ;;  %v5993_v4 = vld [vmem:[#allocation6 + $0x240] sm:$0xff] }
 0x34c   :  { %5567 = vmatprep.subr.bf16.mxu0 %v11900_v3  ;;  %v10328_v3 = vcombine.high %v5985_v61, %v5989_v62  ;;  %v12581_v53 = vld [vmem:[#allocation6 + $0x420] sm:$0xff] }
 0x34d   :  { %v11949_v54 = vld [vmem:[#allocation2 + $0x11c8] ss:$48 sps:$4 sm:$0xff]  }
 0x34e   :  { %5650 = vmatpush1.bf16.msra.mxu1 %v11901_v7  ;;  %v11933_v7 = vld [vmem:[#allocation2 + $0xf8c] ss:$48 sps:$4 sm:$0xff]  }
 0x34f   :  { %5568 = vmatpush1.bf16.msra.mxu0 %v11898_v8  ;;  %5660 = vmatprep.subr.bf16.mxu1 %v11906_v9  ;;  %v10327_v8 = vcombine.low %v5985_v61, %v5989_v62  ;;  %v10336_v9 = vcombine.high %v5993_v4, %v5997_v5  ;;  %v11957_v61 = vld [vmem:[#allocation2 + $0x128c] ss:$48 sps:$4 sm:$0xff]   ;;  %v5747_v62 = vlaneseq }
 0x350   :  { %8225 = vmatprep.subr.bf16.mxu0 %v10264_v10  ;;  %v6001_v10 = vld [vmem:[#allocation6 + $0x280] sm:$0xff] }
 0x351   :  { %5652 = vmatmul.mubr.bf16.vlgmr.msra.gmra.mrb[12].mxu1 %v12496_v11  ;;  %v10288_v11 = vcombine.high %v5945_v27, %v5949_v29  ;;  %v6021_v27 = vld [vmem:[#allocation6 + $0x320] sm:$0xff] }
 0x352   :  { %5570 = vmatmul.mubr.bf16.vlgmr.msra.gmra.mrb[8].mxu0 %v12524_v28  ;;  %5661 = vmatpush1.bf16.msra.mxu1 %v11904_v52  ;;  %v10335_v52 = vcombine.low %v5993_v4, %v5997_v5  ;;  %v11937_v29 = vld [vmem:[#allocation2 + $0x1048] ss:$48 sps:$4 sm:$0xff]   ;;  %v11963_v4 = vld [vmem:[#allocation2 + $0x134c] ss:$48 sps:$4 sm:$0xff]  }
 0x353   :  { %8226 = vmatpush1.bf16.msra.mxu0 %v10263_v14  ;;  %5662 = vmatprep.subr.bf16.mxu1 %v11909_v15  ;;  %v11936_v14 = vld [vmem:[#allocation2 + $0xfec] ss:$48 sps:$4 sm:$0xff]   ;;  %v10344_v15 = vcombine.high %v6001_v10, %v6005_v12 }
 0x354   :  { %8227 = vmatprep.subr.bf16.mxu0 %v10272_v16  ;;  %5692 = vmatprep.mubr.bf16.mxu1 %v12504_v36  ;;  %v5965_v36 = vld [vmem:[#allocation6 + $0x160] sm:$0xff] }
 0x355   :  { %v10304_v44 = vcombine.high %v5961_v0, %v5965_v36  ;;  %v10303_v49 = vcombine.low %v5961_v0, %v5965_v36  ;;  %v6009_v16 = vld [vmem:[#allocation6 + $0x2c0] sm:$0xff] }
 0x356   :  { %5663 = vmatpush1.bf16.msra.mxu1 %v11907_v20  ;;  %v10343_v20 = vcombine.low %v6001_v10, %v6005_v12  ;;  %v6037_v0 = vld [vmem:[#allocation6 + $0x3a0] sm:$0xff]  ;;  %v12602_v10 = vld [vmem:[#allocation4 + $0x1] ss:$2 sm:$0xff] }
 0x357   :  { %8228 = vmatpush1.bf16.msra.mxu0 %v10271_v23  ;;  %5664 = vmatprep.subr.bf16.mxu1 %v11912_v24  ;;  %v11939_v23 = vld [vmem:[#allocation2 + $0x104c] ss:$48 sps:$4 sm:$0xff]   ;;  %v10352_v24 = vcombine.high %v6009_v16, %v6013_v18  ;;  %v11943_v36 = vld [vmem:[#allocation2 + $0x1108] ss:$48 sps:$4 sm:$0xff]  }
 0x358   :  { %8229 = vmatprep.subr.bf16.mxu0 %v10280_v26  ;;  %v6017_v26 = vld [vmem:[#allocation6 + $0x300] sm:$0xff] }
 0x35a   :  { %5665 = vmatpush1.bf16.msra.mxu1 %v11910_v30  ;;  %v10351_v30 = vcombine.low %v6009_v16, %v6013_v18 }
 0x35b   :  { %8230 = vmatpush1.bf16.msra.mxu0 %v10279_v31  ;;  %5666 = vmatprep.subr.bf16.mxu1 %v11915_v33  ;;  %v11942_v31 = vld [vmem:[#allocation2 + $0x10ac] ss:$48 sps:$4 sm:$0xff]   ;;  %v10360_v33 = vcombine.high %v6017_v26, %v6021_v27 }
 0x35c   :  { %8231 = vmatprep.subr.bf16.mxu0 %v10288_v11  ;;  %v6025_v11 = vld [vmem:[#allocation6 + $0x340] sm:$0xff] }
 0x35e   :  { %5667 = vmatpush1.bf16.msra.mxu1 %v11913_v38  ;;  %v10359_v38 = vcombine.low %v6017_v26, %v6021_v27 }
 0x35f   :  { %8232 = vmatpush1.bf16.msra.mxu0 %v10287_v39  ;;  %5668 = vmatprep.subr.bf16.mxu1 %v11918_v40  ;;  %v11945_v39 = vld [vmem:[#allocation2 + $0x110c] ss:$48 sps:$4 sm:$0xff]   ;;  %v10368_v40 = vcombine.high %v6025_v11, %v6029_v35 }
 0x360   :  { %8233 = vmatprep.subr.bf16.mxu0 %v10296_v41  ;;  %v6033_v41 = vld [vmem:[#allocation6 + $0x380] sm:$0xff] }
 0x362   :  { %5669 = vmatpush1.bf16.msra.mxu1 %v11916_v42  ;;  %v10367_v42 = vcombine.low %v6025_v11, %v6029_v35 }
 0x363   :  { %8234 = vmatpush1.bf16.msra.mxu0 %v10295_v1  ;;  %5670 = vmatprep.subr.bf16.mxu1 %v11921_v43  ;;  %v11948_v1 = vld [vmem:[#allocation2 + $0x116c] ss:$48 sps:$4 sm:$0xff]   ;;  %v10376_v43 = vcombine.high %v6033_v41, %v6037_v0 }
 0x364   :  { %8235 = vmatprep.subr.bf16.mxu0 %v10304_v44  ;;  %v6041_v44 = vld [vmem:[#allocation6 + $0x3c0] sm:$0xff] }
 0x366   :  { %5671 = vmatpush1.bf16.msra.mxu1 %v11919_v47  ;;  %v10375_v47 = vcombine.low %v6033_v41, %v6037_v0 }
 0x367   :  { %8236 = vmatpush1.bf16.msra.mxu0 %v10303_v49  ;;  %5672 = vmatprep.subr.bf16.mxu1 %v11924_v50  ;;  %v11951_v49 = vld [vmem:[#allocation2 + $0x11cc] ss:$48 sps:$4 sm:$0xff]   ;;  %v10384_v50 = vcombine.high %v6041_v44, %v6045_v45 }
 0x368   :  { %8237 = vmatprep.subr.bf16.mxu0 %v10312_v51  ;;  %v12579_v51 = vld [vmem:[#allocation6 + $0x400] sm:$0xff] }
 0x36a   :  { %5673 = vmatpush1.bf16.msra.mxu1 %v11922_v55  ;;  %v10383_v55 = vcombine.low %v6041_v44, %v6045_v45  ;;  %v11978_v45 = vld [vmem:[#allocation2 + $0x152c] ss:$48 sps:$4 sm:$0xff]  }
 0x36b   :  { %8238 = vmatpush1.bf16.msra.mxu0 %v10311_v58  ;;  %5674 = vmatprep.subr.bf16.mxu1 %v11927_v59  ;;  %v11954_v58 = vld [vmem:[#allocation2 + $0x122c] ss:$48 sps:$4 sm:$0xff]   ;;  %v10392_v59 = vcombine.high %v12579_v51, %v12581_v53 }
 0x36c   :  { %8239 = vmatprep.subr.bf16.mxu0 %v10320_v60  ;;  %v11952_v60 = vld [vmem:[#allocation2 + $0x1228] ss:$48 sps:$4 sm:$0xff]  }
 0x36e   :  { %5675 = vmatpush1.bf16.msra.mxu1 %v11925_v63  ;;  %v11955_v63 = vld [vmem:[#allocation2 + $0x1288] ss:$48 sps:$4 sm:$0xff]  }
 0x36f   :  { %8240 = vmatpush1.bf16.msra.mxu0 %v10319_v2  ;;  %5676 = vmatprep.subr.bf16.mxu1 %v11930_v48  ;;  %v11960_v2 = vld [vmem:[#allocation2 + $0x12ec] ss:$48 sps:$4 sm:$0xff]   ;;  %v12587_v48 = vshrl.u32 %v5747_v62, 7 }
 0x370   :  { %8241 = vmatprep.subr.bf16.mxu0 %v10328_v3  ;;  %v11958_v3 = vld [vmem:[#allocation2 + $0x12e8] ss:$48 sps:$4 sm:$0xff]  }
 0x371   :  { %v12590_v5 = vsub.s32 0, %v12587_v48  ;;  %v6069_v62 = vld [vmem:[#allocation6 + $0x4a0] sm:$0xff] }
 0x372   :  { %5677 = vmatpush1.bf16.msra.mxu1 %v11928_v6  ;;  %v12592_v6 = vld [vmem:[#allocation4] ss:$2 sm:$0xff] }
 0x373   :  { %8242 = vmatpush1.bf16.msra.mxu0 %v10327_v8  ;;  %5678 = vmatprep.subr.bf16.mxu1 %v11933_v7  ;;  %v12595_v8 = vsub.s32 1, %v12587_v48  ;;  %v5750_v7 = vrot.slane %v12592_v6, %v12590_v5  ;;  %v5828_v16 = vrot.slane %v12602_v10, %v12590_v5 }
 0x374   :  { %8243 = vmatprep.subr.bf16.mxu0 %v10336_v9  ;;  %v12600_v9 = vsub.s32 6, %v12587_v48 }
 0x375   :  { %v5754_v12 = vrot.slane %v12592_v6, %v12595_v8 }
 0x376   :  { %5679 = vmatpush1.bf16.msra.mxu1 %v11931_v13  ;;  %v11964_v13 = vld [vmem:[#allocation2 + $0x13a8] ss:$48 sps:$4 sm:$0xff]   ;;  %v5774_v18 = vrot.slane %v12592_v6, %v12600_v9  ;;  %v5852_v26 = vrot.slane %v12602_v10, %v12600_v9 }
 0x377   :  { %8244 = vmatpush1.bf16.msra.mxu0 %v10335_v52  ;;  %5680 = vmatprep.subr.bf16.mxu1 %v11936_v14  ;;  %v12607_v52 = vsub.s32 7, %v12587_v48  ;;  %v11969_v14 = vld [vmem:[#allocation2 + $0x140c] ss:$48 sps:$4 sm:$0xff]  }
 0x378   :  { %8245 = vmatprep.subr.bf16.mxu0 %v10344_v15  ;;  %v5807_v15 = vmul.f32 %v12547_v32, %v5750_v7  ;;  %v11972_v32 = vld [vmem:[#allocation2 + $0x146c] ss:$48 sps:$4 sm:$0xff]  }
 0x379   :  { %v11987_v7 = vld [vmem:[#allocation2 + $0x164c] ss:$48 sps:$4 sm:$0xff]  }
 0x37a   :  { %5681 = vmatpush1.bf16.msra.mxu1 %v11934_v19  ;;  %v5808_v19 = vmul.f32 %v12550_v34, %v5754_v12 }
 0x37b   :  { %8246 = vmatpush1.bf16.msra.mxu0 %v10343_v20  ;;  %5682 = vmatprep.subr.bf16.mxu1 %v11939_v23  ;;  %v5832_v20 = vrot.slane %v12602_v10, %v12595_v8  ;;  %v5778_v23 = vrot.slane %v12592_v6, %v12607_v52 }
 0x37c   :  { %8247 = vmatprep.subr.bf16.mxu0 %v10352_v24  ;;  %v11967_v24 = vld [vmem:[#allocation2 + $0x1408] ss:$48 sps:$4 sm:$0xff]  }
 0x37e   :  { %5683 = vmatpush1.bf16.msra.mxu1 %v11937_v29  ;;  %v5856_v29 = vrot.slane %v12602_v10, %v12607_v52 }
 0x37f   :  { %8248 = vmatpush1.bf16.msra.mxu0 %v10351_v30  ;;  %5684 = vmatprep.subr.bf16.mxu1 %v11942_v31  ;;  %v5885_v30 = vadd.f32 %v5828_v16, %v5807_v15  ;;  %v11985_v15 = vld [vmem:[#allocation2 + $0x1648] ss:$48 sps:$4 sm:$0xff]  }
 0x380   :  { %8249 = vmatprep.subr.bf16.mxu0 %v10360_v33  ;;  %v5886_v33 = vadd.f32 %v5832_v20, %v5808_v19  ;;  %v6089_v20 = vld [vmem:[#allocation6 + $0x540] sm:$0xff] }
 0x381   :  { %v5897_v0 = vmax.f32 %v5885_v30, 0.0  ;;  %v6101_v30 = vld [vmem:[#allocation6 + $0x5a0] sm:$0xff] }
 0x382   :  { %5685 = vmatpush1.bf16.msra.mxu1 %v11940_v37  ;;  %v11970_v37 = vld [vmem:[#allocation2 + $0x1468] ss:$48 sps:$4 sm:$0xff]  }
 0x383   :  { %8250 = vmatpush1.bf16.msra.mxu0 %v10359_v38  ;;  %5686 = vmatprep.subr.bf16.mxu1 %v11945_v39 }
 0x384   :  { %8251 = vmatprep.subr.bf16.mxu0 %v10368_v40  ;;  %v11975_v40 = vld [vmem:[#allocation2 + $0x14cc] ss:$48 sps:$4 sm:$0xff]  }
 0x386   :  { %5687 = vmatpush1.bf16.msra.mxu1 %v11943_v36 }
 0x387   :  { %8252 = vmatpush1.bf16.msra.mxu0 %v10367_v42  ;;  %5688 = vmatprep.subr.bf16.mxu1 %v11948_v1  ;;  %v5898_v42 = vmax.f32 %v5886_v33, 0.0  ;;  %v11996_v33 = vld [vmem:[#allocation2 + $0x176c] ss:$48 sps:$4 sm:$0xff]  }
 0x388   :  { %8253 = vmatprep.subr.bf16.mxu0 %v10376_v43  ;;  %v11973_v43 = vld [vmem:[#allocation2 + $0x14c8] ss:$48 sps:$4 sm:$0xff]  }
 0x38a   :  { %5689 = vmatpush1.bf16.msra.mxu1 %v11946_v46 }
 0x38b   :  { %8254 = vmatpush1.bf16.msra.mxu0 %v10375_v47  ;;  %5690 = vmatprep.subr.bf16.mxu1 %v11951_v49  ;;  %v6057_v47 = vld [vmem:[#allocation6 + $0x440] sm:$0xff] }
 0x38c   :  { %8255 = vmatprep.subr.bf16.mxu0 %v10384_v50  ;;  %v6061_v49 = vld [vmem:[#allocation6 + $0x460] sm:$0xff] }
 0x38e   :  { %5691 = vmatpush1.bf16.msra.mxu1 %v11949_v54  ;;  %v11976_v54 = vld [vmem:[#allocation2 + $0x1528] ss:$48 sps:$4 sm:$0xff]  }
 0x38f   :  { %8256 = vmatpush1.bf16.msra.mxu0 %v10383_v55  ;;  %5701 = vmatprep.subr.bf16.mxu1 %v11954_v58  ;;  %v10391_v55 = vcombine.low %v12579_v51, %v12581_v53  ;;  %v6073_v51 = vld [vmem:[#allocation6 + $0x4c0] sm:$0xff] }
 0x390   :  { %8266 = vmatprep.subr.bf16.mxu0 %v10392_v59  ;;  %v11981_v59 = vld [vmem:[#allocation2 + $0x158c] ss:$48 sps:$4 sm:$0xff]  }
 0x391   :  { %5693 = vmatmul.mubr.bf16.vlgmr.msra.gmra.mrb[12].mxu1 %v12510_v17  ;;  %v11961_v17 = vld [vmem:[#allocation2 + $0x1348] ss:$48 sps:$4 sm:$0xff]  }
 0x392   :  { %5702 = vmatpush1.bf16.msra.mxu1 %v11952_v60  ;;  %5733 = vmatprep.mubr.bf16.mxu1 %v12517_v25  ;;  %v11966_v25 = vld [vmem:[#allocation2 + $0x13ac] ss:$48 sps:$4 sm:$0xff]   ;;  %v10400_v60 = vcombine.high %v6057_v47, %v6061_v49 }
 0x393   :  { %5703 = vmatprep.subr.bf16.mxu1 %v11957_v61  ;;  %v6065_v61 = vld [vmem:[#allocation6 + $0x480] sm:$0xff] }
 0x394   :  { %v6077_v53 = vld [vmem:[#allocation6 + $0x4e0] sm:$0xff] }
 0x395   :  { %v10416_v12 = vcombine.high %v6073_v51, %v6077_v53  ;;  %v10415_v16 = vcombine.low %v6073_v51, %v6077_v53  ;;  %v12632_v51 = vld [vmem:[#allocation6 + $0x800] sm:$0xff] }
 0x396   :  { %5704 = vmatpush1.bf16.msra.mxu1 %v11955_v63  ;;  %v11979_v63 = vld [vmem:[#allocation2 + $0x1588] ss:$48 sps:$4 sm:$0xff]  }
 0x397   :  { %5705 = vmatprep.subr.bf16.mxu1 %v11960_v2  ;;  %v10399_v2 = vcombine.low %v6057_v47, %v6061_v49  ;;  %v5930_v47 = vld [vmem:[#allocation6 + $0x48] sm:$0xff]  ;;  %v12634_v53 = vld [vmem:[#allocation6 + $0x820] sm:$0xff] }
 0x398   :  { %v5934_v49 = vld [vmem:[#allocation6 + $0x68] sm:$0xff] }
 0x39a   :  { %5706 = vmatpush1.bf16.msra.mxu1 %v11958_v3  ;;  %v11984_v3 = vld [vmem:[#allocation2 + $0x15ec] ss:$48 sps:$4 sm:$0xff]  }
 0x39b   :  { %5707 = vmatprep.subr.bf16.mxu1 %v11963_v4  ;;  %v10408_v4 = vcombine.high %v6065_v61, %v6069_v62 }
 0x39e   :  { %5708 = vmatpush1.bf16.msra.mxu1 %v11961_v17  ;;  %v11982_v17 = vld [vmem:[#allocation2 + $0x15e8] ss:$48 sps:$4 sm:$0xff]  }
 0x39f   :  { %5709 = vmatprep.subr.bf16.mxu1 %v11966_v25  ;;  %v10407_v25 = vcombine.low %v6065_v61, %v6069_v62  ;;  %v5938_v62 = vld [vmem:[#allocation6 + $0x88] sm:$0xff] }
 0x3a2   :  { %5710 = vmatpush1.bf16.msra.mxu1 %v11964_v13  ;;  %v6081_v13 = vld [vmem:[#allocation6 + $0x500] sm:$0xff] }
 0x3a3   :  { %5711 = vmatprep.subr.bf16.mxu1 %v11969_v14  ;;  %v6085_v14 = vld [vmem:[#allocation6 + $0x520] sm:$0xff] }
 0x3a4   :  { %v5407_v27 = vpop.f32.mrb[8].mxu1  ;;  %v10424_v19 = vcombine.high %v6081_v13, %v6085_v14 }
 0x3a5   :  { %v5813_v31 = vmul.f32 %v5774_v18, %v5407_v27  ;;  %v5409_v34 = vpop.f32.mrb[9].mxu1  ;;  %v11990_v18 = vld [vmem:[#allocation2 + $0x16ac] ss:$48 sps:$4 sm:$0xff]  }
 0x3a6   :  { %v5814_v11 = vmul.f32 %v5778_v23, %v5409_v34  ;;  %v5411_v35 = vpop.f32.mrb[10].mxu1  ;;  %5712 = vmatpush1.bf16.msra.mxu1 %v11967_v24  ;;  %v6093_v23 = vld [vmem:[#allocation6 + $0x560] sm:$0xff] }
 0x3a7   :  { %v5891_v38 = vadd.f32 %v5852_v26, %v5813_v31  ;;  %v5412_v39 = vpop.f32.mrb[11].mxu1  ;;  %5713 = vmatprep.subr.bf16.mxu1 %v11972_v32  ;;  %v11988_v24 = vld [vmem:[#allocation2 + $0x16a8] ss:$48 sps:$4 sm:$0xff]   ;;  %v10423_v26 = vcombine.low %v6081_v13, %v6085_v14  ;;  %v11993_v32 = vld [vmem:[#allocation2 + $0x170c] ss:$48 sps:$4 sm:$0xff]   ;;  %v10432_v27 = vcombine.high %v6089_v20, %v6093_v23  ;;  %v10431_v34 = vcombine.low %v6089_v20, %v6093_v23  ;;  %v5946_v13 = vld [vmem:[#allocation6 + $0xc8] sm:$0xff] }
 0x3a8   :  { %v5892_v41 = vadd.f32 %v5856_v29, %v5814_v11  ;;  %v6097_v29 = vld [vmem:[#allocation6 + $0x580] sm:$0xff]  ;;  %v5950_v14 = vld [vmem:[#allocation6 + $0xe8] sm:$0xff] }
 0x3a9   :  { %v5903_v36 = vmax.f32 %v5891_v38, 0.0  ;;  %v11991_v31 = vld [vmem:[#allocation2 + $0x1708] ss:$48 sps:$4 sm:$0xff]   ;;  %v10440_v11 = vcombine.high %v6097_v29, %v6101_v30  ;;  %v10439_v39 = vcombine.low %v6097_v29, %v6101_v30  ;;  %v5954_v23 = vld [vmem:[#allocation6 + $0x108] sm:$0xff]  ;;  %v10289_v29 = vcombine.low %v5946_v13, %v5950_v14 }
 0x3aa   :  { %v5904_v1 = vmax.f32 %v5892_v41, 0.0  ;;  %5714 = vmatpush1.bf16.msra.mxu1 %v11970_v37  ;;  %v6105_v35 = vld [vmem:[#allocation6 + $0x5c0] sm:$0xff]  ;;  %v5922_v41 = vld [vmem:[#allocation6 + $0x8] sm:$0xff] }
 0x3ab   :  { %v5909_v44 = vmax.f32 %v5897_v0, %v5903_v36  ;;  %5715 = vmatprep.subr.bf16.mxu1 %v11975_v40  ;;  %v6109_v37 = vld [vmem:[#allocation6 + $0x5e0] sm:$0xff]  ;;  %v5926_v36 = vld [vmem:[#allocation6 + $0x28] sm:$0xff] }
 0x3ac   :  { %v5910_v46 = vmax.f32 %v5898_v42, %v5904_v1  ;;  %v11994_v38 = vld [vmem:[#allocation2 + $0x1768] ss:$48 sps:$4 sm:$0xff]   ;;  %v11999_v40 = vld [vmem:[#allocation2 + $0x17cc] ss:$48 sps:$4 sm:$0xff]   ;;  %v10448_v0 = vcombine.high %v6105_v35, %v6109_v37 }
 0x3ad   :  { %v12627_v58 = vpack.c.bf16 %v5909_v44, %v5909_v44  ;;  %v6113_v42 = vld [vmem:[#allocation6 + $0x600] sm:$0xff]  ;;  %v10447_v44 = vcombine.low %v6105_v35, %v6109_v37 }
 0x3ae   :  { %v12623_v50 = vpack.c.bf16 %v5910_v46, %v5910_v46  ;;  %5716 = vmatpush1.bf16.msra.mxu1 %v11973_v43  ;;  %v6117_v1 = vld [vmem:[#allocation6 + $0x620] sm:$0xff] }
 0x3af   :  { %5717 = vmatprep.subr.bf16.mxu1 %v11978_v45  ;;  %v11997_v43 = vld [vmem:[#allocation2 + $0x17c8] ss:$48 sps:$4 sm:$0xff]   ;;  %v10266_v45 = vcombine.high %v5922_v41, %v5926_v36  ;;  %v10456_v46 = vcombine.high %v6113_v42, %v6117_v1  ;;  %v10455_v61 = vcombine.low %v6113_v42, %v6117_v1 }
 0x3b0   :  { %8257 = vmatprep.mubr.bf16.mxu0 %v12623_v50  ;;  %v6153_v35 = vld [vmem:[#allocation6 + $0x740] sm:$0xff] }
 0x3b1   :  { %8258 = vmatmul.mubr.bf16.vlgmr.msra.gmra.mrb[12].mxu0 %v12627_v58  ;;  %v6157_v37 = vld [vmem:[#allocation6 + $0x760] sm:$0xff] }
 0x3b2   :  { %5718 = vmatpush1.bf16.msra.mxu1 %v11976_v54  ;;  %8267 = vmatpush1.bf16.msra.mxu0 %v10391_v55  ;;  %v6121_v54 = vld [vmem:[#allocation6 + $0x640] sm:$0xff] }
 0x3b3   :  { %5719 = vmatprep.subr.bf16.mxu1 %v11981_v59  ;;  %8268 = vmatprep.subr.bf16.mxu0 %v10400_v60  ;;  %v6125_v55 = vld [vmem:[#allocation6 + $0x660] sm:$0xff]  ;;  %v10265_v59 = vcombine.low %v5922_v41, %v5926_v36  ;;  %v10274_v60 = vcombine.high %v5930_v47, %v5934_v49  ;;  %v5970_v41 = vld [vmem:[#allocation6 + $0x188] sm:$0xff]  ;;  %v10496_v36 = vcombine.high %v6153_v35, %v6157_v37 }
 0x3b4   :  { %v6161_v42 = vld [vmem:[#allocation6 + $0x780] sm:$0xff] }
 0x3b5   :  { %v6165_v1 = vld [vmem:[#allocation6 + $0x7a0] sm:$0xff] }
 0x3b6   :  { %5720 = vmatpush1.bf16.msra.mxu1 %v11979_v63  ;;  %8269 = vmatpush1.bf16.msra.mxu0 %v10399_v2  ;;  %v5942_v63 = vld [vmem:[#allocation6 + $0xa8] sm:$0xff]  ;;  %v10464_v2 = vcombine.high %v6121_v54, %v6125_v55 }
 0x3b7   :  { %5721 = vmatprep.subr.bf16.mxu1 %v11984_v3  ;;  %8270 = vmatprep.subr.bf16.mxu0 %v10408_v4  ;;  %v6129_v3 = vld [vmem:[#allocation6 + $0x680] sm:$0xff] }
 0x3b8   :  { %v6133_v4 = vld [vmem:[#allocation6 + $0x6a0] sm:$0xff] }
 0x3b9   :  { %v10471_v20 = vcombine.low %v6129_v3, %v6133_v4 }
 0x3ba   :  { %5722 = vmatpush1.bf16.msra.mxu1 %v11982_v17  ;;  %8271 = vmatpush1.bf16.msra.mxu0 %v10407_v25  ;;  %v10273_v17 = vcombine.low %v5930_v47, %v5934_v49  ;;  %v10519_v25 = vcombine.low %v12632_v51, %v12634_v53  ;;  %v5982_v47 = vld [vmem:[#allocation6 + $0x1e8] sm:$0xff]  ;;  %v10504_v49 = vcombine.high %v6161_v42, %v6165_v1 }
 0x3bb   :  { %5723 = vmatprep.subr.bf16.mxu1 %v11987_v7  ;;  %8272 = vmatprep.subr.bf16.mxu0 %v10416_v12  ;;  %v10282_v7 = vcombine.high %v5938_v62, %v5942_v63  ;;  %v10463_v12 = vcombine.low %v6121_v54, %v6125_v55  ;;  %v6169_v54 = vld [vmem:[#allocation6 + $0x7c0] sm:$0xff] }
 0x3bc   :  { %v6173_v55 = vld [vmem:[#allocation6 + $0x7e0] sm:$0xff] }
 0x3be   :  { %5724 = vmatpush1.bf16.msra.mxu1 %v11985_v15  ;;  %8273 = vmatpush1.bf16.msra.mxu0 %v10415_v16  ;;  %v6137_v15 = vld [vmem:[#allocation6 + $0x6c0] sm:$0xff] }
 0x3bf   :  { %5725 = vmatprep.subr.bf16.mxu1 %v11990_v18  ;;  %8274 = vmatprep.subr.bf16.mxu0 %v10424_v19  ;;  %v6141_v16 = vld [vmem:[#allocation6 + $0x6e0] sm:$0xff]  ;;  %v10281_v18 = vcombine.low %v5938_v62, %v5942_v63  ;;  %v10290_v19 = vcombine.high %v5946_v13, %v5950_v14  ;;  %v5986_v62 = vld [vmem:[#allocation6 + $0x208] sm:$0xff]  ;;  %v10520_v13 = vcombine.high %v12632_v51, %v12634_v53 }
 0x3c0   :  { %v5990_v63 = vld [vmem:[#allocation6 + $0x228] sm:$0xff]  ;;  %v6209_v53 = vld [vmem:[#allocation6 + $0x900] sm:$0xff] }
 0x3c1   :  { %v10329_v14 = vcombine.low %v5986_v62, %v5990_v63  ;;  %v6150_v51 = vld [vmem:[#allocation6 + $0x728] sm:$0xff] }
 0x3c2   :  { %5726 = vmatpush1.bf16.msra.mxu1 %v11988_v24  ;;  %8275 = vmatpush1.bf16.msra.mxu0 %v10423_v26  ;;  %v5958_v24 = vld [vmem:[#allocation6 + $0x128] sm:$0xff]  ;;  %v10480_v26 = vcombine.high %v6137_v15, %v6141_v16 }
 0x3c3   :  { %5727 = vmatprep.subr.bf16.mxu1 %v11993_v32  ;;  %8276 = vmatprep.subr.bf16.mxu0 %v10432_v27  ;;  %v6145_v32 = vld [vmem:[#allocation6 + $0x700] sm:$0xff]  ;;  %v10298_v30 = vcombine.high %v5954_v23, %v5958_v24 }
 0x3c4   :  { %v6149_v27 = vld [vmem:[#allocation6 + $0x720] sm:$0xff] }
 0x3c6   :  { %5728 = vmatpush1.bf16.msra.mxu1 %v11991_v31  ;;  %8277 = vmatpush1.bf16.msra.mxu0 %v10431_v34  ;;  %v10479_v31 = vcombine.low %v6137_v15, %v6141_v16  ;;  %v5962_v34 = vld [vmem:[#allocation6 + $0x148] sm:$0xff] }
 0x3c7   :  { %5729 = vmatprep.subr.bf16.mxu1 %v11996_v33  ;;  %8278 = vmatprep.subr.bf16.mxu0 %v10440_v11  ;;  %v5966_v33 = vld [vmem:[#allocation6 + $0x168] sm:$0xff]  ;;  %v10488_v11 = vcombine.high %v6145_v32, %v6149_v27 }
 0x3c8   :  { %v6002_v15 = vld [vmem:[#allocation6 + $0x288] sm:$0xff] }
 0x3c9   :  { %v6006_v16 = vld [vmem:[#allocation6 + $0x2a8] sm:$0xff] }
 0x3ca   :  { %5730 = vmatpush1.bf16.msra.mxu1 %v11994_v38  ;;  %8279 = vmatpush1.bf16.msra.mxu0 %v10439_v39  ;;  %v10297_v38 = vcombine.low %v5954_v23, %v5958_v24  ;;  %v10306_v39 = vcombine.high %v5962_v34, %v5966_v33  ;;  %v6014_v23 = vld [vmem:[#allocation6 + $0x2e8] sm:$0xff]  ;;  %v10345_v24 = vcombine.low %v6002_v15, %v6006_v16 }
 0x3cb   :  { %5731 = vmatprep.subr.bf16.mxu1 %v11999_v40  ;;  %8280 = vmatprep.subr.bf16.mxu0 %v10448_v0  ;;  %v10487_v40 = vcombine.low %v6145_v32, %v6149_v27  ;;  %v5974_v0 = vld [vmem:[#allocation6 + $0x1a8] sm:$0xff] }
 0x3cc   :  { %v6018_v32 = vld [vmem:[#allocation6 + $0x308] sm:$0xff] }
 0x3cd   :  { %v6022_v27 = vld [vmem:[#allocation6 + $0x328] sm:$0xff] }
 0x3ce   :  { %5732 = vmatpush1.bf16.msra.mxu1 %v11997_v43  ;;  %8281 = vmatpush1.bf16.msra.mxu0 %v10447_v44  ;;  %v10305_v43 = vcombine.low %v5962_v34, %v5966_v33  ;;  %v10314_v44 = vcombine.high %v5970_v41, %v5974_v0  ;;  %v6030_v34 = vld [vmem:[#allocation6 + $0x368] sm:$0xff]  ;;  %v10361_v33 = vcombine.low %v6018_v32, %v6022_v27 }
 0x3cf   :  { %8348 = vmatprep.subr.bf16.mxu1 %v10266_v45  ;;  %8282 = vmatprep.subr.bf16.mxu0 %v10456_v46  ;;  %v10495_v45 = vcombine.low %v6153_v35, %v6157_v37  ;;  %v5978_v46 = vld [vmem:[#allocation6 + $0x1c8] sm:$0xff] }
 0x3d0   :  { %v6034_v35 = vld [vmem:[#allocation6 + $0x388] sm:$0xff] }
 0x3d1   :  { %5734 = vmatmul.mubr.bf16.vlgmr.msra.gmra.mrb[12].mxu1 %v12524_v28  ;;  %v10472_v28 = vcombine.high %v6129_v3, %v6133_v4  ;;  %v10321_v3 = vcombine.low %v5978_v46, %v5982_v47  ;;  %v10330_v4 = vcombine.high %v5986_v62, %v5990_v63  ;;  %v6038_v37 = vld [vmem:[#allocation6 + $0x3a8] sm:$0xff] }
 0x3d2   :  { %8349 = vmatpush1.bf16.msra.mxu1 %v10265_v59  ;;  %8380 = vmatprep.mubr.bf16.mxu1 %v12623_v50  ;;  %v10313_v59 = vcombine.low %v5970_v41, %v5974_v0  ;;  %v6046_v41 = vld [vmem:[#allocation6 + $0x3e8] sm:$0xff]  ;;  %v10377_v0 = vcombine.low %v6034_v35, %v6038_v37 }
 0x3d3   :  { %8350 = vmatprep.subr.bf16.mxu1 %v10274_v60  ;;  %8283 = vmatpush1.bf16.msra.mxu0 %v10455_v61  ;;  %v10322_v60 = vcombine.high %v5978_v46, %v5982_v47  ;;  %v10503_v61 = vcombine.low %v6161_v42, %v6165_v1  ;;  %v6050_v42 = vld [vmem:[#allocation6 + $0x408] sm:$0xff] }
 0x3d4   :  { %8284 = vmatprep.subr.bf16.mxu0 %v10464_v2  ;;  %v10512_v2 = vcombine.high %v6169_v54, %v6173_v55  ;;  %v6054_v1 = vld [vmem:[#allocation6 + $0x428] sm:$0xff] }
 0x3d5   :  { %v6062_v46 = vld [vmem:[#allocation6 + $0x468] sm:$0xff]  ;;  %v10393_v47 = vcombine.low %v6050_v42, %v6054_v1 }
 0x3d6   :  { %8351 = vmatpush1.bf16.msra.mxu1 %v10273_v17  ;;  %v10511_v17 = vcombine.low %v6169_v54, %v6173_v55  ;;  %v6066_v54 = vld [vmem:[#allocation6 + $0x488] sm:$0xff] }
 0x3d7   :  { %8352 = vmatprep.subr.bf16.mxu1 %v10282_v7  ;;  %8285 = vmatpush1.bf16.msra.mxu0 %v10463_v12  ;;  %v5994_v7 = vld [vmem:[#allocation6 + $0x248] sm:$0xff] }
 0x3d8   :  { %8286 = vmatprep.subr.bf16.mxu0 %v10472_v28  ;;  %v5998_v12 = vld [vmem:[#allocation6 + $0x268] sm:$0xff] }
 0x3d9   :  { %v10338_v28 = vcombine.high %v5994_v7, %v5998_v12  ;;  %v6070_v55 = vld [vmem:[#allocation6 + $0x4a8] sm:$0xff] }
 0x3da   :  { %8353 = vmatpush1.bf16.msra.mxu1 %v10281_v18  ;;  %v10337_v18 = vcombine.low %v5994_v7, %v5998_v12  ;;  %v6078_v62 = vld [vmem:[#allocation6 + $0x4e8] sm:$0xff]  ;;  %v10409_v63 = vcombine.low %v6066_v54, %v6070_v55  ;;  %v12646_v7 = vsub.s32 3, %v12587_v48 }
 0x3db   :  { %8354 = vmatprep.subr.bf16.mxu1 %v10290_v19  ;;  %8287 = vmatpush1.bf16.msra.mxu0 %v10471_v20  ;;  %v10346_v19 = vcombine.high %v6002_v15, %v6006_v16  ;;  %v6010_v20 = vld [vmem:[#allocation6 + $0x2c8] sm:$0xff] }
 0x3dc   :  { %8288 = vmatprep.subr.bf16.mxu0 %v10480_v26  ;;  %v10354_v26 = vcombine.high %v6010_v20, %v6014_v23  ;;  %v5762_v16 = vrot.slane %v12592_v6, %v12646_v7 }
 0x3de   :  { %8355 = vmatpush1.bf16.msra.mxu1 %v10289_v29  ;;  %v10353_v29 = vcombine.low %v6010_v20, %v6014_v23  ;;  %v12654_v23 = vld [vmem:[#allocation4 + $0x11] ss:$2 sm:$0xf] }
 0x3df   :  { %8356 = vmatprep.subr.bf16.mxu1 %v10298_v30  ;;  %8289 = vmatpush1.bf16.msra.mxu0 %v10479_v31  ;;  %v10362_v30 = vcombine.high %v6018_v32, %v6022_v27  ;;  %v6026_v31 = vld [vmem:[#allocation6 + $0x348] sm:$0xff] }
 0x3e0   :  { %8290 = vmatprep.subr.bf16.mxu0 %v10488_v11  ;;  %v10370_v11 = vcombine.high %v6026_v31, %v6030_v34 }
 0x3e2   :  { %8357 = vmatpush1.bf16.msra.mxu1 %v10297_v38  ;;  %v10369_v38 = vcombine.low %v6026_v31, %v6030_v34 }
 0x3e3   :  { %8358 = vmatprep.subr.bf16.mxu1 %v10306_v39  ;;  %8291 = vmatpush1.bf16.msra.mxu0 %v10487_v40  ;;  %v10378_v39 = vcombine.high %v6034_v35, %v6038_v37  ;;  %v6042_v40 = vld [vmem:[#allocation6 + $0x3c8] sm:$0xff]  ;;  %v5864_v35 = vrot.slane %v12654_v23, %v12595_v8 }
 0x3e4   :  { %8292 = vmatprep.subr.bf16.mxu0 %v10496_v36  ;;  %v10386_v36 = vcombine.high %v6042_v40, %v6046_v41  ;;  %v6106_v37 = vld [vmem:[#allocation6 + $0x5c8] sm:$0xff] }
 0x3e6   :  { %8359 = vmatpush1.bf16.msra.mxu1 %v10305_v43  ;;  %v10385_v43 = vcombine.low %v6042_v40, %v6046_v41 }
 0x3e7   :  { %8360 = vmatprep.subr.bf16.mxu1 %v10314_v44  ;;  %8293 = vmatpush1.bf16.msra.mxu0 %v10495_v45  ;;  %v10394_v44 = vcombine.high %v6050_v42, %v6054_v1  ;;  %v6058_v45 = vld [vmem:[#allocation6 + $0x448] sm:$0xff] }
 0x3e8   :  { %8294 = vmatprep.subr.bf16.mxu0 %v10504_v49  ;;  %v10402_v49 = vcombine.high %v6058_v45, %v6062_v46 }
 0x3ea   :  { %8361 = vmatpush1.bf16.msra.mxu1 %v10313_v59  ;;  %v10401_v59 = vcombine.low %v6058_v45, %v6062_v46  ;;  %v6114_v45 = vld [vmem:[#allocation6 + $0x608] sm:$0xff] }
 0x3eb   :  { %8362 = vmatprep.subr.bf16.mxu1 %v10322_v60  ;;  %8295 = vmatpush1.bf16.msra.mxu0 %v10503_v61  ;;  %v10410_v60 = vcombine.high %v6066_v54, %v6070_v55  ;;  %v6074_v61 = vld [vmem:[#allocation6 + $0x4c8] sm:$0xff] }
 0x3ec   :  { %8296 = vmatprep.subr.bf16.mxu0 %v10512_v2  ;;  %v10418_v2 = vcombine.high %v6074_v61, %v6078_v62  ;;  %v10417_v12 = vcombine.low %v6074_v61, %v6078_v62  ;;  %v6118_v46 = vld [vmem:[#allocation6 + $0x628] sm:$0xff] }
 0x3ed   :  { %v10458_v61 = vcombine.high %v6114_v45, %v6118_v46  ;;  %v6122_v62 = vld [vmem:[#allocation6 + $0x648] sm:$0xff] }
 0x3ee   :  { %8363 = vmatpush1.bf16.msra.mxu1 %v10321_v3  ;;  %v6082_v3 = vld [vmem:[#allocation6 + $0x508] sm:$0xff] }
 0x3ef   :  { %8364 = vmatprep.subr.bf16.mxu1 %v10330_v4  ;;  %8297 = vmatpush1.bf16.msra.mxu0 %v10511_v17  ;;  %v6086_v4 = vld [vmem:[#allocation6 + $0x528] sm:$0xff]  ;;  %v12643_v17 = vsub.s32 2, %v12587_v48 }
 0x3f0   :  { %8307 = vmatprep.subr.bf16.mxu0 %v10520_v13  ;;  %v10426_v13 = vcombine.high %v6082_v3, %v6086_v4 }
 0x3f1   :  { %v5758_v15 = vrot.slane %v12592_v6, %v12643_v17  ;;  %v5836_v27 = vrot.slane %v12602_v10, %v12643_v17  ;;  %v5810_v6 = vmul.f32 %v5762_v16, %v12562_v57 }
 0x3f2   :  { %8365 = vmatpush1.bf16.msra.mxu1 %v10329_v14  ;;  %v6090_v14 = vld [vmem:[#allocation6 + $0x548] sm:$0xff] }
 0x3f3   :  { %8366 = vmatprep.subr.bf16.mxu1 %v10338_v28  ;;  %v6094_v28 = vld [vmem:[#allocation6 + $0x568] sm:$0xff]  ;;  %v5809_v32 = vmul.f32 %v5758_v15, %v12560_v56 }
 0x3f4   :  { %v10434_v20 = vcombine.high %v6090_v14, %v6094_v28  ;;  %v10433_v34 = vcombine.low %v6090_v14, %v6094_v28  ;;  %v10457_v28 = vcombine.low %v6114_v45, %v6118_v46 }
 0x3f5   :  { %v5887_v57 = vadd.f32 %v5836_v27, %v5809_v32  ;;  %v6193_v32 = vld [vmem:[#allocation6 + $0x880] sm:$0xff] }
 0x3f6   :  { %8367 = vmatpush1.bf16.msra.mxu1 %v10337_v18  ;;  %v10425_v18 = vcombine.low %v6082_v3, %v6086_v4  ;;  %v6185_v3 = vld [vmem:[#allocation6 + $0x840] sm:$0xff] }
 0x3f7   :  { %8368 = vmatprep.subr.bf16.mxu1 %v10346_v19  ;;  %v12652_v19 = vld [vmem:[#allocation4 + $0x10] ss:$2 sm:$0xf]  ;;  %v6189_v4 = vld [vmem:[#allocation6 + $0x860] sm:$0xff] }
 0x3f8   :  { %v5786_v31 = vrot.slane %v12652_v19, %v12595_v8  ;;  %v6197_v27 = vld [vmem:[#allocation6 + $0x8a0] sm:$0xff] }
 0x3fa   :  { %8369 = vmatpush1.bf16.msra.mxu1 %v10345_v24  ;;  %v6098_v24 = vld [vmem:[#allocation6 + $0x588] sm:$0xff] }
 0x3fb   :  { %8370 = vmatprep.subr.bf16.mxu1 %v10354_v26  ;;  %v6102_v26 = vld [vmem:[#allocation6 + $0x5a8] sm:$0xff] }
 0x3fc   :  { %v10442_v56 = vcombine.high %v6098_v24, %v6102_v26 }
 0x3fe   :  { %8371 = vmatpush1.bf16.msra.mxu1 %v10353_v29  ;;  %v5782_v29 = vrot.slane %v12652_v19, %v12590_v5 }
 0x3ff   :  { %8372 = vmatprep.subr.bf16.mxu1 %v10362_v30  ;;  %v5840_v30 = vrot.slane %v12602_v10, %v12646_v7 }
 0x401   :  { %v5888_v10 = vadd.f32 %v5840_v30, %v5810_v6  ;;  %v10527_v6 = vcombine.low %v6185_v3, %v6189_v4 }
 0x402   :  { %8373 = vmatpush1.bf16.msra.mxu1 %v10361_v33  ;;  %v5860_v33 = vrot.slane %v12654_v23, %v12590_v5 }
 0x403   :  { %8374 = vmatprep.subr.bf16.mxu1 %v10370_v11  ;;  %v5900_v54 = vmax.f32 %v5888_v10, 0.0 }
 0x406   :  { %8375 = vmatpush1.bf16.msra.mxu1 %v10369_v38  ;;  %v6110_v38 = vld [vmem:[#allocation6 + $0x5e8] sm:$0xff] }
 0x407   :  { %8376 = vmatprep.subr.bf16.mxu1 %v10378_v39 }
 0x40a   :  { %8377 = vmatpush1.bf16.msra.mxu1 %v10377_v0 }
 0x40b   :  { %8378 = vmatprep.subr.bf16.mxu1 %v10386_v36  ;;  %v10441_v36 = vcombine.low %v6098_v24, %v6102_v26  ;;  %v6134_v26 = vld [vmem:[#allocation6 + $0x6a8] sm:$0xff] }
 0x40e   :  { %8379 = vmatpush1.bf16.msra.mxu1 %v10385_v43  ;;  %v10450_v43 = vcombine.high %v6106_v37, %v6110_v38 }
 0x40f   :  { %8389 = vmatprep.subr.bf16.mxu1 %v10394_v44 }
 0x411   :  { %8381 = vmatmul.mubr.bf16.vlgmr.msra.gmra.mrb[16].mxu1 %v12627_v58 }
 0x412   :  { %8390 = vmatpush1.bf16.msra.mxu1 %v10393_v47  ;;  %v5899_v47 = vmax.f32 %v5887_v57, 0.0  ;;  %v6146_v57 = vld [vmem:[#allocation6 + $0x708] sm:$0xff] }
 0x413   :  { %8391 = vmatprep.subr.bf16.mxu1 %v10402_v49 }
 0x416   :  { %8392 = vmatpush1.bf16.msra.mxu1 %v10401_v59  ;;  %v10449_v59 = vcombine.low %v6106_v37, %v6110_v38  ;;  %v10535_v37 = vcombine.low %v6193_v32, %v6197_v27 }
 0x417   :  { %8393 = vmatprep.subr.bf16.mxu1 %v10410_v60 }
 0x41a   :  { %8394 = vmatpush1.bf16.msra.mxu1 %v10409_v63 }
 0x41b   :  { %8395 = vmatprep.subr.bf16.mxu1 %v10418_v2  ;;  %v6126_v2 = vld [vmem:[#allocation6 + $0x668] sm:$0xff] }
 0x41c   :  { %v10466_v16 = vcombine.high %v6122_v62, %v6126_v2 }
 0x41e   :  { %8396 = vmatpush1.bf16.msra.mxu1 %v10417_v12  ;;  %v12670_v12 = vld [vmem:[#allocation6 + $0x10] sm:$0xff] }
 0x41f   :  { %8397 = vmatprep.subr.bf16.mxu1 %v10426_v13  ;;  %v12672_v13 = vld [vmem:[#allocation6 + $0x30] sm:$0xff] }
 0x420   :  { %v10267_v24 = vcombine.low %v12670_v12, %v12672_v13 }
 0x422   :  { %8398 = vmatpush1.bf16.msra.mxu1 %v10425_v18  ;;  %v6130_v18 = vld [vmem:[#allocation6 + $0x688] sm:$0xff] }
 0x423   :  { %8399 = vmatprep.subr.bf16.mxu1 %v10434_v20  ;;  %v10528_v20 = vcombine.high %v6185_v3, %v6189_v4  ;;  %v10474_v30 = vcombine.high %v6130_v18, %v6134_v26  ;;  %v6174_v3 = vld [vmem:[#allocation6 + $0x7e8] sm:$0xff]  ;;  %v6233_v4 = vld [vmem:[#allocation6 + $0x9c0] sm:$0xff] }
 0x425   :  { %v5571_v11 = vpop.f32.mrb[8].mxu0 }
 0x426   :  { %v5815_v39 = vmul.f32 %v5782_v29, %v5571_v11  ;;  %v5573_v40 = vpop.f32.mrb[9].mxu0  ;;  %8400 = vmatpush1.bf16.msra.mxu1 %v10433_v34  ;;  %v10465_v29 = vcombine.low %v6122_v62, %v6126_v2  ;;  %v10536_v34 = vcombine.high %v6193_v32, %v6197_v27  ;;  %v6205_v11 = vld [vmem:[#allocation6 + $0x8e0] sm:$0xff]  ;;  %v6182_v27 = vld [vmem:[#allocation6 + $0x828] sm:$0xff] }
 0x427   :  { %v5816_v41 = vmul.f32 %v5786_v31, %v5573_v40  ;;  %v5575_v0 = vpop.f32.mrb[10].mxu0  ;;  %8401 = vmatprep.subr.bf16.mxu1 %v10442_v56  ;;  %v6138_v31 = vld [vmem:[#allocation6 + $0x6c8] sm:$0xff]  ;;  %v6201_v56 = vld [vmem:[#allocation6 + $0x8c0] sm:$0xff] }
 0x428   :  { %v5893_v42 = vadd.f32 %v5860_v33, %v5815_v39  ;;  %v5576_v1 = vpop.f32.mrb[11].mxu0  ;;  %v6142_v33 = vld [vmem:[#allocation6 + $0x6e8] sm:$0xff]  ;;  %v10544_v39 = vcombine.high %v6201_v56, %v6205_v11  ;;  %v10543_v10 = vcombine.low %v6201_v56, %v6205_v11 }
 0x429   :  { %v5894_v44 = vadd.f32 %v5864_v35, %v5816_v41  ;;  %v10473_v35 = vcombine.low %v6130_v18, %v6134_v26  ;;  %v10482_v38 = vcombine.high %v6138_v31, %v6142_v33  ;;  %v10481_v40 = vcombine.low %v6138_v31, %v6142_v33  ;;  %v6154_v0 = vld [vmem:[#allocation6 + $0x748] sm:$0xff]  ;;  %v6217_v1 = vld [vmem:[#allocation6 + $0x940] sm:$0xff] }
 0x42a   :  { %v5905_v49 = vmax.f32 %v5893_v42, 0.0  ;;  %8402 = vmatpush1.bf16.msra.mxu1 %v10441_v36  ;;  %v10490_v41 = vcombine.high %v6146_v57, %v6150_v51  ;;  %v6158_v42 = vld [vmem:[#allocation6 + $0x768] sm:$0xff] }
 0x42b   :  { %v5906_v55 = vmax.f32 %v5894_v44, 0.0  ;;  %8403 = vmatprep.subr.bf16.mxu1 %v10450_v43  ;;  %v6221_v43 = vld [vmem:[#allocation6 + $0x960] sm:$0xff]  ;;  %v10489_v44 = vcombine.low %v6146_v57, %v6150_v51  ;;  %v10498_v46 = vcombine.high %v6154_v0, %v6158_v42  ;;  %v6178_v26 = vld [vmem:[#allocation6 + $0x808] sm:$0xff] }
 0x42c   :  { %v5911_v60 = vmax.f32 %v5899_v47, %v5905_v49  ;;  %v6162_v47 = vld [vmem:[#allocation6 + $0x788] sm:$0xff]  ;;  %v10560_v49 = vcombine.high %v6217_v1, %v6221_v43 }
 0x42d   :  { %v5912_v63 = vmax.f32 %v5900_v54, %v5906_v55  ;;  %v6166_v54 = vld [vmem:[#allocation6 + $0x7a8] sm:$0xff]  ;;  %v6225_v55 = vld [vmem:[#allocation6 + $0x980] sm:$0xff] }
 0x42e   :  { %8404 = vmatpush1.bf16.msra.mxu1 %v10449_v59  ;;  %v12676_v15 = vpack.c.bf16 %v5911_v60, %v5911_v60  ;;  %v6229_v59 = vld [vmem:[#allocation6 + $0x9a0] sm:$0xff]  ;;  %v10497_v60 = vcombine.low %v6154_v0, %v6158_v42  ;;  %v10506_v62 = vcombine.high %v6162_v47, %v6166_v54  ;;  %v6186_v33 = vld [vmem:[#allocation6 + $0x848] sm:$0xff] }
 0x42f   :  { %v12674_v14 = vpack.c.bf16 %v5912_v63, %v5912_v63  ;;  %8405 = vmatprep.subr.bf16.mxu1 %v10458_v61  ;;  %v10559_v61 = vcombine.low %v6217_v1, %v6221_v43  ;;  %v6170_v63 = vld [vmem:[#allocation6 + $0x7c8] sm:$0xff]  ;;  %v10568_v2 = vcombine.high %v6225_v55, %v6229_v59  ;;  %v10567_v18 = vcombine.low %v6225_v55, %v6229_v59 }
 0x430   :  { %v6190_v11 = vld [vmem:[#allocation6 + $0x868] sm:$0xff] }
 0x431   :  { %8298 = vmatprep.mubr.bf16.mxu0 %v12674_v14  ;;  %8421 = vmatprep.mubr.bf16.mxu1 %v12674_v14  ;;  %v6194_v51 = vld [vmem:[#allocation6 + $0x888] sm:$0xff] }
 0x432   :  { %8299 = vmatmul.mubr.bf16.vlgmr.msra.gmra.mrb[12].mxu0 %v12676_v15  ;;  %8406 = vmatpush1.bf16.msra.mxu1 %v10457_v28  ;;  %v6237_v28 = vld [vmem:[#allocation6 + $0x9e0] sm:$0xff]  ;;  %v6202_v42 = vld [vmem:[#allocation6 + $0x8c8] sm:$0xff] }
 0x433   :  { %8308 = vmatpush1.bf16.msra.mxu0 %v10519_v25  ;;  %8407 = vmatprep.subr.bf16.mxu1 %v10466_v16  ;;  %v6213_v25 = vld [vmem:[#allocation6 + $0x920] sm:$0xff]  ;;  %v10505_v16 = vcombine.low %v6162_v47, %v6166_v54  ;;  %v10576_v32 = vcombine.high %v6233_v4, %v6237_v28  ;;  %v10575_v31 = vcombine.low %v6233_v4, %v6237_v28  ;;  %v6206_v43 = vld [vmem:[#allocation6 + $0x8e8] sm:$0xff] }
 0x434   :  { %8309 = vmatprep.subr.bf16.mxu0 %v10528_v20  ;;  %v10552_v36 = vcombine.high %v6209_v53, %v6213_v25  ;;  %v10551_v45 = vcombine.low %v6209_v53, %v6213_v25  ;;  %v10514_v20 = vcombine.high %v6170_v63, %v6174_v3  ;;  %v6198_v25 = vld [vmem:[#allocation6 + $0x8a8] sm:$0xff] }
 0x435   :  { %v6210_v54 = vld [vmem:[#allocation6 + $0x908] sm:$0xff] }
 0x436   :  { %8408 = vmatpush1.bf16.msra.mxu1 %v10465_v29  ;;  %v6241_v29 = vld [vmem:[#allocation6 + $0xa00] sm:$0xff]  ;;  %v6214_v59 = vld [vmem:[#allocation6 + $0x928] sm:$0xff] }
 0x437   :  { %8310 = vmatpush1.bf16.msra.mxu0 %v10527_v6  ;;  %8409 = vmatprep.subr.bf16.mxu1 %v10474_v30  ;;  %v6245_v6 = vld [vmem:[#allocation6 + $0xa20] sm:$0xff]  ;;  %v10513_v30 = vcombine.low %v6170_v63, %v6174_v3  ;;  %v6218_v3 = vld [vmem:[#allocation6 + $0x948] sm:$0xff] }
 0x438   :  { %8311 = vmatprep.subr.bf16.mxu0 %v10536_v34  ;;  %v10522_v34 = vcombine.high %v6178_v26, %v6182_v27  ;;  %v10584_v56 = vcombine.high %v6241_v29, %v6245_v6  ;;  %v10583_v57 = vcombine.low %v6241_v29, %v6245_v6  ;;  %v6222_v28 = vld [vmem:[#allocation6 + $0x968] sm:$0xff] }
 0x439   :  { %v6230_v6 = vld [vmem:[#allocation6 + $0x9a8] sm:$0xff] }
 0x43a   :  { %8410 = vmatpush1.bf16.msra.mxu1 %v10473_v35  ;;  %v6249_v35 = vld [vmem:[#allocation6 + $0xa40] sm:$0xff] }
 0x43b   :  { %8312 = vmatpush1.bf16.msra.mxu0 %v10535_v37  ;;  %8411 = vmatprep.subr.bf16.mxu1 %v10482_v38  ;;  %v6253_v37 = vld [vmem:[#allocation6 + $0xa60] sm:$0xff]  ;;  %v10521_v38 = vcombine.low %v6178_v26, %v6182_v27  ;;  %v6226_v27 = vld [vmem:[#allocation6 + $0x988] sm:$0xff] }
 0x43c   :  { %8313 = vmatprep.subr.bf16.mxu0 %v10544_v39  ;;  %v10530_v39 = vcombine.high %v6186_v33, %v6190_v11  ;;  %v10592_v53 = vcombine.high %v6249_v35, %v6253_v37  ;;  %v10591_v0 = vcombine.low %v6249_v35, %v6253_v37  ;;  %v6238_v37 = vld [vmem:[#allocation6 + $0x9e8] sm:$0xff] }
 0x43e   :  { %8412 = vmatpush1.bf16.msra.mxu1 %v10481_v40  ;;  %v6257_v40 = vld [vmem:[#allocation6 + $0xa80] sm:$0xff] }
 0x43f   :  { %8314 = vmatpush1.bf16.msra.mxu0 %v10543_v10  ;;  %8413 = vmatprep.subr.bf16.mxu1 %v10490_v41  ;;  %v6261_v10 = vld [vmem:[#allocation6 + $0xaa0] sm:$0xff]  ;;  %v10529_v41 = vcombine.low %v6186_v33, %v6190_v11  ;;  %v6234_v11 = vld [vmem:[#allocation6 + $0x9c8] sm:$0xff] }
 0x440   :  { %8315 = vmatprep.subr.bf16.mxu0 %v10552_v36  ;;  %v10538_v36 = vcombine.high %v6194_v51, %v6198_v25  ;;  %v10600_v1 = vcombine.high %v6257_v40, %v6261_v10  ;;  %v10599_v47 = vcombine.low %v6257_v40, %v6261_v10  ;;  %v6242_v40 = vld [vmem:[#allocation6 + $0xa08] sm:$0xff] }
 0x441   :  { %v6246_v10 = vld [vmem:[#allocation6 + $0xa28] sm:$0xff] }
 0x442   :  { %8414 = vmatpush1.bf16.msra.mxu1 %v10489_v44  ;;  %v6265_v44 = vld [vmem:[#allocation6 + $0xac0] sm:$0xff] }
 0x443   :  { %8316 = vmatpush1.bf16.msra.mxu0 %v10551_v45  ;;  %8415 = vmatprep.subr.bf16.mxu1 %v10498_v46  ;;  %v6269_v45 = vld [vmem:[#allocation6 + $0xae0] sm:$0xff]  ;;  %v10537_v46 = vcombine.low %v6194_v51, %v6198_v25 }
 0x444   :  { %8317 = vmatprep.subr.bf16.mxu0 %v10560_v49  ;;  %v10546_v49 = vcombine.high %v6202_v42, %v6206_v43  ;;  %v10608_v55 = vcombine.high %v6265_v44, %v6269_v45  ;;  %v10607_v63 = vcombine.low %v6265_v44, %v6269_v45  ;;  %v10585_v44 = vcombine.low %v6242_v40, %v6246_v10 }
 0x446   :  { %8416 = vmatpush1.bf16.msra.mxu1 %v10497_v60  ;;  %v6273_v60 = vld [vmem:[#allocation6 + $0xb00] sm:$0xff] }
 0x447   :  { %8318 = vmatpush1.bf16.msra.mxu0 %v10559_v61  ;;  %8417 = vmatprep.subr.bf16.mxu1 %v10506_v62  ;;  %v6277_v61 = vld [vmem:[#allocation6 + $0xb20] sm:$0xff]  ;;  %v10545_v62 = vcombine.low %v6202_v42, %v6206_v43  ;;  %v10268_v42 = vcombine.high %v12670_v12, %v12672_v13  ;;  %v6254_v43 = vld [vmem:[#allocation6 + $0xa68] sm:$0xff] }
 0x448   :  { %8319 = vmatprep.subr.bf16.mxu0 %v10568_v2  ;;  %v10554_v2 = vcombine.high %v6210_v54, %v6214_v59  ;;  %v10616_v4 = vcombine.high %v6273_v60, %v6277_v61  ;;  %v10615_v26 = vcombine.low %v6273_v60, %v6277_v61 }
 0x44a   :  { %8418 = vmatpush1.bf16.msra.mxu1 %v10505_v16  ;;  %v6281_v16 = vld [vmem:[#allocation6 + $0xb40] sm:$0xff] }
 0x44b   :  { %8320 = vmatpush1.bf16.msra.mxu0 %v10567_v18  ;;  %8419 = vmatprep.subr.bf16.mxu1 %v10514_v20  ;;  %v6285_v18 = vld [vmem:[#allocation6 + $0xb60] sm:$0xff]  ;;  %v10553_v20 = vcombine.low %v6210_v54, %v6214_v59  ;;  %v6270_v59 = vld [vmem:[#allocation6 + $0xae8] sm:$0xff] }
 0x44c   :  { %8321 = vmatprep.subr.bf16.mxu0 %v10576_v32  ;;  %v10562_v32 = vcombine.high %v6218_v3, %v6222_v28  ;;  %v10624_v29 = vcombine.high %v6281_v16, %v6285_v18  ;;  %v10623_v33 = vcombine.low %v6281_v16, %v6285_v18 }
 0x44e   :  { %8420 = vmatpush1.bf16.msra.mxu1 %v10513_v30  ;;  %v6289_v30 = vld [vmem:[#allocation6 + $0xb80] sm:$0xff] }
 0x44f   :  { %8322 = vmatpush1.bf16.msra.mxu0 %v10575_v31  ;;  %8430 = vmatprep.subr.bf16.mxu1 %v10522_v34  ;;  %v6293_v31 = vld [vmem:[#allocation6 + $0xba0] sm:$0xff]  ;;  %v10561_v34 = vcombine.low %v6218_v3, %v6222_v28  ;;  %v6286_v28 = vld [vmem:[#allocation6 + $0xb68] sm:$0xff] }
 0x450   :  { %8323 = vmatprep.subr.bf16.mxu0 %v10584_v56  ;;  %v10570_v56 = vcombine.high %v6226_v27, %v6230_v6  ;;  %v10632_v35 = vcombine.high %v6289_v30, %v6293_v31  ;;  %v10631_v51 = vcombine.low %v6289_v30, %v6293_v31 }
 0x451   :  { %8422 = vmatmul.mubr.bf16.vlgmr.msra.gmra.mrb[16].mxu1 %v12676_v15 }
 0x452   :  { %8431 = vmatpush1.bf16.msra.mxu1 %v10521_v38  ;;  %v6297_v38 = vld [vmem:[#allocation6 + $0xbc0] sm:$0xff] }
 0x453   :  { %8324 = vmatpush1.bf16.msra.mxu0 %v10583_v57  ;;  %8432 = vmatprep.subr.bf16.mxu1 %v10530_v39  ;;  %v6301_v57 = vld [vmem:[#allocation6 + $0xbe0] sm:$0xff]  ;;  %v10569_v39 = vcombine.low %v6226_v27, %v6230_v6  ;;  %v6302_v6 = vld [vmem:[#allocation6 + $0xbe8] sm:$0xff] }
 0x454   :  { %8325 = vmatprep.subr.bf16.mxu0 %v10592_v53  ;;  %v10578_v53 = vcombine.high %v6234_v11, %v6238_v37  ;;  %v10640_v25 = vcombine.high %v6297_v38, %v6301_v57 }
 0x456   :  { %8433 = vmatpush1.bf16.msra.mxu1 %v10529_v41  ;;  %v10577_v41 = vcombine.low %v6234_v11, %v6238_v37  ;;  %v12693_v37 = vsub.s32 5, %v12587_v48 }
 0x457   :  { %8326 = vmatpush1.bf16.msra.mxu0 %v10591_v0  ;;  %8434 = vmatprep.subr.bf16.mxu1 %v10538_v36  ;;  %v10639_v0 = vcombine.low %v6297_v38, %v6301_v57  ;;  %v10586_v36 = vcombine.high %v6242_v40, %v6246_v10  ;;  %v12120_v38 = vld [vmem:[#allocation4] ss:$2 sm:$0xff]  ;;  %v5790_v40 = vrot.slane %v12652_v19, %v12643_v17 }
 0x458   :  { %8327 = vmatprep.subr.bf16.mxu0 %v10600_v1  ;;  %v6250_v1 = vld [vmem:[#allocation6 + $0xa48] sm:$0xff] }
 0x459   :  { %v10594_v45 = vcombine.high %v6250_v1, %v6254_v43 }
 0x45a   :  { %8435 = vmatpush1.bf16.msra.mxu1 %v10537_v46  ;;  %v6258_v46 = vld [vmem:[#allocation6 + $0xa88] sm:$0xff] }
 0x45b   :  { %8328 = vmatpush1.bf16.msra.mxu0 %v10599_v47  ;;  %8436 = vmatprep.subr.bf16.mxu1 %v10546_v49  ;;  %v6262_v47 = vld [vmem:[#allocation6 + $0xaa8] sm:$0xff]  ;;  %v10593_v49 = vcombine.low %v6250_v1, %v6254_v43 }
 0x45c   :  { %8329 = vmatprep.subr.bf16.mxu0 %v10608_v55  ;;  %v10602_v54 = vcombine.high %v6258_v46, %v6262_v47  ;;  %v6266_v55 = vld [vmem:[#allocation6 + $0xac8] sm:$0xff]  ;;  %v10601_v60 = vcombine.low %v6258_v46, %v6262_v47 }
 0x45d   :  { %v10610_v61 = vcombine.high %v6266_v55, %v6270_v59 }
 0x45e   :  { %8437 = vmatpush1.bf16.msra.mxu1 %v10545_v62  ;;  %v6274_v62 = vld [vmem:[#allocation6 + $0xb08] sm:$0xff] }
 0x45f   :  { %8330 = vmatpush1.bf16.msra.mxu0 %v10607_v63  ;;  %8438 = vmatprep.subr.bf16.mxu1 %v10554_v2  ;;  %v6278_v63 = vld [vmem:[#allocation6 + $0xb28] sm:$0xff]  ;;  %v10609_v2 = vcombine.low %v6266_v55, %v6270_v59 }
 0x460   :  { %8331 = vmatprep.subr.bf16.mxu0 %v10616_v4  ;;  %v10618_v3 = vcombine.high %v6274_v62, %v6278_v63  ;;  %v6282_v4 = vld [vmem:[#allocation6 + $0xb48] sm:$0xff]  ;;  %v10617_v16 = vcombine.low %v6274_v62, %v6278_v63  ;;  %v5931_v62 = vld [vmem:[#allocation6 + $0x50] sm:$0xff] }
 0x461   :  { %v10626_v18 = vcombine.high %v6282_v4, %v6286_v28  ;;  %v5935_v63 = vld [vmem:[#allocation6 + $0x70] sm:$0xff] }
 0x462   :  { %8439 = vmatpush1.bf16.msra.mxu1 %v10553_v20  ;;  %v6290_v20 = vld [vmem:[#allocation6 + $0xb88] sm:$0xff] }
 0x463   :  { %8332 = vmatpush1.bf16.msra.mxu0 %v10615_v26  ;;  %8440 = vmatprep.subr.bf16.mxu1 %v10562_v32  ;;  %v6294_v26 = vld [vmem:[#allocation6 + $0xba8] sm:$0xff]  ;;  %v10625_v32 = vcombine.low %v6282_v4, %v6286_v28 }
 0x464   :  { %8333 = vmatprep.subr.bf16.mxu0 %v10624_v29  ;;  %v10634_v27 = vcombine.high %v6290_v20, %v6294_v26  ;;  %v6298_v29 = vld [vmem:[#allocation6 + $0xbc8] sm:$0xff]  ;;  %v10633_v30 = vcombine.low %v6290_v20, %v6294_v26  ;;  %v5943_v26 = vld [vmem:[#allocation6 + $0xb0] sm:$0xff] }
 0x465   :  { %v10642_v31 = vcombine.high %v6298_v29, %v6302_v6 }
 0x466   :  { %8441 = vmatpush1.bf16.msra.mxu1 %v10561_v34  ;;  %v5924_v34 = vld [vmem:[#allocation6 + $0x18] sm:$0xff] }
 0x467   :  { %8334 = vmatpush1.bf16.msra.mxu0 %v10623_v33  ;;  %8442 = vmatprep.subr.bf16.mxu1 %v10570_v56  ;;  %v5928_v33 = vld [vmem:[#allocation6 + $0x38] sm:$0xff]  ;;  %v10641_v56 = vcombine.low %v6298_v29, %v6302_v6  ;;  %v10275_v29 = vcombine.low %v5931_v62, %v5935_v63 }
 0x468   :  { %8335 = vmatprep.subr.bf16.mxu0 %v10632_v35  ;;  %v10270_v11 = vcombine.high %v5924_v34, %v5928_v33  ;;  %v12690_v35 = vsub.s32 4, %v12587_v48  ;;  %v5794_v48 = vrot.slane %v12652_v19, %v12646_v7  ;;  %v10269_v4 = vcombine.low %v5924_v34, %v5928_v33  ;;  %v5947_v34 = vld [vmem:[#allocation6 + $0xd0] sm:$0xff] }
 0x469   :  { %v5951_v33 = vld [vmem:[#allocation6 + $0xf0] sm:$0xff] }
 0x46a   :  { %8443 = vmatpush1.bf16.msra.mxu1 %v10569_v39  ;;  %v5766_v57 = vrot.slane %v12120_v38, %v12690_v35  ;;  %v5770_v39 = vrot.slane %v12120_v38, %v12693_v37  ;;  %v10292_v13 = vcombine.high %v5947_v34, %v5951_v33 }
 0x46b   :  { %8336 = vmatpush1.bf16.msra.mxu0 %v10631_v51  ;;  %8444 = vmatprep.subr.bf16.mxu1 %v10578_v53  ;;  %v12121_v53 = vld [vmem:[#allocation4 + $0x1] ss:$2 sm:$0xff] }
 0x46c   :  { %8337 = vmatprep.subr.bf16.mxu0 %v10640_v25  ;;  %v5811_v51 = vmul.f32 %v5766_v57, %v12572_v21  ;;  %v5844_v25 = vrot.slane %v12121_v53, %v12690_v35  ;;  %v5812_v10 = vmul.f32 %v5770_v39, %v12574_v22  ;;  %v5872_v21 = vrot.slane %v12654_v23, %v12646_v7  ;;  %v5955_v57 = vld [vmem:[#allocation6 + $0x110] sm:$0xff] }
 0x46d   :  { %v5959_v39 = vld [vmem:[#allocation6 + $0x130] sm:$0xff] }
 0x46e   :  { %8445 = vmatpush1.bf16.msra.mxu1 %v10577_v41  ;;  %v5848_v41 = vrot.slane %v12121_v53, %v12693_v37  ;;  %v10291_v53 = vcombine.low %v5947_v34, %v5951_v33  ;;  %v6000_v34 = vld [vmem:[#allocation6 + $0x278] sm:$0xff] }
 0x46f   :  { %8338 = vmatpush1.bf16.msra.mxu0 %v10639_v0  ;;  %8446 = vmatprep.subr.bf16.mxu1 %v10586_v36  ;;  %v5868_v0 = vrot.slane %v12654_v23, %v12643_v17 }
 0x470   :  { %8471 = vmatprep.subr.bf16.mxu0 %v10268_v42  ;;  %v5889_v42 = vadd.f32 %v5844_v25, %v5811_v51  ;;  %v5956_v51 = vld [vmem:[#allocation6 + $0x118] sm:$0xff] }
 0x472   :  { %8447 = vmatpush1.bf16.msra.mxu1 %v10585_v44  ;;  %v5890_v44 = vadd.f32 %v5848_v41, %v5812_v10  ;;  %v5963_v41 = vld [vmem:[#allocation6 + $0x150] sm:$0xff] }
 0x473   :  { %8448 = vmatprep.subr.bf16.mxu1 %v10594_v45 }
 0x474   :  { %v5902_v59 = vmax.f32 %v5890_v44, 0.0  ;;  %v5971_v44 = vld [vmem:[#allocation6 + $0x190] sm:$0xff] }
 0x476   :  { %8449 = vmatpush1.bf16.msra.mxu1 %v10593_v49 }
 0x477   :  { %8450 = vmatprep.subr.bf16.mxu1 %v10602_v54  ;;  %v5901_v54 = vmax.f32 %v5889_v42, 0.0 }
 0x47a   :  { %8451 = vmatpush1.bf16.msra.mxu1 %v10601_v60 }
 0x47b   :  { %8452 = vmatprep.subr.bf16.mxu1 %v10610_v61 }
 0x47e   :  { %8453 = vmatpush1.bf16.msra.mxu1 %v10609_v2  ;;  %v5932_v2 = vld [vmem:[#allocation6 + $0x58] sm:$0xff] }
 0x47f   :  { %8454 = vmatprep.subr.bf16.mxu1 %v10618_v3  ;;  %v5936_v3 = vld [vmem:[#allocation6 + $0x78] sm:$0xff] }
 0x480   :  { %v10278_v20 = vcombine.high %v5932_v2, %v5936_v3  ;;  %v10277_v6 = vcombine.low %v5932_v2, %v5936_v3 }
 0x482   :  { %8455 = vmatpush1.bf16.msra.mxu1 %v10617_v16  ;;  %v5939_v16 = vld [vmem:[#allocation6 + $0x90] sm:$0xff] }
 0x483   :  { %8456 = vmatprep.subr.bf16.mxu1 %v10626_v18  ;;  %v10276_v18 = vcombine.high %v5931_v62, %v5935_v63  ;;  %v10283_v38 = vcombine.low %v5939_v16, %v5943_v26 }
 0x486   :  { %8457 = vmatpush1.bf16.msra.mxu1 %v10625_v32  ;;  %v5940_v32 = vld [vmem:[#allocation6 + $0x98] sm:$0xff] }
 0x487   :  { %8458 = vmatprep.subr.bf16.mxu1 %v10634_v27  ;;  %v5944_v27 = vld [vmem:[#allocation6 + $0xb8] sm:$0xff] }
 0x488   :  { %v10285_v12 = vcombine.low %v5940_v32, %v5944_v27 }
 0x48a   :  { %8459 = vmatpush1.bf16.msra.mxu1 %v10633_v30  ;;  %v10284_v30 = vcombine.high %v5939_v16, %v5943_v26  ;;  %v5991_v16 = vld [vmem:[#allocation6 + $0x230] sm:$0xff] }
 0x48b   :  { %8460 = vmatprep.subr.bf16.mxu1 %v10642_v31  ;;  %v10286_v31 = vcombine.high %v5940_v32, %v5944_v27 }
 0x48e   :  { %8461 = vmatpush1.bf16.msra.mxu1 %v10641_v56  ;;  %v5948_v56 = vld [vmem:[#allocation6 + $0xd8] sm:$0xff] }
 0x48f   :  { %8594 = vmatprep.subr.bf16.mxu1 %v10270_v11  ;;  %v5952_v11 = vld [vmem:[#allocation6 + $0xf8] sm:$0xff] }
 0x490   :  { %v10293_v25 = vcombine.low %v5948_v56, %v5952_v11 }
 0x4a4   :  { %v5735_v36 = vpop.f32.mrb[12].mxu1 }
 0x4a5   :  { %v5817_v1 = vmul.f32 %v5790_v40, %v5735_v36  ;;  %v5737_v43 = vpop.f32.mrb[13].mxu1  ;;  %v10300_v40 = vcombine.high %v5955_v57, %v5959_v39  ;;  %v5968_v36 = vld [vmem:[#allocation6 + $0x178] sm:$0xff] }
 0x4a6   :  { %v5818_v45 = vmul.f32 %v5794_v48, %v5737_v43  ;;  %v5739_v46 = vpop.f32.mrb[14].mxu1  ;;  %v5967_v48 = vld [vmem:[#allocation6 + $0x170] sm:$0xff] }
 0x4a7   :  { %v5895_v47 = vadd.f32 %v5868_v0, %v5817_v1  ;;  %v5740_v22 = vpop.f32.mrb[15].mxu1  ;;  %v5964_v0 = vld [vmem:[#allocation6 + $0x158] sm:$0xff]  ;;  %v10308_v1 = vcombine.high %v5963_v41, %v5967_v48 }
 0x4a8   :  { %v5896_v49 = vadd.f32 %v5872_v21, %v5818_v45  ;;  %v10299_v21 = vcombine.low %v5955_v57, %v5959_v39  ;;  %v10310_v43 = vcombine.high %v5964_v0, %v5968_v36  ;;  %v5975_v45 = vld [vmem:[#allocation6 + $0x1b0] sm:$0xff]  ;;  %v5972_v46 = vld [vmem:[#allocation6 + $0x198] sm:$0xff]  ;;  %v10307_v22 = vcombine.low %v5963_v41, %v5967_v48 }
 0x4a9   :  { %v5907_v55 = vmax.f32 %v5895_v47, 0.0  ;;  %v5976_v47 = vld [vmem:[#allocation6 + $0x1b8] sm:$0xff]  ;;  %v10315_v62 = vcombine.low %v5971_v44, %v5975_v45 }
 0x4aa   :  { %v5908_v19 = vmax.f32 %v5896_v49, 0.0  ;;  %v10309_v49 = vcombine.low %v5964_v0, %v5968_v36  ;;  %v10317_v63 = vcombine.low %v5972_v46, %v5976_v47  ;;  %v6008_v57 = vld [vmem:[#allocation6 + $0x2b8] sm:$0xff] }
 0x4ab   :  { %v5913_v60 = vmax.f32 %v5901_v54, %v5907_v55  ;;  %v10316_v54 = vcombine.high %v5971_v44, %v5975_v45  ;;  %v10318_v55 = vcombine.high %v5972_v46, %v5976_v47  ;;  %v6016_v41 = vld [vmem:[#allocation6 + $0x2f8] sm:$0xff] }
 0x4ac   :  { %v5914_v61 = vmax.f32 %v5902_v59, %v5908_v19  ;;  %v5979_v59 = vld [vmem:[#allocation6 + $0x1d0] sm:$0xff]  ;;  %v6024_v44 = vld [vmem:[#allocation6 + $0x338] sm:$0xff] }
 0x4ad   :  { %v12711_v28 = vpack.c.bf16 %v5913_v60, %v5913_v60  ;;  %v5983_v19 = vld [vmem:[#allocation6 + $0x1f0] sm:$0xff]  ;;  %v5980_v60 = vld [vmem:[#allocation6 + $0x1d8] sm:$0xff] }
 0x4ae   :  { %v12709_v23 = vpack.c.bf16 %v5914_v61, %v5914_v61  ;;  %v5984_v61 = vld [vmem:[#allocation6 + $0x1f8] sm:$0xff]  ;;  %v10324_v2 = vcombine.high %v5979_v59, %v5983_v19  ;;  %v10323_v26 = vcombine.low %v5979_v59, %v5983_v19 }
 0x4af   :  { %v10326_v3 = vcombine.high %v5980_v60, %v5984_v61  ;;  %v10325_v32 = vcombine.low %v5980_v60, %v5984_v61  ;;  %v6032_v59 = vld [vmem:[#allocation6 + $0x378] sm:$0xff] }
 0x4b0   :  { %8339 = vmatprep.mubr.bf16.mxu0 %v12709_v23  ;;  %8462 = vmatprep.mubr.bf16.mxu1 %v12709_v23 }
 0x4b1   :  { %8340 = vmatmul.mubr.bf16.vlgmr.msra.gmra.mrb[12].mxu0 %v12711_v28  ;;  %8463 = vmatmul.mubr.bf16.vlgmr.msra.gmra.mrb[16].mxu1 %v12711_v28 }
 0x4b2   :  { %8472 = vmatpush1.bf16.msra.mxu0 %v10267_v24  ;;  %8595 = vmatpush1.bf16.msra.mxu1 %v10269_v4  ;;  %v10294_v24 = vcombine.high %v5948_v56, %v5952_v11  ;;  %v5987_v4 = vld [vmem:[#allocation6 + $0x210] sm:$0xff] }
 0x4b3   :  { %8503 = vmatprep.mubr.bf16.mxu0 %v12623_v50  ;;  %8626 = vmatprep.mubr.bf16.mxu1 %v12623_v50  ;;  %v5960_v50 = vld [vmem:[#allocation6 + $0x138] sm:$0xff]  ;;  %v10332_v27 = vcombine.high %v5987_v4, %v5991_v16  ;;  %v10331_v33 = vcombine.low %v5987_v4, %v5991_v16 }
 0x4b4   :  { %8473 = vmatprep.subr.bf16.mxu0 %v10276_v18  ;;  %8596 = vmatprep.subr.bf16.mxu1 %v10278_v20  ;;  %v10302_v10 = vcombine.high %v5956_v51, %v5960_v50  ;;  %v10301_v42 = vcombine.low %v5956_v51, %v5960_v50  ;;  %v5988_v18 = vld [vmem:[#allocation6 + $0x218] sm:$0xff] }
 0x4b5   :  { %v5992_v20 = vld [vmem:[#allocation6 + $0x238] sm:$0xff] }
 0x4b6   :  { %8474 = vmatpush1.bf16.msra.mxu0 %v10275_v29  ;;  %8597 = vmatpush1.bf16.msra.mxu1 %v10277_v6  ;;  %v10334_v29 = vcombine.high %v5988_v18, %v5992_v20  ;;  %v5995_v6 = vld [vmem:[#allocation6 + $0x250] sm:$0xff]  ;;  %v10333_v56 = vcombine.low %v5988_v18, %v5992_v20  ;;  %v6040_v4 = vld [vmem:[#allocation6 + $0x3b8] sm:$0xff] }
 0x4b7   :  { %8475 = vmatprep.subr.bf16.mxu0 %v10284_v30  ;;  %8598 = vmatprep.subr.bf16.mxu1 %v10286_v31  ;;  %v5999_v30 = vld [vmem:[#allocation6 + $0x270] sm:$0xff]  ;;  %v5996_v31 = vld [vmem:[#allocation6 + $0x258] sm:$0xff] }
 0x4b8   :  { %v10340_v11 = vcombine.high %v5995_v6, %v5999_v30  ;;  %v10339_v39 = vcombine.low %v5995_v6, %v5999_v30  ;;  %v10341_v51 = vcombine.low %v5996_v31, %v6000_v34  ;;  %v6048_v6 = vld [vmem:[#allocation6 + $0x3f8] sm:$0xff] }
 0x4ba   :  { %8476 = vmatpush1.bf16.msra.mxu0 %v10283_v38  ;;  %8599 = vmatpush1.bf16.msra.mxu1 %v10285_v12  ;;  %v10342_v38 = vcombine.high %v5996_v31, %v6000_v34  ;;  %v6003_v12 = vld [vmem:[#allocation6 + $0x290] sm:$0xff] }
 0x4bb   :  { %8477 = vmatprep.subr.bf16.mxu0 %v10292_v13  ;;  %8600 = vmatprep.subr.bf16.mxu1 %v10294_v24  ;;  %v6007_v13 = vld [vmem:[#allocation6 + $0x2b0] sm:$0xff]  ;;  %v6004_v24 = vld [vmem:[#allocation6 + $0x298] sm:$0xff] }
 0x4bc   :  { %v10348_v50 = vcombine.high %v6003_v12, %v6007_v13  ;;  %v10347_v48 = vcombine.low %v6003_v12, %v6007_v13  ;;  %v10349_v0 = vcombine.low %v6004_v24, %v6008_v57  ;;  %v6056_v12 = vld [vmem:[#allocation6 + $0x438] sm:$0xff] }
 0x4be   :  { %8478 = vmatpush1.bf16.msra.mxu0 %v10291_v53  ;;  %8601 = vmatpush1.bf16.msra.mxu1 %v10293_v25  ;;  %v10350_v53 = vcombine.high %v6004_v24, %v6008_v57  ;;  %v6011_v25 = vld [vmem:[#allocation6 + $0x2d0] sm:$0xff] }
 0x4bf   :  { %8479 = vmatprep.subr.bf16.mxu0 %v10300_v40  ;;  %8602 = vmatprep.subr.bf16.mxu1 %v10302_v10  ;;  %v6015_v40 = vld [vmem:[#allocation6 + $0x2f0] sm:$0xff]  ;;  %v6012_v10 = vld [vmem:[#allocation6 + $0x2d8] sm:$0xff] }
 0x4c0   :  { %v10356_v36 = vcombine.high %v6011_v25, %v6015_v40  ;;  %v10355_v45 = vcombine.low %v6011_v25, %v6015_v40  ;;  %v10357_v46 = vcombine.low %v6012_v10, %v6016_v41  ;;  %v6064_v25 = vld [vmem:[#allocation6 + $0x478] sm:$0xff] }
 0x4c2   :  { %8480 = vmatpush1.bf16.msra.mxu0 %v10299_v21  ;;  %8603 = vmatpush1.bf16.msra.mxu1 %v10301_v42  ;;  %v10358_v21 = vcombine.high %v6012_v10, %v6016_v41  ;;  %v6019_v42 = vld [vmem:[#allocation6 + $0x310] sm:$0xff] }
 0x4c3   :  { %8481 = vmatprep.subr.bf16.mxu0 %v10308_v1  ;;  %8604 = vmatprep.subr.bf16.mxu1 %v10310_v43  ;;  %v6023_v1 = vld [vmem:[#allocation6 + $0x330] sm:$0xff]  ;;  %v6020_v43 = vld [vmem:[#allocation6 + $0x318] sm:$0xff] }
 0x4c4   :  { %v10364_v47 = vcombine.high %v6019_v42, %v6023_v1  ;;  %v10363_v19 = vcombine.low %v6019_v42, %v6023_v1  ;;  %v10365_v60 = vcombine.low %v6020_v43, %v6024_v44  ;;  %v6072_v42 = vld [vmem:[#allocation6 + $0x4b8] sm:$0xff] }
 0x4c6   :  { %8482 = vmatpush1.bf16.msra.mxu0 %v10307_v22  ;;  %8605 = vmatpush1.bf16.msra.mxu1 %v10309_v49  ;;  %v10366_v22 = vcombine.high %v6020_v43, %v6024_v44  ;;  %v6027_v49 = vld [vmem:[#allocation6 + $0x350] sm:$0xff] }
 0x4c7   :  { %8483 = vmatprep.subr.bf16.mxu0 %v10316_v54  ;;  %8606 = vmatprep.subr.bf16.mxu1 %v10318_v55  ;;  %v6031_v54 = vld [vmem:[#allocation6 + $0x370] sm:$0xff]  ;;  %v6028_v55 = vld [vmem:[#allocation6 + $0x358] sm:$0xff] }
 0x4c8   :  { %v10372_v61 = vcombine.high %v6027_v49, %v6031_v54  ;;  %v10371_v16 = vcombine.low %v6027_v49, %v6031_v54  ;;  %v10373_v18 = vcombine.low %v6028_v55, %v6032_v59  ;;  %v6080_v49 = vld [vmem:[#allocation6 + $0x4f8] sm:$0xff] }
 0x4ca   :  { %8484 = vmatpush1.bf16.msra.mxu0 %v10315_v62  ;;  %8607 = vmatpush1.bf16.msra.mxu1 %v10317_v63  ;;  %v10374_v62 = vcombine.high %v6028_v55, %v6032_v59  ;;  %v6035_v63 = vld [vmem:[#allocation6 + $0x390] sm:$0xff] }
 0x4cb   :  { %8485 = vmatprep.subr.bf16.mxu0 %v10324_v2  ;;  %8608 = vmatprep.subr.bf16.mxu1 %v10326_v3  ;;  %v6039_v2 = vld [vmem:[#allocation6 + $0x3b0] sm:$0xff]  ;;  %v6036_v3 = vld [vmem:[#allocation6 + $0x398] sm:$0xff] }
 0x4cc   :  { %v10380_v20 = vcombine.high %v6035_v63, %v6039_v2  ;;  %v10379_v30 = vcombine.low %v6035_v63, %v6039_v2  ;;  %v10381_v31 = vcombine.low %v6036_v3, %v6040_v4 }
 0x4ce   :  { %8486 = vmatpush1.bf16.msra.mxu0 %v10323_v26  ;;  %8609 = vmatpush1.bf16.msra.mxu1 %v10325_v32  ;;  %v10382_v26 = vcombine.high %v6036_v3, %v6040_v4  ;;  %v6043_v32 = vld [vmem:[#allocation6 + $0x3d0] sm:$0xff] }
 0x4cf   :  { %8487 = vmatprep.subr.bf16.mxu0 %v10332_v27  ;;  %8610 = vmatprep.subr.bf16.mxu1 %v10334_v29  ;;  %v6047_v27 = vld [vmem:[#allocation6 + $0x3f0] sm:$0xff]  ;;  %v6044_v29 = vld [vmem:[#allocation6 + $0x3d8] sm:$0xff] }
 0x4d0   :  { %v10388_v34 = vcombine.high %v6043_v32, %v6047_v27  ;;  %v10387_v13 = vcombine.low %v6043_v32, %v6047_v27  ;;  %v10389_v24 = vcombine.low %v6044_v29, %v6048_v6  ;;  %v6091_v4 = vld [vmem:[#allocation6 + $0x550] sm:$0xff] }
 0x4d2   :  { %8488 = vmatpush1.bf16.msra.mxu0 %v10331_v33  ;;  %8611 = vmatpush1.bf16.msra.mxu1 %v10333_v56  ;;  %v10390_v33 = vcombine.high %v6044_v29, %v6048_v6  ;;  %v6051_v56 = vld [vmem:[#allocation6 + $0x410] sm:$0xff] }
 0x4d3   :  { %8489 = vmatprep.subr.bf16.mxu0 %v10340_v11  ;;  %8612 = vmatprep.subr.bf16.mxu1 %v10342_v38  ;;  %v6055_v11 = vld [vmem:[#allocation6 + $0x430] sm:$0xff]  ;;  %v6052_v38 = vld [vmem:[#allocation6 + $0x418] sm:$0xff] }
 0x4d4   :  { %v10396_v57 = vcombine.high %v6051_v56, %v6055_v11  ;;  %v10395_v40 = vcombine.low %v6051_v56, %v6055_v11  ;;  %v10397_v10 = vcombine.low %v6052_v38, %v6056_v12  ;;  %v6099_v6 = vld [vmem:[#allocation6 + $0x590] sm:$0xff] }
 0x4d6   :  { %8490 = vmatpush1.bf16.msra.mxu0 %v10339_v39  ;;  %8613 = vmatpush1.bf16.msra.mxu1 %v10341_v51  ;;  %v10398_v39 = vcombine.high %v6052_v38, %v6056_v12  ;;  %v6059_v51 = vld [vmem:[#allocation6 + $0x450] sm:$0xff] }
 0x4d7   :  { %8491 = vmatprep.subr.bf16.mxu0 %v10348_v50  ;;  %8614 = vmatprep.subr.bf16.mxu1 %v10350_v53  ;;  %v6063_v50 = vld [vmem:[#allocation6 + $0x470] sm:$0xff]  ;;  %v6060_v53 = vld [vmem:[#allocation6 + $0x458] sm:$0xff] }
 0x4d8   :  { %v10404_v41 = vcombine.high %v6059_v51, %v6063_v50  ;;  %v10403_v1 = vcombine.low %v6059_v51, %v6063_v50  ;;  %v10405_v43 = vcombine.low %v6060_v53, %v6064_v25  ;;  %v6107_v12 = vld [vmem:[#allocation6 + $0x5d0] sm:$0xff] }
 0x4da   :  { %8492 = vmatpush1.bf16.msra.mxu0 %v10347_v48  ;;  %8615 = vmatpush1.bf16.msra.mxu1 %v10349_v0  ;;  %v10406_v48 = vcombine.high %v6060_v53, %v6064_v25  ;;  %v6067_v0 = vld [vmem:[#allocation6 + $0x490] sm:$0xff] }
 0x4db   :  { %8493 = vmatprep.subr.bf16.mxu0 %v10356_v36  ;;  %8616 = vmatprep.subr.bf16.mxu1 %v10358_v21  ;;  %v6071_v36 = vld [vmem:[#allocation6 + $0x4b0] sm:$0xff]  ;;  %v6068_v21 = vld [vmem:[#allocation6 + $0x498] sm:$0xff] }
 0x4dc   :  { %v10412_v44 = vcombine.high %v6067_v0, %v6071_v36  ;;  %v10413_v54 = vcombine.low %v6068_v21, %v6072_v42  ;;  %v6115_v25 = vld [vmem:[#allocation6 + $0x610] sm:$0xff] }
 0x4de   :  { %8494 = vmatpush1.bf16.msra.mxu0 %v10355_v45  ;;  %8617 = vmatpush1.bf16.msra.mxu1 %v10357_v46  ;;  %v10414_v45 = vcombine.high %v6068_v21, %v6072_v42  ;;  %v6075_v46 = vld [vmem:[#allocation6 + $0x4d0] sm:$0xff] }
 0x4df   :  { %8495 = vmatprep.subr.bf16.mxu0 %v10364_v47  ;;  %8618 = vmatprep.subr.bf16.mxu1 %v10366_v22  ;;  %v6079_v47 = vld [vmem:[#allocation6 + $0x4f0] sm:$0xff]  ;;  %v6076_v22 = vld [vmem:[#allocation6 + $0x4d8] sm:$0xff] }
 0x4e0   :  { %v10420_v55 = vcombine.high %v6075_v46, %v6079_v47  ;;  %v10422_v59 = vcombine.high %v6076_v22, %v6080_v49  ;;  %v10421_v63 = vcombine.low %v6076_v22, %v6080_v49  ;;  %v6123_v42 = vld [vmem:[#allocation6 + $0x650] sm:$0xff] }
 0x4e1   :  { %v6131_v49 = vld [vmem:[#allocation6 + $0x690] sm:$0xff] }
 0x4e2   :  { %8496 = vmatpush1.bf16.msra.mxu0 %v10363_v19  ;;  %8619 = vmatpush1.bf16.msra.mxu1 %v10365_v60  ;;  %v6083_v19 = vld [vmem:[#allocation6 + $0x510] sm:$0xff] }
 0x4e3   :  { %8497 = vmatprep.subr.bf16.mxu0 %v10372_v61  ;;  %8620 = vmatprep.subr.bf16.mxu1 %v10374_v62  ;;  %v6087_v60 = vld [vmem:[#allocation6 + $0x530] sm:$0xff]  ;;  %v6088_v61 = vld [vmem:[#allocation6 + $0x538] sm:$0xff]  ;;  %v10419_v62 = vcombine.low %v6075_v46, %v6079_v47 }
 0x4e4   :  { %v10428_v2 = vcombine.high %v6083_v19, %v6087_v60 }
 0x4e6   :  { %8498 = vmatpush1.bf16.msra.mxu0 %v10371_v16  ;;  %8621 = vmatpush1.bf16.msra.mxu1 %v10373_v18  ;;  %v6095_v16 = vld [vmem:[#allocation6 + $0x570] sm:$0xff]  ;;  %v6092_v18 = vld [vmem:[#allocation6 + $0x558] sm:$0xff] }
 0x4e7   :  { %8499 = vmatprep.subr.bf16.mxu0 %v10380_v20  ;;  %8622 = vmatprep.subr.bf16.mxu1 %v10382_v26  ;;  %v6096_v20 = vld [vmem:[#allocation6 + $0x578] sm:$0xff]  ;;  %v10427_v26 = vcombine.low %v6083_v19, %v6087_v60  ;;  %v10436_v27 = vcombine.high %v6091_v4, %v6095_v16 }
 0x4e8   :  { %v10438_v29 = vcombine.high %v6092_v18, %v6096_v20  ;;  %v10437_v56 = vcombine.low %v6092_v18, %v6096_v20  ;;  %v6147_v20 = vld [vmem:[#allocation6 + $0x710] sm:$0xff] }
 0x4ea   :  { %8500 = vmatpush1.bf16.msra.mxu0 %v10379_v30  ;;  %8623 = vmatpush1.bf16.msra.mxu1 %v10381_v31  ;;  %v6103_v30 = vld [vmem:[#allocation6 + $0x5b0] sm:$0xff]  ;;  %v6100_v31 = vld [vmem:[#allocation6 + $0x598] sm:$0xff] }
 0x4eb   :  { %8501 = vmatprep.subr.bf16.mxu0 %v10388_v34  ;;  %8624 = vmatprep.subr.bf16.mxu1 %v10390_v33  ;;  %v6104_v34 = vld [vmem:[#allocation6 + $0x5b8] sm:$0xff]  ;;  %v10435_v33 = vcombine.low %v6091_v4, %v6095_v16  ;;  %v10444_v11 = vcombine.high %v6099_v6, %v6103_v30 }
 0x4ec   :  { %v10446_v38 = vcombine.high %v6100_v31, %v6104_v34  ;;  %v10445_v51 = vcombine.low %v6100_v31, %v6104_v34  ;;  %v6155_v34 = vld [vmem:[#allocation6 + $0x750] sm:$0xff] }
 0x4ee   :  { %8502 = vmatpush1.bf16.msra.mxu0 %v10387_v13  ;;  %8625 = vmatpush1.bf16.msra.mxu1 %v10389_v24  ;;  %v6111_v13 = vld [vmem:[#allocation6 + $0x5f0] sm:$0xff]  ;;  %v6108_v24 = vld [vmem:[#allocation6 + $0x5d8] sm:$0xff] }
 0x4ef   :  { %8512 = vmatprep.subr.bf16.mxu0 %v10396_v57  ;;  %8635 = vmatprep.subr.bf16.mxu1 %v10398_v39  ;;  %v6112_v57 = vld [vmem:[#allocation6 + $0x5f8] sm:$0xff]  ;;  %v10443_v39 = vcombine.low %v6099_v6, %v6103_v30  ;;  %v10452_v50 = vcombine.high %v6107_v12, %v6111_v13 }
 0x4f0   :  { %v10454_v53 = vcombine.high %v6108_v24, %v6112_v57 }
 0x4f1   :  { %8504 = vmatmul.mubr.bf16.vlgmr.msra.gmra.mrb[16].mxu0 %v12627_v58  ;;  %8627 = vmatmul.mubr.bf16.vlgmr.msra.gmra.mrb[20].mxu1 %v12627_v58  ;;  %v10411_v58 = vcombine.low %v6067_v0, %v6071_v36  ;;  %v10453_v0 = vcombine.low %v6108_v24, %v6112_v57  ;;  %v6163_v57 = vld [vmem:[#allocation6 + $0x790] sm:$0xff] }
 0x4f2   :  { %8513 = vmatpush1.bf16.msra.mxu0 %v10395_v40  ;;  %8544 = vmatprep.mubr.bf16.mxu0 %v12674_v14  ;;  %v6119_v40 = vld [vmem:[#allocation6 + $0x630] sm:$0xff] }
 0x4f3   :  { %8636 = vmatpush1.bf16.msra.mxu1 %v10397_v10  ;;  %8667 = vmatprep.mubr.bf16.mxu1 %v12674_v14  ;;  %v6084_v14 = vld [vmem:[#allocation6 + $0x518] sm:$0xff]  ;;  %v10460_v36 = vcombine.high %v6115_v25, %v6119_v40 }
 0x4f4   :  { %8514 = vmatprep.subr.bf16.mxu0 %v10404_v41  ;;  %8637 = vmatprep.subr.bf16.mxu1 %v10406_v48  ;;  %v10430_v3 = vcombine.high %v6084_v14, %v6088_v61  ;;  %v10429_v32 = vcombine.low %v6084_v14, %v6088_v61  ;;  %v6116_v10 = vld [vmem:[#allocation6 + $0x618] sm:$0xff]  ;;  %v10451_v48 = vcombine.low %v6107_v12, %v6111_v13  ;;  %v6139_v61 = vld [vmem:[#allocation6 + $0x6d0] sm:$0xff] }
 0x4f5   :  { %v6120_v41 = vld [vmem:[#allocation6 + $0x638] sm:$0xff] }
 0x4f6   :  { %8515 = vmatpush1.bf16.msra.mxu0 %v10403_v1  ;;  %v10462_v21 = vcombine.high %v6116_v10, %v6120_v41  ;;  %v6127_v1 = vld [vmem:[#allocation6 + $0x670] sm:$0xff]  ;;  %v10461_v46 = vcombine.low %v6116_v10, %v6120_v41 }
 0x4f7   :  { %8638 = vmatpush1.bf16.msra.mxu1 %v10405_v43  ;;  %8516 = vmatprep.subr.bf16.mxu0 %v10412_v44  ;;  %v6124_v43 = vld [vmem:[#allocation6 + $0x658] sm:$0xff]  ;;  %v10468_v47 = vcombine.high %v6123_v42, %v6127_v1  ;;  %v6171_v41 = vld [vmem:[#allocation6 + $0x7d0] sm:$0xff] }
 0x4f8   :  { %8639 = vmatprep.subr.bf16.mxu1 %v10414_v45  ;;  %v6128_v44 = vld [vmem:[#allocation6 + $0x678] sm:$0xff]  ;;  %v10459_v45 = vcombine.low %v6115_v25, %v6119_v40 }
 0x4f9   :  { %v10470_v22 = vcombine.high %v6124_v43, %v6128_v44  ;;  %v10469_v19 = vcombine.low %v6124_v43, %v6128_v44  ;;  %v6179_v44 = vld [vmem:[#allocation6 + $0x810] sm:$0xff] }
 0x4fa   :  { %8517 = vmatpush1.bf16.msra.mxu0 %v10411_v58  ;;  %v6135_v58 = vld [vmem:[#allocation6 + $0x6b0] sm:$0xff] }
 0x4fb   :  { %8640 = vmatpush1.bf16.msra.mxu1 %v10413_v54  ;;  %8518 = vmatprep.subr.bf16.mxu0 %v10420_v55  ;;  %v6132_v54 = vld [vmem:[#allocation6 + $0x698] sm:$0xff]  ;;  %v10476_v60 = vcombine.high %v6131_v49, %v6135_v58 }
 0x4fc   :  { %8641 = vmatprep.subr.bf16.mxu1 %v10422_v59  ;;  %v6136_v55 = vld [vmem:[#allocation6 + $0x6b8] sm:$0xff]  ;;  %v10467_v59 = vcombine.low %v6123_v42, %v6127_v1 }
 0x4fd   :  { %v10478_v14 = vcombine.high %v6132_v54, %v6136_v55  ;;  %v10477_v4 = vcombine.low %v6132_v54, %v6136_v55  ;;  %v6187_v55 = vld [vmem:[#allocation6 + $0x850] sm:$0xff] }
 0x4fe   :  { %8519 = vmatpush1.bf16.msra.mxu0 %v10419_v62  ;;  %v6143_v62 = vld [vmem:[#allocation6 + $0x6f0] sm:$0xff] }
 0x4ff   :  { %8642 = vmatpush1.bf16.msra.mxu1 %v10421_v63  ;;  %8520 = vmatprep.subr.bf16.mxu0 %v10428_v2  ;;  %v6140_v63 = vld [vmem:[#allocation6 + $0x6d8] sm:$0xff]  ;;  %v10484_v16 = vcombine.high %v6139_v61, %v6143_v62 }
 0x500   :  { %8643 = vmatprep.subr.bf16.mxu1 %v10430_v3  ;;  %v6144_v2 = vld [vmem:[#allocation6 + $0x6f8] sm:$0xff]  ;;  %v10475_v3 = vcombine.low %v6131_v49, %v6135_v58 }
 0x501   :  { %v10486_v18 = vcombine.high %v6140_v63, %v6144_v2  ;;  %v10485_v6 = vcombine.low %v6140_v63, %v6144_v2  ;;  %v6195_v63 = vld [vmem:[#allocation6 + $0x890] sm:$0xff] }
 0x502   :  { %8521 = vmatpush1.bf16.msra.mxu0 %v10427_v26  ;;  %v6151_v26 = vld [vmem:[#allocation6 + $0x730] sm:$0xff] }
 0x503   :  { %8644 = vmatpush1.bf16.msra.mxu1 %v10429_v32  ;;  %8522 = vmatprep.subr.bf16.mxu0 %v10436_v27  ;;  %v6148_v32 = vld [vmem:[#allocation6 + $0x718] sm:$0xff]  ;;  %v10492_v30 = vcombine.high %v6147_v20, %v6151_v26  ;;  %v6199_v2 = vld [vmem:[#allocation6 + $0x8b0] sm:$0xff] }
 0x504   :  { %8645 = vmatprep.subr.bf16.mxu1 %v10438_v29  ;;  %v6152_v27 = vld [vmem:[#allocation6 + $0x738] sm:$0xff]  ;;  %v10483_v29 = vcombine.low %v6139_v61, %v6143_v62 }
 0x505   :  { %v10494_v31 = vcombine.high %v6148_v32, %v6152_v27  ;;  %v10493_v12 = vcombine.low %v6148_v32, %v6152_v27  ;;  %v6203_v27 = vld [vmem:[#allocation6 + $0x8d0] sm:$0xff] }
 0x506   :  { %8523 = vmatpush1.bf16.msra.mxu0 %v10435_v33  ;;  %v6159_v33 = vld [vmem:[#allocation6 + $0x770] sm:$0xff] }
 0x507   :  { %8646 = vmatpush1.bf16.msra.mxu1 %v10437_v56  ;;  %8524 = vmatprep.subr.bf16.mxu0 %v10444_v11  ;;  %v6156_v56 = vld [vmem:[#allocation6 + $0x758] sm:$0xff]  ;;  %v10500_v13 = vcombine.high %v6155_v34, %v6159_v33 }
 0x508   :  { %8647 = vmatprep.subr.bf16.mxu1 %v10446_v38  ;;  %v6160_v11 = vld [vmem:[#allocation6 + $0x778] sm:$0xff]  ;;  %v10491_v38 = vcombine.low %v6147_v20, %v6151_v26  ;;  %v10540_v26 = vcombine.high %v6195_v63, %v6199_v2 }
 0x509   :  { %v10502_v24 = vcombine.high %v6156_v56, %v6160_v11  ;;  %v10501_v25 = vcombine.low %v6156_v56, %v6160_v11  ;;  %v6211_v56 = vld [vmem:[#allocation6 + $0x910] sm:$0xff] }
 0x50a   :  { %8525 = vmatpush1.bf16.msra.mxu0 %v10443_v39  ;;  %v6167_v39 = vld [vmem:[#allocation6 + $0x7b0] sm:$0xff] }
 0x50b   :  { %8648 = vmatpush1.bf16.msra.mxu1 %v10445_v51  ;;  %8526 = vmatprep.subr.bf16.mxu0 %v10452_v50  ;;  %v6164_v51 = vld [vmem:[#allocation6 + $0x798] sm:$0xff]  ;;  %v10508_v40 = vcombine.high %v6163_v57, %v6167_v39  ;;  %v6215_v11 = vld [vmem:[#allocation6 + $0x930] sm:$0xff] }
 0x50c   :  { %8649 = vmatprep.subr.bf16.mxu1 %v10454_v53  ;;  %v6168_v50 = vld [vmem:[#allocation6 + $0x7b8] sm:$0xff]  ;;  %v10499_v53 = vcombine.low %v6155_v34, %v6159_v33 }
 0x50d   :  { %v10510_v10 = vcombine.high %v6164_v51, %v6168_v50  ;;  %v10509_v42 = vcombine.low %v6164_v51, %v6168_v50  ;;  %v6223_v51 = vld [vmem:[#allocation6 + $0x970] sm:$0xff]  ;;  %v6220_v50 = vld [vmem:[#allocation6 + $0x958] sm:$0xff] }
 0x50e   :  { %8527 = vmatpush1.bf16.msra.mxu0 %v10451_v48  ;;  %v6175_v48 = vld [vmem:[#allocation6 + $0x7f0] sm:$0xff] }
 0x50f   :  { %8650 = vmatpush1.bf16.msra.mxu1 %v10453_v0  ;;  %8528 = vmatprep.subr.bf16.mxu0 %v10460_v36  ;;  %v6172_v0 = vld [vmem:[#allocation6 + $0x7d8] sm:$0xff]  ;;  %v10516_v1 = vcombine.high %v6171_v41, %v6175_v48 }
 0x510   :  { %8651 = vmatprep.subr.bf16.mxu1 %v10462_v21  ;;  %v6176_v36 = vld [vmem:[#allocation6 + $0x7f8] sm:$0xff]  ;;  %v10507_v21 = vcombine.low %v6163_v57, %v6167_v39  ;;  %v6219_v39 = vld [vmem:[#allocation6 + $0x950] sm:$0xff] }
 0x511   :  { %v10518_v43 = vcombine.high %v6172_v0, %v6176_v36  ;;  %v10517_v49 = vcombine.low %v6172_v0, %v6176_v36  ;;  %v6231_v0 = vld [vmem:[#allocation6 + $0x9b0] sm:$0xff]  ;;  %v6228_v36 = vld [vmem:[#allocation6 + $0x998] sm:$0xff] }
 0x512   :  { %8529 = vmatpush1.bf16.msra.mxu0 %v10459_v45  ;;  %v6183_v45 = vld [vmem:[#allocation6 + $0x830] sm:$0xff] }
 0x513   :  { %8652 = vmatpush1.bf16.msra.mxu1 %v10461_v46  ;;  %8530 = vmatprep.subr.bf16.mxu0 %v10468_v47  ;;  %v6180_v46 = vld [vmem:[#allocation6 + $0x818] sm:$0xff]  ;;  %v10524_v58 = vcombine.high %v6179_v44, %v6183_v45 }
 0x514   :  { %8653 = vmatprep.subr.bf16.mxu1 %v10470_v22  ;;  %v6184_v47 = vld [vmem:[#allocation6 + $0x838] sm:$0xff]  ;;  %v10515_v22 = vcombine.low %v6171_v41, %v6175_v48  ;;  %v6227_v48 = vld [vmem:[#allocation6 + $0x990] sm:$0xff] }
 0x515   :  { %v10526_v54 = vcombine.high %v6180_v46, %v6184_v47  ;;  %v10525_v61 = vcombine.low %v6180_v46, %v6184_v47  ;;  %v6239_v46 = vld [vmem:[#allocation6 + $0x9f0] sm:$0xff]  ;;  %v6236_v47 = vld [vmem:[#allocation6 + $0x9d8] sm:$0xff] }
 0x516   :  { %8531 = vmatpush1.bf16.msra.mxu0 %v10467_v59  ;;  %v6191_v59 = vld [vmem:[#allocation6 + $0x870] sm:$0xff] }
 0x517   :  { %8654 = vmatpush1.bf16.msra.mxu1 %v10469_v19  ;;  %8532 = vmatprep.subr.bf16.mxu0 %v10476_v60  ;;  %v10523_v19 = vcombine.low %v6179_v44, %v6183_v45  ;;  %v6188_v60 = vld [vmem:[#allocation6 + $0x858] sm:$0xff]  ;;  %v10532_v62 = vcombine.high %v6187_v55, %v6191_v59  ;;  %v6235_v45 = vld [vmem:[#allocation6 + $0x9d0] sm:$0xff] }
 0x518   :  { %8655 = vmatprep.subr.bf16.mxu1 %v10478_v14  ;;  %v6192_v14 = vld [vmem:[#allocation6 + $0x878] sm:$0xff] }
 0x519   :  { %v10533_v20 = vcombine.low %v6188_v60, %v6192_v14 }
 0x51a   :  { %8533 = vmatpush1.bf16.msra.mxu0 %v10475_v3  ;;  %v10534_v3 = vcombine.high %v6188_v60, %v6192_v14  ;;  %v6244_v60 = vld [vmem:[#allocation6 + $0xa18] sm:$0xff] }
 0x51b   :  { %8656 = vmatpush1.bf16.msra.mxu1 %v10477_v4  ;;  %8534 = vmatprep.subr.bf16.mxu0 %v10484_v16  ;;  %v6196_v4 = vld [vmem:[#allocation6 + $0x898] sm:$0xff] }
 0x51c   :  { %8657 = vmatprep.subr.bf16.mxu1 %v10486_v18  ;;  %v6200_v16 = vld [vmem:[#allocation6 + $0x8b8] sm:$0xff]  ;;  %v10531_v18 = vcombine.low %v6187_v55, %v6191_v59  ;;  %v6243_v59 = vld [vmem:[#allocation6 + $0xa10] sm:$0xff] }
 0x51d   :  { %v10542_v32 = vcombine.high %v6196_v4, %v6200_v16  ;;  %v6248_v14 = vld [vmem:[#allocation6 + $0xa38] sm:$0xff] }
 0x51e   :  { %8535 = vmatpush1.bf16.msra.mxu0 %v10483_v29  ;;  %v6207_v29 = vld [vmem:[#allocation6 + $0x8f0] sm:$0xff] }
 0x51f   :  { %8658 = vmatpush1.bf16.msra.mxu1 %v10485_v6  ;;  %8536 = vmatprep.subr.bf16.mxu0 %v10492_v30  ;;  %v6204_v6 = vld [vmem:[#allocation6 + $0x8d8] sm:$0xff]  ;;  %v10548_v34 = vcombine.high %v6203_v27, %v6207_v29 }
 0x520   :  { %8659 = vmatprep.subr.bf16.mxu1 %v10494_v31  ;;  %v6208_v30 = vld [vmem:[#allocation6 + $0x8f8] sm:$0xff]  ;;  %v10539_v31 = vcombine.low %v6195_v63, %v6199_v2  ;;  %v10590_v2 = vcombine.high %v6244_v60, %v6248_v14 }
 0x521   :  { %v10550_v33 = vcombine.high %v6204_v6, %v6208_v30 }
 0x522   :  { %8537 = vmatpush1.bf16.msra.mxu0 %v10491_v38  ;;  %v6212_v38 = vld [vmem:[#allocation6 + $0x918] sm:$0xff] }
 0x523   :  { %8660 = vmatpush1.bf16.msra.mxu1 %v10493_v12  ;;  %8538 = vmatprep.subr.bf16.mxu0 %v10500_v13  ;;  %v6216_v12 = vld [vmem:[#allocation6 + $0x938] sm:$0xff]  ;;  %v10549_v13 = vcombine.low %v6204_v6, %v6208_v30  ;;  %v6263_v6 = vld [vmem:[#allocation6 + $0xab0] sm:$0xff] }
 0x524   :  { %8661 = vmatprep.subr.bf16.mxu1 %v10502_v24  ;;  %v10556_v24 = vcombine.high %v6211_v56, %v6215_v11  ;;  %v10558_v57 = vcombine.high %v6212_v38, %v6216_v12  ;;  %v6260_v30 = vld [vmem:[#allocation6 + $0xa98] sm:$0xff] }
 0x526   :  { %8539 = vmatpush1.bf16.msra.mxu0 %v10499_v53  ;;  %v6224_v53 = vld [vmem:[#allocation6 + $0x978] sm:$0xff] }
 0x527   :  { %8662 = vmatpush1.bf16.msra.mxu1 %v10501_v25  ;;  %8540 = vmatprep.subr.bf16.mxu0 %v10508_v40  ;;  %v10555_v25 = vcombine.low %v6211_v56, %v6215_v11  ;;  %v10557_v40 = vcombine.low %v6212_v38, %v6216_v12  ;;  %v10566_v41 = vcombine.high %v6220_v50, %v6224_v53  ;;  %v6267_v11 = vld [vmem:[#allocation6 + $0xad0] sm:$0xff]  ;;  %v6268_v12 = vld [vmem:[#allocation6 + $0xad8] sm:$0xff] }
 0x528   :  { %8663 = vmatprep.subr.bf16.mxu1 %v10510_v10  ;;  %v10564_v10 = vcombine.high %v6219_v39, %v6223_v51  ;;  %v6271_v38 = vld [vmem:[#allocation6 + $0xaf0] sm:$0xff] }
 0x52a   :  { %8541 = vmatpush1.bf16.msra.mxu0 %v10507_v21  ;;  %v6232_v21 = vld [vmem:[#allocation6 + $0x9b8] sm:$0xff] }
 0x52b   :  { %8664 = vmatpush1.bf16.msra.mxu1 %v10509_v42  ;;  %8542 = vmatprep.subr.bf16.mxu0 %v10516_v1  ;;  %v10563_v42 = vcombine.low %v6219_v39, %v6223_v51  ;;  %v10565_v1 = vcombine.low %v6220_v50, %v6224_v53  ;;  %v10574_v44 = vcombine.high %v6228_v36, %v6232_v21  ;;  %v6275_v51 = vld [vmem:[#allocation6 + $0xb10] sm:$0xff]  ;;  %v6276_v53 = vld [vmem:[#allocation6 + $0xb18] sm:$0xff] }
 0x52c   :  { %8665 = vmatprep.subr.bf16.mxu1 %v10518_v43  ;;  %v10572_v43 = vcombine.high %v6227_v48, %v6231_v0  ;;  %v6279_v50 = vld [vmem:[#allocation6 + $0xb30] sm:$0xff] }
 0x52e   :  { %8543 = vmatpush1.bf16.msra.mxu0 %v10515_v22  ;;  %v6240_v22 = vld [vmem:[#allocation6 + $0x9f8] sm:$0xff] }
 0x52f   :  { %8666 = vmatpush1.bf16.msra.mxu1 %v10517_v49  ;;  %8553 = vmatprep.subr.bf16.mxu0 %v10524_v58  ;;  %v10571_v49 = vcombine.low %v6227_v48, %v6231_v0  ;;  %v10573_v58 = vcombine.low %v6228_v36, %v6232_v21  ;;  %v10582_v55 = vcombine.high %v6236_v47, %v6240_v22  ;;  %v6283_v0 = vld [vmem:[#allocation6 + $0xb50] sm:$0xff]  ;;  %v6284_v21 = vld [vmem:[#allocation6 + $0xb58] sm:$0xff] }
 0x530   :  { %8676 = vmatprep.subr.bf16.mxu1 %v10526_v54  ;;  %v10580_v54 = vcombine.high %v6235_v45, %v6239_v46  ;;  %v6287_v36 = vld [vmem:[#allocation6 + $0xb70] sm:$0xff] }
 0x531   :  { %8545 = vmatmul.mubr.bf16.vlgmr.msra.gmra.mrb[16].mxu0 %v12676_v15 }
 0x532   :  { %8668 = vmatmul.mubr.bf16.vlgmr.msra.gmra.mrb[20].mxu1 %v12676_v15  ;;  %8554 = vmatpush1.bf16.msra.mxu0 %v10523_v19  ;;  %v10541_v15 = vcombine.low %v6196_v4, %v6200_v16  ;;  %v6247_v19 = vld [vmem:[#allocation6 + $0xa30] sm:$0xff]  ;;  %v6252_v16 = vld [vmem:[#allocation6 + $0xa58] sm:$0xff] }
 0x533   :  { %8585 = vmatprep.mubr.bf16.mxu0 %v12709_v23  ;;  %8677 = vmatpush1.bf16.msra.mxu1 %v10525_v61  ;;  %v10579_v61 = vcombine.low %v6235_v45, %v6239_v46  ;;  %v10588_v63 = vcombine.high %v6243_v59, %v6247_v19  ;;  %v6255_v4 = vld [vmem:[#allocation6 + $0xa70] sm:$0xff] }
 0x534   :  { %8708 = vmatprep.mubr.bf16.mxu1 %v12709_v23  ;;  %8555 = vmatprep.subr.bf16.mxu0 %v10532_v62  ;;  %v10547_v23 = vcombine.low %v6203_v27, %v6207_v29  ;;  %v10581_v62 = vcombine.low %v6236_v47, %v6240_v22  ;;  %v6259_v29 = vld [vmem:[#allocation6 + $0xa90] sm:$0xff]  ;;  %v6292_v22 = vld [vmem:[#allocation6 + $0xb98] sm:$0xff] }
 0x535   :  { %8678 = vmatprep.subr.bf16.mxu1 %v10534_v3  ;;  %v6251_v3 = vld [vmem:[#allocation6 + $0xa50] sm:$0xff] }
 0x536   :  { %8556 = vmatpush1.bf16.msra.mxu0 %v10531_v18  ;;  %v6256_v18 = vld [vmem:[#allocation6 + $0xa78] sm:$0xff]  ;;  %v6291_v46 = vld [vmem:[#allocation6 + $0xb90] sm:$0xff] }
 0x537   :  { %8679 = vmatpush1.bf16.msra.mxu1 %v10533_v20  ;;  %8557 = vmatprep.subr.bf16.mxu0 %v10540_v26  ;;  %v10587_v20 = vcombine.low %v6243_v59, %v6247_v19  ;;  %v10589_v26 = vcombine.low %v6244_v60, %v6248_v14  ;;  %v10598_v27 = vcombine.high %v6252_v16, %v6256_v18  ;;  %v6295_v47 = vld [vmem:[#allocation6 + $0xbb0] sm:$0xff]  ;;  %v6300_v14 = vld [vmem:[#allocation6 + $0xbd8] sm:$0xff] }
 0x538   :  { %8680 = vmatprep.subr.bf16.mxu1 %v10542_v32  ;;  %v10596_v32 = vcombine.high %v6251_v3, %v6255_v4  ;;  %v6299_v19 = vld [vmem:[#allocation6 + $0xbd0] sm:$0xff] }
 0x539   :  { %v6303_v60 = vld [vmem:[#allocation6 + $0xbf0] sm:$0xff] }
 0x53a   :  { %8558 = vmatpush1.bf16.msra.mxu0 %v10539_v31  ;;  %v6264_v31 = vld [vmem:[#allocation6 + $0xab8] sm:$0xff] }
 0x53b   :  { %8681 = vmatpush1.bf16.msra.mxu1 %v10541_v15  ;;  %8559 = vmatprep.subr.bf16.mxu0 %v10548_v34  ;;  %v10595_v15 = vcombine.low %v6251_v3, %v6255_v4  ;;  %v10597_v34 = vcombine.low %v6252_v16, %v6256_v18  ;;  %v10606_v56 = vcombine.high %v6260_v30, %v6264_v31  ;;  %v12002_v18 = vld [vmem:[#allocation9 + $0x4] ss:$8 sps:$4 sm:$0xff]  }
 0x53c   :  { %8682 = vmatprep.subr.bf16.mxu1 %v10550_v33  ;;  %v10604_v33 = vcombine.high %v6259_v29, %v6263_v6  ;;  %v10643_v4 = vcombine.low %v6299_v19, %v6303_v60 }
 0x53e   :  { %8560 = vmatpush1.bf16.msra.mxu0 %v10547_v23  ;;  %v6272_v23 = vld [vmem:[#allocation6 + $0xaf8] sm:$0xff] }
 0x53f   :  { %8683 = vmatpush1.bf16.msra.mxu1 %v10549_v13  ;;  %8561 = vmatprep.subr.bf16.mxu0 %v10556_v24  ;;  %v10603_v13 = vcombine.low %v6259_v29, %v6263_v6  ;;  %v10605_v24 = vcombine.low %v6260_v30, %v6264_v31  ;;  %v10614_v39 = vcombine.high %v6268_v12, %v6272_v23  ;;  %v12006_v29 = vld [vmem:[#allocation9 + $0x20] ss:$8 sps:$4 sm:$0xff]   ;;  %v12011_v6 = vld [vmem:[#allocation9 + $0x34] ss:$8 sps:$4 sm:$0xff]   ;;  %v12009_v30 = vld [vmem:[#allocation9 + $0x30] ss:$8 sps:$4 sm:$0xff]  }
 0x540   :  { %8684 = vmatprep.subr.bf16.mxu1 %v10558_v57  ;;  %v10612_v57 = vcombine.high %v6267_v11, %v6271_v38  ;;  %v12014_v31 = vld [vmem:[#allocation9 + $0x44] ss:$8 sps:$4 sm:$0xff]  }
 0x542   :  { %8562 = vmatpush1.bf16.msra.mxu0 %v10555_v25  ;;  %v6280_v25 = vld [vmem:[#allocation6 + $0xb38] sm:$0xff] }
 0x543   :  { %8685 = vmatpush1.bf16.msra.mxu1 %v10557_v40  ;;  %8563 = vmatprep.subr.bf16.mxu0 %v10564_v10  ;;  %v10611_v40 = vcombine.low %v6267_v11, %v6271_v38  ;;  %v10613_v10 = vcombine.low %v6268_v12, %v6272_v23  ;;  %v10622_v48 = vcombine.high %v6276_v53, %v6280_v25 }
 0x544   :  { %8686 = vmatprep.subr.bf16.mxu1 %v10566_v41  ;;  %v10620_v41 = vcombine.high %v6275_v51, %v6279_v50 }
 0x546   :  { %8564 = vmatpush1.bf16.msra.mxu0 %v10563_v42  ;;  %v6288_v42 = vld [vmem:[#allocation6 + $0xb78] sm:$0xff] }
 0x547   :  { %8687 = vmatpush1.bf16.msra.mxu1 %v10565_v1  ;;  %8565 = vmatprep.subr.bf16.mxu0 %v10572_v43  ;;  %v10619_v1 = vcombine.low %v6275_v51, %v6279_v50  ;;  %v10621_v43 = vcombine.low %v6276_v53, %v6280_v25  ;;  %v10630_v45 = vcombine.high %v6284_v21, %v6288_v42  ;;  %v12023_v51 = vld [vmem:[#allocation9 + $0x74] ss:$8 sps:$4 sm:$0xff]   ;;  %v12021_v50 = vld [vmem:[#allocation9 + $0x70] ss:$8 sps:$4 sm:$0xff]   ;;  %v12026_v53 = vld [vmem:[#allocation9 + $0x84] ss:$8 sps:$4 sm:$0xff]  }
 0x548   :  { %8688 = vmatprep.subr.bf16.mxu1 %v10574_v44  ;;  %v10628_v44 = vcombine.high %v6283_v0, %v6287_v36  ;;  %v12024_v25 = vld [vmem:[#allocation9 + $0x80] ss:$8 sps:$4 sm:$0xff]  }
 0x54a   :  { %8566 = vmatpush1.bf16.msra.mxu0 %v10571_v49  ;;  %v6296_v49 = vld [vmem:[#allocation6 + $0xbb8] sm:$0xff] }
 0x54b   :  { %8689 = vmatpush1.bf16.msra.mxu1 %v10573_v58  ;;  %8567 = vmatprep.subr.bf16.mxu0 %v10580_v54  ;;  %v10627_v58 = vcombine.low %v6283_v0, %v6287_v36  ;;  %v10629_v54 = vcombine.low %v6284_v21, %v6288_v42  ;;  %v10638_v59 = vcombine.high %v6292_v22, %v6296_v49  ;;  %v12035_v0 = vld [vmem:[#allocation9 + $0xb4] ss:$8 sps:$4 sm:$0xff]   ;;  %v12033_v36 = vld [vmem:[#allocation9 + $0xb0] ss:$8 sps:$4 sm:$0xff]   ;;  %v12038_v21 = vld [vmem:[#allocation9 + $0xc4] ss:$8 sps:$4 sm:$0xff]  }
 0x54c   :  { %8690 = vmatprep.subr.bf16.mxu1 %v10582_v55  ;;  %v10636_v55 = vcombine.high %v6291_v46, %v6295_v47  ;;  %v12036_v42 = vld [vmem:[#allocation9 + $0xc0] ss:$8 sps:$4 sm:$0xff]  }
 0x54e   :  { %8568 = vmatpush1.bf16.msra.mxu0 %v10579_v61  ;;  %v6304_v61 = vld [vmem:[#allocation6 + $0xbf8] sm:$0xff] }
 0x54f   :  { %8691 = vmatpush1.bf16.msra.mxu1 %v10581_v62  ;;  %8569 = vmatprep.subr.bf16.mxu0 %v10588_v63  ;;  %v10635_v62 = vcombine.low %v6291_v46, %v6295_v47  ;;  %v10637_v63 = vcombine.low %v6292_v22, %v6296_v49  ;;  %v10646_v3 = vcombine.high %v6300_v14, %v6304_v61  ;;  %v12047_v46 = vld [vmem:[#allocation9 + $0xf4] ss:$8 sps:$4 sm:$0xff]   ;;  %v12045_v47 = vld [vmem:[#allocation9 + $0xf0] ss:$8 sps:$4 sm:$0xff]   ;;  %v12050_v22 = vld [vmem:[#allocation9 + $0x104] ss:$8 sps:$4 sm:$0xff]  }
 0x550   :  { %8692 = vmatprep.subr.bf16.mxu1 %v10590_v2  ;;  %v10644_v2 = vcombine.high %v6299_v19, %v6303_v60  ;;  %v10645_v16 = vcombine.low %v6300_v14, %v6304_v61  ;;  %v12096_v49 = vld [vmem:[#allocation12] ss:$8 sps:$4 sm:$0xff]   ;;  %v12107_v60 = vld [vmem:[#allocation12 + $0x34] ss:$8 sps:$4 sm:$0xff]   ;;  %v12105_v14 = vld [vmem:[#allocation12 + $0x30] ss:$8 sps:$4 sm:$0xff]  }
 0x551   :  { %v12102_v19 = vld [vmem:[#allocation12 + $0x20] ss:$8 sps:$4 sm:$0xff]   ;;  %v12110_v61 = vld [vmem:[#allocation12 + $0x44] ss:$8 sps:$4 sm:$0xff]  }
 0x552   :  { %8570 = vmatpush1.bf16.msra.mxu0 %v10587_v20  ;;  %v12000_v20 = vld [vmem:[#allocation9] ss:$8 sps:$4 sm:$0xff]  }
 0x553   :  { %8693 = vmatpush1.bf16.msra.mxu1 %v10589_v26  ;;  %8571 = vmatprep.subr.bf16.mxu0 %v10596_v32  ;;  %v12005_v26 = vld [vmem:[#allocation9 + $0x14] ss:$8 sps:$4 sm:$0xff]   ;;  %v12003_v32 = vld [vmem:[#allocation9 + $0x10] ss:$8 sps:$4 sm:$0xff]  }
 0x554   :  { %8694 = vmatprep.subr.bf16.mxu1 %v10598_v27  ;;  %v12008_v27 = vld [vmem:[#allocation9 + $0x24] ss:$8 sps:$4 sm:$0xff]  }
 0x556   :  { %8572 = vmatpush1.bf16.msra.mxu0 %v10595_v15  ;;  %v12012_v15 = vld [vmem:[#allocation9 + $0x40] ss:$8 sps:$4 sm:$0xff]  }
 0x557   :  { %8695 = vmatpush1.bf16.msra.mxu1 %v10597_v34  ;;  %8573 = vmatprep.subr.bf16.mxu0 %v10604_v33  ;;  %v12017_v34 = vld [vmem:[#allocation9 + $0x54] ss:$8 sps:$4 sm:$0xff]   ;;  %v12015_v33 = vld [vmem:[#allocation9 + $0x50] ss:$8 sps:$4 sm:$0xff]  }
 0x558   :  { %8696 = vmatprep.subr.bf16.mxu1 %v10606_v56 }
 0x55a   :  { %8574 = vmatpush1.bf16.msra.mxu0 %v10603_v13 }
 0x55b   :  { %8697 = vmatpush1.bf16.msra.mxu1 %v10605_v24  ;;  %8575 = vmatprep.subr.bf16.mxu0 %v10612_v57  ;;  %v12018_v24 = vld [vmem:[#allocation9 + $0x60] ss:$8 sps:$4 sm:$0xff]  }
 0x55c   :  { %8698 = vmatprep.subr.bf16.mxu1 %v10614_v39 }
 0x55e   :  { %8576 = vmatpush1.bf16.msra.mxu0 %v10611_v40  ;;  %v12029_v40 = vld [vmem:[#allocation9 + $0x94] ss:$8 sps:$4 sm:$0xff]  }
 0x55f   :  { %8699 = vmatpush1.bf16.msra.mxu1 %v10613_v10  ;;  %8577 = vmatprep.subr.bf16.mxu0 %v10620_v41  ;;  %v12027_v10 = vld [vmem:[#allocation9 + $0x90] ss:$8 sps:$4 sm:$0xff]   ;;  %v12032_v41 = vld [vmem:[#allocation9 + $0xa4] ss:$8 sps:$4 sm:$0xff]  }
 0x560   :  { %8700 = vmatprep.subr.bf16.mxu1 %v10622_v48  ;;  %v12030_v48 = vld [vmem:[#allocation9 + $0xa0] ss:$8 sps:$4 sm:$0xff]  }
 0x562   :  { %8578 = vmatpush1.bf16.msra.mxu0 %v10619_v1  ;;  %v12041_v1 = vld [vmem:[#allocation9 + $0xd4] ss:$8 sps:$4 sm:$0xff]  }
 0x563   :  { %8701 = vmatpush1.bf16.msra.mxu1 %v10621_v43  ;;  %8579 = vmatprep.subr.bf16.mxu0 %v10628_v44  ;;  %v12039_v43 = vld [vmem:[#allocation9 + $0xd0] ss:$8 sps:$4 sm:$0xff]   ;;  %v12044_v44 = vld [vmem:[#allocation9 + $0xe4] ss:$8 sps:$4 sm:$0xff]  }
 0x564   :  { %8702 = vmatprep.subr.bf16.mxu1 %v10630_v45  ;;  %v12042_v45 = vld [vmem:[#allocation9 + $0xe0] ss:$8 sps:$4 sm:$0xff]  }
 0x566   :  { %8580 = vmatpush1.bf16.msra.mxu0 %v10627_v58  ;;  %v12098_v58 = vld [vmem:[#allocation12 + $0x4] ss:$8 sps:$4 sm:$0xff]  }
 0x567   :  { %8703 = vmatpush1.bf16.msra.mxu1 %v10629_v54  ;;  %8581 = vmatprep.subr.bf16.mxu0 %v10636_v55  ;;  %v12101_v54 = vld [vmem:[#allocation12 + $0x14] ss:$8 sps:$4 sm:$0xff]   ;;  %v12099_v55 = vld [vmem:[#allocation12 + $0x10] ss:$8 sps:$4 sm:$0xff]  }
 0x568   :  { %8704 = vmatprep.subr.bf16.mxu1 %v10638_v59  ;;  %v12104_v59 = vld [vmem:[#allocation12 + $0x24] ss:$8 sps:$4 sm:$0xff]  }
 0x56a   :  { %8582 = vmatpush1.bf16.msra.mxu0 %v10635_v62  ;;  %v12108_v62 = vld [vmem:[#allocation12 + $0x40] ss:$8 sps:$4 sm:$0xff]  }
 0x56b   :  { %8705 = vmatpush1.bf16.msra.mxu1 %v10637_v63  ;;  %8583 = vmatprep.subr.bf16.mxu0 %v10644_v2  ;;  %v8717_v63 = vld [vmem:[#allocation7] ss:$2 sm:$0xff] }
 0x56c   :  { %8706 = vmatprep.subr.bf16.mxu1 %v10646_v3  ;;  %v8722_v2 = vrot.slane %v8717_v63, %v12590_v5  ;;  %v8768_v3 = vld [vmem:[#allocation7 + $0x1] ss:$2 sm:$0xff] }
 0x56e   :  { %8584 = vmatpush1.bf16.msra.mxu0 %v10643_v4  ;;  %v8730_v4 = vrot.slane %v8717_v63, %v12643_v17 }
 0x56f   :  { %8707 = vmatpush1.bf16.msra.mxu1 %v10645_v16  ;;  %9218 = vmatprep.subr.bf16.mxu0 %v12002_v18  ;;  %v8726_v16 = vrot.slane %v8717_v63, %v12595_v8  ;;  %v8734_v18 = vrot.slane %v8717_v63, %v12646_v7 }
 0x570   :  { %9441 = vmatprep.subr.bf16.mxu1 %v12098_v58 }
 0x571   :  { %8586 = vmatmul.mubr.bf16.vlgmr.msra.gmra.mrb[16].mxu0 %v12711_v28 }
 0x572   :  { %8709 = vmatmul.mubr.bf16.vlgmr.msra.gmra.mrb[20].mxu1 %v12711_v28  ;;  %9219 = vmatpush1.bf16.msra.mxu0 %v12000_v20  ;;  %v12020_v28 = vld [vmem:[#allocation9 + $0x64] ss:$8 sps:$4 sm:$0xff]   ;;  %v8773_v20 = vrot.slane %v8768_v3, %v12590_v5 }
 0x573   :  { %9220 = vmatprep.subr.bf16.mxu0 %v12005_v26  ;;  %9442 = vmatpush1.bf16.msra.mxu1 %v12096_v49 }
 0x574   :  { %9443 = vmatprep.subr.bf16.mxu1 %v12101_v54 }
 0x576   :  { %9221 = vmatpush1.bf16.msra.mxu0 %v12003_v32  ;;  %v8781_v32 = vrot.slane %v8768_v3, %v12643_v17  ;;  %v8750_v17 = vrot.slane %v8717_v63, %v12607_v52 }
 0x577   :  { %9222 = vmatprep.subr.bf16.mxu0 %v12008_v27  ;;  %9444 = vmatpush1.bf16.msra.mxu1 %v12099_v55  ;;  %v8777_v27 = vrot.slane %v8768_v3, %v12595_v8  ;;  %v12048_v55 = vld [vmem:[#allocation9 + $0x100] ss:$8 sps:$4 sm:$0xff]  }
 0x578   :  { %9445 = vmatprep.subr.bf16.mxu1 %v12104_v59 }
 0x57a   :  { %9223 = vmatpush1.bf16.msra.mxu0 %v12006_v29  ;;  %v8738_v29 = vrot.slane %v8717_v63, %v12690_v35 }
 0x57b   :  { %9224 = vmatprep.subr.bf16.mxu0 %v12011_v6  ;;  %9446 = vmatpush1.bf16.msra.mxu1 %v12102_v19  ;;  %v12053_v19 = vld [vmem:[#allocation9 + $0x114] ss:$8 sps:$4 sm:$0xff]  }
 0x57c   :  { %9447 = vmatprep.subr.bf16.mxu1 %v12107_v60 }
 0x57e   :  { %9225 = vmatpush1.bf16.msra.mxu0 %v12009_v30 }
 0x57f   :  { %9226 = vmatprep.subr.bf16.mxu0 %v12014_v31  ;;  %9448 = vmatpush1.bf16.msra.mxu1 %v12105_v14  ;;  %v8746_v31 = vrot.slane %v8717_v63, %v12600_v9  ;;  %v12051_v14 = vld [vmem:[#allocation9 + $0x110] ss:$8 sps:$4 sm:$0xff]  }
 0x580   :  { %9449 = vmatprep.subr.bf16.mxu1 %v12110_v61  ;;  %v12056_v61 = vld [vmem:[#allocation9 + $0x124] ss:$8 sps:$4 sm:$0xff]  }
 0x582   :  { %9227 = vmatpush1.bf16.msra.mxu0 %v12012_v15  ;;  %v8742_v15 = vrot.slane %v8717_v63, %v12693_v37  ;;  %v12059_v63 = vld [vmem:[#allocation9 + $0x134] ss:$8 sps:$4 sm:$0xff]  }
 0x583   :  { %9228 = vmatprep.subr.bf16.mxu0 %v12017_v34  ;;  %9450 = vmatpush1.bf16.msra.mxu1 %v12108_v62  ;;  %v12054_v62 = vld [vmem:[#allocation9 + $0x120] ss:$8 sps:$4 sm:$0xff]  }
 0x584   :  { %v12732_v56 = vpop.f32.mrb[12].mxu0  ;;  %v12734_v11 = vpop.f32.mrb[16].mxu1 }
 0x585   :  { %v12736_v38 = vpop.f32.mrb[13].mxu0  ;;  %v12738_v12 = vpop.f32.mrb[17].mxu1  ;;  %v8759_v26 = vmul.f32 %v8722_v2, %v12732_v56  ;;  %v8761_v6 = vmul.f32 %v8730_v4, %v12734_v11  ;;  %v12057_v2 = vld [vmem:[#allocation9 + $0x130] ss:$8 sps:$4 sm:$0xff]   ;;  %v12060_v4 = vld [vmem:[#allocation9 + $0x140] ss:$8 sps:$4 sm:$0xff]  }
 0x586   :  { %v8345_v23 = vpop.f32.mrb[14].mxu0  ;;  %v8468_v13 = vpop.f32.mrb[18].mxu1  ;;  %9229 = vmatpush1.bf16.msra.mxu0 %v12015_v33  ;;  %v8760_v30 = vmul.f32 %v8726_v16, %v12736_v38  ;;  %v8762_v34 = vmul.f32 %v8734_v18, %v12738_v12  ;;  %v8785_v33 = vrot.slane %v8768_v3, %v12646_v7  ;;  %v12065_v16 = vld [vmem:[#allocation9 + $0x154] ss:$8 sps:$4 sm:$0xff]   ;;  %v12063_v18 = vld [vmem:[#allocation9 + $0x150] ss:$8 sps:$4 sm:$0xff]  }
 0x587   :  { %v8346_v57 = vpop.f32.mrb[15].mxu0  ;;  %v8469_v39 = vpop.f32.mrb[19].mxu1  ;;  %9230 = vmatprep.subr.bf16.mxu0 %v12020_v28  ;;  %v8789_v28 = vrot.slane %v8768_v3, %v12690_v35  ;;  %v8797_v23 = vrot.slane %v8768_v3, %v12600_v9  ;;  %v8793_v13 = vrot.slane %v8768_v3, %v12693_v37  ;;  %v8810_v11 = vadd.f32 %v8773_v20, %v8759_v26  ;;  %v12068_v20 = vld [vmem:[#allocation9 + $0x164] ss:$8 sps:$4 sm:$0xff]   ;;  %v12066_v26 = vld [vmem:[#allocation9 + $0x160] ss:$8 sps:$4 sm:$0xff]  }
 0x588   :  { %v8801_v39 = vrot.slane %v8768_v3, %v12607_v52  ;;  %v8813_v35 = vadd.f32 %v8785_v33, %v8762_v34  ;;  %v12062_v3 = vld [vmem:[#allocation9 + $0x144] ss:$8 sps:$4 sm:$0xff]   ;;  %v12078_v34 = vld [vmem:[#allocation9 + $0x1a0] ss:$8 sps:$4 sm:$0xff]   ;;  %v12083_v33 = vld [vmem:[#allocation9 + $0x1b4] ss:$8 sps:$4 sm:$0xff]  }
 0x58a   :  { %9231 = vmatpush1.bf16.msra.mxu0 %v12018_v24 }
 0x58b   :  { %9232 = vmatprep.subr.bf16.mxu0 %v12023_v51  ;;  %v8812_v51 = vadd.f32 %v8781_v32, %v8761_v6  ;;  %v12071_v32 = vld [vmem:[#allocation9 + $0x174] ss:$8 sps:$4 sm:$0xff]   ;;  %v12072_v6 = vld [vmem:[#allocation9 + $0x180] ss:$8 sps:$4 sm:$0xff]  }
 0x58e   :  { %9233 = vmatpush1.bf16.msra.mxu0 %v12021_v50  ;;  %v8811_v50 = vadd.f32 %v8777_v27, %v8760_v30  ;;  %v12069_v27 = vld [vmem:[#allocation9 + $0x170] ss:$8 sps:$4 sm:$0xff]   ;;  %v12077_v30 = vld [vmem:[#allocation9 + $0x194] ss:$8 sps:$4 sm:$0xff]  }
 0x58f   :  { %9234 = vmatprep.subr.bf16.mxu0 %v12026_v53 }
 0x592   :  { %9235 = vmatpush1.bf16.msra.mxu0 %v12024_v25 }
 0x593   :  { %9236 = vmatprep.subr.bf16.mxu0 %v12029_v40 }
 0x596   :  { %9237 = vmatpush1.bf16.msra.mxu0 %v12027_v10 }
 0x597   :  { %9238 = vmatprep.subr.bf16.mxu0 %v12032_v41 }
 0x59a   :  { %9239 = vmatpush1.bf16.msra.mxu0 %v12030_v48 }
 0x59b   :  { %9240 = vmatprep.subr.bf16.mxu0 %v12035_v0 }
 0x59e   :  { %9241 = vmatpush1.bf16.msra.mxu0 %v12033_v36  ;;  %v8818_v36 = vmax.f32 %v8810_v11, 0.0  ;;  %v12092_v11 = vld [vmem:[#allocation9 + $0x1e4] ss:$8 sps:$4 sm:$0xff]  }
 0x59f   :  { %9242 = vmatprep.subr.bf16.mxu0 %v12038_v21 }
 0x5a2   :  { %9243 = vmatpush1.bf16.msra.mxu0 %v12036_v42 }
 0x5a3   :  { %9244 = vmatprep.subr.bf16.mxu0 %v12041_v1  ;;  %v8820_v1 = vmax.f32 %v8812_v51, 0.0  ;;  %v12113_v51 = vld [vmem:[#allocation12 + $0x54] ss:$8 sps:$4 sm:$0xff]  }
 0x5a4   :  { %9451 = vmatprep.subr.bf16.mxu1 %v12113_v51 }
 0x5a6   :  { %9245 = vmatpush1.bf16.msra.mxu0 %v12039_v43  ;;  %v8819_v43 = vmax.f32 %v8811_v50, 0.0  ;;  %v12111_v50 = vld [vmem:[#allocation12 + $0x50] ss:$8 sps:$4 sm:$0xff]  }
 0x5a7   :  { %9246 = vmatprep.subr.bf16.mxu0 %v12044_v44  ;;  %9452 = vmatpush1.bf16.msra.mxu1 %v12111_v50 }
 0x5aa   :  { %9247 = vmatpush1.bf16.msra.mxu0 %v12042_v45  ;;  %v8821_v45 = vmax.f32 %v8813_v35, 0.0  ;;  %v12322_v35 = vmov 0  }
 0x5ab   :  { %9248 = vmatprep.subr.bf16.mxu0 %v12047_v46  ;;  %9473 = vmatprep.mubr.bf16.mxu1 %v12322_v35 }
 0x5ae   :  { %9249 = vmatpush1.bf16.msra.mxu0 %v12045_v47 }
 0x5af   :  { %9259 = vmatprep.subr.bf16.mxu0 %v12050_v22 }
 0x644   :  { %v8587_v56 = vpop.f32.mrb[16].mxu0 }
 0x645   :  { %v8763_v24 = vmul.f32 %v8738_v29, %v8587_v56  ;;  %v8710_v38 = vpop.f32.mrb[20].mxu1  ;;  %v8589_v57 = vpop.f32.mrb[17].mxu0  ;;  %v12074_v29 = vld [vmem:[#allocation9 + $0x184] ss:$8 sps:$4 sm:$0xff]   ;;  %v12084_v56 = vld [vmem:[#allocation9 + $0x1c0] ss:$8 sps:$4 sm:$0xff]  }
 0x646   :  { %v8765_v12 = vmul.f32 %v8746_v31, %v8710_v38  ;;  %v8764_v53 = vmul.f32 %v8742_v15, %v8589_v57  ;;  %v8712_v7 = vpop.f32.mrb[21].mxu1  ;;  %v8591_v25 = vpop.f32.mrb[18].mxu0  ;;  %v12075_v31 = vld [vmem:[#allocation9 + $0x190] ss:$8 sps:$4 sm:$0xff]   ;;  %v12080_v15 = vld [vmem:[#allocation9 + $0x1a4] ss:$8 sps:$4 sm:$0xff]  }
 0x647   :  { %v8814_v40 = vadd.f32 %v8789_v28, %v8763_v24  ;;  %v8766_v10 = vmul.f32 %v8750_v17, %v8712_v7  ;;  %v8714_v41 = vpop.f32.mrb[22].mxu1  ;;  %v8592_v48 = vpop.f32.mrb[19].mxu0  ;;  %v12081_v28 = vld [vmem:[#allocation9 + $0x1b0] ss:$8 sps:$4 sm:$0xff]   ;;  %v12086_v17 = vld [vmem:[#allocation9 + $0x1c4] ss:$8 sps:$4 sm:$0xff]  }
 0x648   :  { %v8816_v9 = vadd.f32 %v8797_v23, %v8765_v12  ;;  %v8815_v0 = vadd.f32 %v8793_v13, %v8764_v53  ;;  %v8715_v37 = vpop.f32.mrb[23].mxu1  ;;  %v12089_v23 = vld [vmem:[#allocation9 + $0x1d4] ss:$8 sps:$4 sm:$0xff]   ;;  %v12087_v13 = vld [vmem:[#allocation9 + $0x1d0] ss:$8 sps:$4 sm:$0xff]  }
 0x649   :  { %v8822_v21 = vmax.f32 %v8814_v40, 0.0  ;;  %v8817_v42 = vadd.f32 %v8801_v39, %v8766_v10  ;;  %v12090_v24 = vld [vmem:[#allocation9 + $0x1e0] ss:$8 sps:$4 sm:$0xff]   ;;  %v12095_v38 = vld [vmem:[#allocation9 + $0x1f4] ss:$8 sps:$4 sm:$0xff]  }
 0x64a   :  { %v8824_v52 = vmax.f32 %v8816_v9, 0.0  ;;  %v8823_v44 = vmax.f32 %v8815_v0, 0.0  ;;  %v12093_v57 = vld [vmem:[#allocation9 + $0x1f0] ss:$8 sps:$4 sm:$0xff]   ;;  %v12114_v53 = vld [vmem:[#allocation12 + $0x60] ss:$8 sps:$4 sm:$0xff]  }
 0x64b   :  { %v8826_v46 = vmax.f32 %v8818_v36, %v8822_v21  ;;  %v8825_v47 = vmax.f32 %v8817_v42, 0.0  ;;  %v12116_v12 = vld [vmem:[#allocation12 + $0x64] ss:$8 sps:$4 sm:$0xff]   ;;  %v12119_v7 = vld [vmem:[#allocation12 + $0x74] ss:$8 sps:$4 sm:$0xff]  }
 0x64c   :  { %v12760_v22 = vmax.f32 %v8820_v1, %v8824_v52  ;;  %v8827_v49 = vmax.f32 %v8819_v43, %v8823_v44  ;;  %9453 = vmatprep.subr.bf16.mxu1 %v12116_v12  ;;  %v12117_v25 = vld [vmem:[#allocation12 + $0x70] ss:$8 sps:$4 sm:$0xff]   ;;  %v9300_v40 = vld [vmem:[#allocation10] ss:$2 sm:$0x3] }
 0x64d   :  { %v8829_v58 = vmax.f32 %v8821_v45, %v8825_v47  ;;  %v8830_v59 = vpack.c.bf16 %v8826_v46, %v8826_v46  ;;  %9454 = vmatpush1.bf16.msra.mxu1 %v12114_v53  ;;  %v9315_v10 = vld [vmem:[#allocation10 + $0x1] ss:$2 sm:$0x3]  ;;  %v9305_v41 = vrot.slane %v9300_v40, %v12590_v5  ;;  %v9309_v48 = vrot.slane %v9300_v40, %v12595_v8 }
 0x64e   :  { %v8831_v54 = vpack.c.bf16 %v8827_v49, %v8827_v49  ;;  %v8832_v39 = vpack.c.bf16 %v12760_v22, %v12760_v22  ;;  %9455 = vmatprep.subr.bf16.mxu1 %v12119_v7  ;;  %v9320_v9 = vrot.slane %v9315_v10, %v12590_v5  ;;  %v9324_v37 = vrot.slane %v9315_v10, %v12595_v8  ;;  %v9349_v49 = vld [vmem:[#allocation13] sm:$0x3] }
 0x64f   :  { %v8833_v60 = vpack.c.bf16 %v8829_v58, %v8829_v58  ;;  %v9354_v58 = vrot.slane %v9349_v49, %v12590_v5 }
 0x650   :  { %9250 = vmatprep.mubr.bf16.mxu0 %v8831_v54  ;;  %v9358_v54 = vrot.slane %v9349_v49, %v12595_v8 }
 0x651   :  { %9251 = vmatmul.mubr.bf16.vlgmr.msra.gmra.mrb[20].mxu0 %v8830_v59  ;;  %9456 = vmatpush1.bf16.msra.mxu1 %v12117_v25 }
 0x652   :  { %9260 = vmatpush1.bf16.msra.mxu0 %v12048_v55  ;;  %9291 = vmatprep.mubr.bf16.mxu0 %v8833_v60 }
 0x653   :  { %9261 = vmatprep.subr.bf16.mxu0 %v12053_v19 }
 0x656   :  { %9262 = vmatpush1.bf16.msra.mxu0 %v12051_v14 }
 0x657   :  { %9263 = vmatprep.subr.bf16.mxu0 %v12056_v61 }
 0x65a   :  { %9264 = vmatpush1.bf16.msra.mxu0 %v12054_v62 }
 0x65b   :  { %9265 = vmatprep.subr.bf16.mxu0 %v12059_v63 }
 0x65e   :  { %9266 = vmatpush1.bf16.msra.mxu0 %v12057_v2 }
 0x65f   :  { %9267 = vmatprep.subr.bf16.mxu0 %v12062_v3 }
 0x662   :  { %9268 = vmatpush1.bf16.msra.mxu0 %v12060_v4 }
 0x663   :  { %9269 = vmatprep.subr.bf16.mxu0 %v12065_v16 }
 0x666   :  { %9270 = vmatpush1.bf16.msra.mxu0 %v12063_v18 }
 0x667   :  { %9271 = vmatprep.subr.bf16.mxu0 %v12068_v20 }
 0x66a   :  { %9272 = vmatpush1.bf16.msra.mxu0 %v12066_v26 }
 0x66b   :  { %9273 = vmatprep.subr.bf16.mxu0 %v12071_v32 }
 0x66e   :  { %9274 = vmatpush1.bf16.msra.mxu0 %v12069_v27 }
 0x66f   :  { %9275 = vmatprep.subr.bf16.mxu0 %v12074_v29 }
 0x672   :  { %9276 = vmatpush1.bf16.msra.mxu0 %v12072_v6 }
 0x673   :  { %9277 = vmatprep.subr.bf16.mxu0 %v12077_v30 }
 0x676   :  { %9278 = vmatpush1.bf16.msra.mxu0 %v12075_v31 }
 0x677   :  { %9279 = vmatprep.subr.bf16.mxu0 %v12080_v15 }
 0x67a   :  { %9280 = vmatpush1.bf16.msra.mxu0 %v12078_v34 }
 0x67b   :  { %9281 = vmatprep.subr.bf16.mxu0 %v12083_v33 }
 0x67e   :  { %9282 = vmatpush1.bf16.msra.mxu0 %v12081_v28 }
 0x67f   :  { %9283 = vmatprep.subr.bf16.mxu0 %v12086_v17 }
 0x682   :  { %9284 = vmatpush1.bf16.msra.mxu0 %v12084_v56 }
 0x683   :  { %9285 = vmatprep.subr.bf16.mxu0 %v12089_v23 }
 0x686   :  { %9286 = vmatpush1.bf16.msra.mxu0 %v12087_v13 }
 0x687   :  { %9287 = vmatprep.subr.bf16.mxu0 %v12092_v11 }
 0x68a   :  { %9288 = vmatpush1.bf16.msra.mxu0 %v12090_v24 }
 0x68b   :  { %9289 = vmatprep.subr.bf16.mxu0 %v12095_v38 }
 0x68e   :  { %9290 = vmatpush1.bf16.msra.mxu0 %v12093_v57 }
 0x691   :  { %9292 = vmatmul.mubr.bf16.vlgmr.msra.gmra.mrb[20].mxu0 %v8832_v39 }
 0x764   :  { %v9293_v0 = vpop.f32.mrb[20].mxu0 }
 0x765   :  { %v9312_v36 = vmul.f32 %v9305_v41, %v9293_v0  ;;  %v9295_v21 = vpop.f32.mrb[21].mxu0 }
 0x766   :  { %v9313_v42 = vmul.f32 %v9309_v48, %v9295_v21  ;;  %v9297_v1 = vpop.f32.mrb[22].mxu0 }
 0x767   :  { %v9327_v43 = vadd.f32 %v9320_v9, %v9312_v36  ;;  %v9298_v52 = vpop.f32.mrb[23].mxu0 }
 0x768   :  { %v9328_v44 = vadd.f32 %v9324_v37, %v9313_v42 }
 0x769   :  { %v9329_v45 = vmax.f32 %v9327_v43, 0.0 }
 0x76a   :  { %v9330_v46 = vmax.f32 %v9328_v44, 0.0 }
 0x76c   :  { %v9331_v47 = vmax.f32 %v9329_v45, %v9330_v46 }
 0x76e   :  { %v9332_v22 = vpack.c.bf16 %v9331_v47, %v9331_v47 }
 0x770   :  { %9474 = vmatmul.mubr.bf16.vlgmr.msra.gmra.mrb[24].mxu1 %v9332_v22 }
 0x843   :  { %v9475_v55 = vpop.f32.mrb[24].mxu1 }
 0x844   :  { %v9476_v59 = vadd.f32 %v9475_v55, %v9354_v58  ;;  %v9477_v19 = vpop.f32.mrb[25].mxu1 }
 0x845   :  { %v9478_v60 = vadd.f32 %v9477_v19, %v9358_v54  ;;  %v9479_v14 = vpop.f32.mrb[26].mxu1 }
 0x846   :  { %v9482_v61 = vmax.f32 %v9476_v59, 0.0  ;;  %v9480_v62 = vpop.f32.mrb[27].mxu1 }
 0x847   :  { %v9483_v63 = vmax.f32 %v9478_v60, 0.0 }
 0x848   :  { %9484 = vst [vmem:[%s12785_s9] sm:$0xff] %v9482_v61 }
 0x849   :  { %9485 = vst [vmem:[%s12785_s9 + $0x8] sm:$0xff] %v9483_v63 }
 0x84a   :  { %9490 = vsyncpa [#allocation3], 1 }
 0x84b   :  { %9491 = vsyncpa [#allocation5], 1 }
 0x84c   :  { %9492 = vsyncpa [#allocation8], 1 }
 0x84d   :  { %9493 = vsyncpa [#allocation11], 1 }
 0x84e   :  { %9494 = vsyncpa [#allocation14], 1 }

</bundles_post_ra>
